<compile_context>
chip_gen: v7x
topology: tpu7x:2x2x1
jax: 0.10.0
libtpu: 0.0.40
codegen_flags: <defaults>
</compile_context>

<pallas_src>
from functools import partial

import jax
import jax.numpy as jnp
from jax.experimental import pallas as pl
from jax.experimental.pallas import tpu as pltpu


# --------------------------- weight preparation -----------------------------

def _band_weight(w_oihw, bn_scale, in_len, in_offset, w_out, stride):
    """(3, in_len*Cin, w_out*Cout) banded matrices, one per kernel row dy.

    Row index  = w * Cin + c   (flat input row, w-major / channel-minor;
                                `in_offset` = how many W-pad columns precede
                                index 0 in padded coordinates)
    Col index  = j * Cout + o  (flat output row, no W-pad columns)
    Entry      = conv_weight[o, c, dy, dx] * bn_scale[o]
                 where (w + in_offset) == stride * j + dx.
    Contributions from W-pad input columns are dropped (they multiply zeros).
    """
    cout, cin, _, _ = w_oihw.shape
    w_idx = jnp.arange(in_len)[:, None, None] + in_offset
    j_idx = jnp.arange(w_out)[None, :, None]
    dx_idx = jnp.arange(3)[None, None, :]
    sel = (w_idx == stride * j_idx + dx_idx).astype(jnp.float32)   # (W, J, 3)
    w_scaled = w_oihw * bn_scale[:, None, None, None]              # (O, C, 3, 3)
    band = jnp.einsum("wjd,ocyd->ywcjo", sel, w_scaled)
    return band.reshape(3, in_len * cin, w_out * cout)


def prepare_inference_params(params, height, width):
    """Fold BN + avgpool into kernel-ready weights (done once, eagerly)."""
    assert height == width and height % 4 == 0, "kernel assumes square H=W, H%4==0"
    H1, H2, H3 = height, height // 2, height // 4
    cin = params["conv1_w"].shape[1]
    ncls = params["fc1_w"].shape[0]

    def fold_bn(i):
        scale = params[f"bn{i}_gamma"] * jax.lax.rsqrt(params[f"bn{i}_var"] + 1e-5)
        shift = params[f"bn{i}_beta"] - params[f"bn{i}_mean"] * scale
        return scale, shift

    sc1, sh1 = fold_bn(1)
    sc2, sh2 = fold_bn(2)
    sc3, sh3 = fold_bn(3)

    # conv1: input is the zero-padded raw row (padded coords), output has no
    # W-pad columns; the 3 dy taps are stacked along K (matches the wrapper's
    # per-output-row im2col).
    b1 = _band_weight(params["conv1_w"], sc1, in_len=height + 2, in_offset=0,
                      w_out=H1, stride=1)
    b1 = b1.reshape(3 * (height + 2) * cin, H1 * 64)        # (108, 1024) for H=16
    # conv2/conv3: inputs are the pruned (no W-pad) activation rows.
    b2 = _band_weight(params["conv2_w"], sc2, in_len=H1, in_offset=1,
                      w_out=H2, stride=2)                   # (3, 1024, 512)
    b3 = _band_weight(params["conv3_w"], sc3, in_len=H2, in_offset=1,
                      w_out=H3, stride=2)                   # (3, 512, 256)

    # Global average pool folded into fc1; class dim padded to 128 lanes so
    # the per-tile output store is lane-dense (wrapper slices the pad off).
    ncp = max(128, ((ncls + 127) // 128) * 128)
    wh = jnp.tile(params["fc1_w"].T, (H3, 1)) / float(H3 * H3)     # (H3*64, ncls)
    wh = jnp.zeros((H3 * 64, ncp), jnp.float32).at[:, :ncls].set(wh)
    bh = jnp.zeros((1, ncp), jnp.float32).at[0, :ncls].set(params["fc1_b"])

    prep = {
        # banded conv weights in bf16 (MXU native rate, half the DMA bytes)
        "b1": b1.astype(jnp.bfloat16),
        "b2": b2.astype(jnp.bfloat16),
        "b3": b3.astype(jnp.bfloat16),
        # folded-BN shifts broadcast over the flat output row (f32 epilogue)
        "s1": jnp.tile(sh1, (H1,)).reshape(1, -1),
        "s2": jnp.tile(sh2, (H2,)).reshape(1, -1),
        "s3": jnp.tile(sh3, (H3,)).reshape(1, -1),
        "wh": wh,
        "bh": bh,
        "ncls": int(ncls),
    }
    return prep


# ------------------------------ fused kernel --------------------------------

def _forward_pallas(xcat, b1, b2, b3, s1, s2, s3, wh, bh, *, batch_tile):
    B = int(batch_tile)
    T = xcat.shape[0]
    half = xcat.shape[2] // B                 # H/2 conv1 rows per parity group
    H1 = 2 * half
    H2, H3 = H1 // 2, H1 // 4
    G1, G2 = H2 + 1, H3 + 1                   # padded-row pairs in act1/act2
    K1 = xcat.shape[3]                        # 3 * (W+2) * Cin
    R1, R2, R3 = b1.shape[1], b2.shape[2], b3.shape[2]
    NCP = wh.shape[1]
    f32, bf16 = jnp.float32, jnp.bfloat16

    def kernel(x_ref, b1_ref, b2_ref, b3_ref, s1_ref, s2_ref, s3_ref,
               wh_ref, bh_ref, o_ref, act1_ref, act2_ref):
        # Padded row 0 of each activation must be zero (the dy=0 tap of the
        # next conv reads it).  Scratch persists across grid steps, so zero
        # it unconditionally every step (never gate on program_id: under
        # megacore the second core never sees step 0).
        act1_ref[0, 0:B, :] = jnp.zeros((B, R1), bf16)
        act2_ref[0, 0:B, :] = jnp.zeros((B, R2), bf16)

        # ---- conv1 + bn1 + relu (stride 1) --------------------------------
        # The 3 dy taps are pre-concatenated along K in the wrapper, so each
        # output-row-parity group is a single (half*B, K1) @ (K1, R1) matmul.
        s1v = s1_ref[...]
        b1v = b1_ref[...]
        for t in range(2):                                # output rows h=2r+t
            a = x_ref[0, t]                               # (half*B, K1) bf16
            y = jnp.dot(a, b1v, preferred_element_type=f32)
            y = jnp.maximum(y + s1v, 0.0).astype(bf16)
            # output row h -> padded row h+1: parity (t+1)%2, pair index r+t
            # -> one contiguous (half*B, R1) store.
            act1_ref[(t + 1) % 2, t * B:(t + half) * B, :] = y

        def band_conv(act_ref, b_ref, rows):
            # sum_dy A_dy @ B_dy  (bf16 MXU, f32 accumulate); each tap is a
            # contiguous (rows*B, R) block thanks to the parity-pair layout.
            acc = None
            for dy in range(3):
                a = act_ref[dy % 2, (dy // 2) * B:(dy // 2 + rows) * B, :]
                y = jnp.dot(a, b_ref[dy], preferred_element_type=f32)
                acc = y if acc is None else acc + y
            return acc

        # ---- conv2 + bn2 + relu (stride 2) --------------------------------
        y2 = jnp.maximum(band_conv(act1_ref, b2_ref, H2) + s2_ref[...], 0.0)
        y2 = y2.astype(bf16)                               # (H2*B, R2)
        for j in range(H2):      # output row j -> padded act2 row j+1
            g = (j + 1) // 2
            act2_ref[(j + 1) % 2, g * B:(g + 1) * B, :] = y2[j * B:(j + 1) * B, :]

        # ---- conv3 + bn3 + relu (stride 2) --------------------------------
        y3 = jnp.maximum(band_conv(act2_ref, b3_ref, H3) + s3_ref[...], 0.0)

        # ---- global average pool (folded into wh) + fc1 -------------------
        pooled = y3[0:B, :]
        for k in range(1, H3):
            pooled = pooled + y3[k * B:(k + 1) * B, :]
        logits = jnp.dot(pooled, wh_ref[...], preferred_element_type=f32)
        o_ref[0] = logits + bh_ref[...]
        # nn.Dropout(p=0.2) is identity at inference; nn.MaxPool2d is defined
        # in the module but never used in forward().

    def const_spec(a):
        nd = a.ndim
        return pl.BlockSpec(a.shape, lambda i, nd=nd: (0,) * nd)

    grid_spec = pltpu.PrefetchScalarGridSpec(
        num_scalar_prefetch=0,
        grid=(T,),
        in_specs=[
            pl.BlockSpec((1, 2, half * B, K1), lambda i: (i, 0, 0, 0)),  # input
            const_spec(b1), const_spec(b2), const_spec(b3),              # banded W
            const_spec(s1), const_spec(s2), const_spec(s3),              # BN shifts
            const_spec(wh), const_spec(bh),                              # fused head
        ],
        out_specs=pl.BlockSpec((1, B, NCP), lambda i: (i, 0, 0)),
        scratch_shapes=[pltpu.VMEM((2, G1 * B, R1), bf16),
                        pltpu.VMEM((2, G2 * B, R2), bf16)],
    )

    Np = T * B
    flops = 2 * Np * (H1 * K1 * R1 + 3 * H2 * R1 * R2 + 3 * H3 * R2 * R3
                      + R3 * NCP)
    bytes_accessed = sum(int(a.size) * a.dtype.itemsize
                         for a in (b1, b2, b3, s1, s2, s3, wh, bh))
    bytes_accessed += int(xcat.size) * xcat.dtype.itemsize + Np * NCP * 4

    out = pl.pallas_call(
        kernel,
        out_shape=jax.ShapeDtypeStruct((T, B, NCP), jnp.float32),
        grid_spec=grid_spec,
        compiler_params=pltpu.CompilerParams(
            dimension_semantics=("parallel",)),
        cost_estimate=pl.CostEstimate(flops=int(flops), transcendentals=0,
                                      bytes_accessed=int(bytes_accessed)),
    )(xcat, b1, b2, b3, s1, s2, s3, wh, bh)
    return out


def baseline_forward(prep, x_nchw, batch_tile=None):
    """NCHW input (PyTorch convention) -> logits (N, n_classes)."""
    N, cin, H, W = x_nchw.shape
    ncls = prep["ncls"]
    B = int(batch_tile) if batch_tile else min(N, 32)   # batch tile along M
    T = -(-N // B)
    Np = T * B
    if Np != N:
        x_nchw = jnp.pad(x_nchw, ((0, Np - N), (0, 0), (0, 0), (0, 0)))

    # NCHW -> zero-padded NHWC -> flat padded rows (w-major, channel-minor).
    xh = jnp.transpose(x_nchw, (0, 2, 3, 1))
    xh = jnp.pad(xh, ((0, 0), (1, 1), (1, 1), (0, 0)))
    xr = xh.reshape(Np, H + 2, (W + 2) * cin)
    # Per-output-row im2col over the 3 kernel rows (dy taps concatenated on K).
    xcat = jnp.concatenate([xr[:, 0:H], xr[:, 1:H + 1], xr[:, 2:H + 2]], axis=-1)
    half = H // 2
    # Group output rows by parity (h = 2r + t) and stack the batch tile along
    # the matmul M dimension: final layout (tile, t, r*B + b, 3*K0).
    xcat = xcat.reshape(T, B, half, 2, 3 * (W + 2) * cin)
    xcat = jnp.transpose(xcat, (0, 3, 2, 1, 4))
    xcat = xcat.reshape(T, 2, half * B, 3 * (W + 2) * cin).astype(jnp.bfloat16)

    out = _forward_pallas(xcat, prep["b1"], prep["b2"], prep["b3"],
                          prep["s1"], prep["s2"], prep["s3"],
                          prep["wh"], prep["bh"], batch_tile=B)
    return out.reshape(Np, -1)[:N, :ncls]


# --------------------------- deterministic params ---------------------------

def init_params(key, input_channels=2, n_classes=2):
    ks = jax.random.split(key, 8)

    def conv_w(k, cout, cin):
        fan_in = cin * 9
        return jax.random.normal(k, (cout, cin, 3, 3), jnp.float32) / jnp.sqrt(
            jnp.float32(fan_in))

    params = {
        "conv1_w": conv_w(ks[0], 64, input_channels),
        "conv2_w": conv_w(ks[1], 64, 64),
        "conv3_w": conv_w(ks[2], 64, 64),
        "fc1_w": jax.random.normal(ks[3], (n_classes, 64), jnp.float32) * 0.125,
        "fc1_b": jax.random.normal(ks[4], (n_classes,), jnp.float32) * 0.01,
    }
    for i, k in zip((1, 2, 3), (ks[5], ks[6], ks[7])):
        kk = jax.random.split(k, 4)
        params[f"bn{i}_gamma"] = 1.0 + 0.1 * jax.random.normal(kk[0], (64,), jnp.float32)
        params[f"bn{i}_beta"] = 0.1 * jax.random.normal(kk[1], (64,), jnp.float32)
        params[f"bn{i}_mean"] = 0.05 * jax.random.normal(kk[2], (64,), jnp.float32)
        params[f"bn{i}_var"] = 1.0 + 0.1 * jnp.abs(
            jax.random.normal(kk[3], (64,), jnp.float32))
    return params


# ---------------------------------- main -------------------------------------

if __name__ == "__main__":
    key = jax.random.PRNGKey(0)
    pkey, xkey = jax.random.split(key)
    params = init_params(pkey, input_channels=2, n_classes=2)

    # NCHW input, matching the PyTorch module's expectation.
    x = jax.random.normal(xkey, (2, 2, 16, 16), jnp.float32)

    prep = prepare_inference_params(params, height=16, width=16)  # once, eager
    fwd = jax.jit(partial(baseline_forward, prep))
    out = fwd(x)
    jax.block_until_ready(out)

    assert out.shape == (2, 2) and out.dtype == jnp.float32
    print("KERNEL_OK")
</pallas_src>

<mosaic_0001>
module attributes {stable_mosaic.version = 11 : i64} {
  func.func @kernel(%arg0: i32, %arg1: memref<1x2x16x108xbf16, #tpu.memory_space<vmem>>, %arg2: memref<108x1024xbf16, #tpu.memory_space<vmem>>, %arg3: memref<3x1024x512xbf16, #tpu.memory_space<vmem>>, %arg4: memref<3x512x256xbf16, #tpu.memory_space<vmem>>, %arg5: memref<1x1024xf32, #tpu.memory_space<vmem>>, %arg6: memref<1x512xf32, #tpu.memory_space<vmem>>, %arg7: memref<1x256xf32, #tpu.memory_space<vmem>>, %arg8: memref<256x128xf32, #tpu.memory_space<vmem>>, %arg9: memref<1x128xf32, #tpu.memory_space<vmem>>, %arg10: memref<1x2x128xf32, #tpu.memory_space<vmem>>, %arg11: memref<2x18x1024xbf16, #tpu.memory_space<vmem>>, %arg12: memref<2x10x512xbf16, #tpu.memory_space<vmem>>) attributes {dimension_semantics = [#tpu.dimension_semantics<parallel>], iteration_bounds = array<i64: 1>, scalar_prefetch = 0 : i64, scratch_operands = 2 : i64, tpu.core_type = #tpu.core_type<tc>, window_params = [{transform_indices = @transform_0, window_bounds = array<i64: 1, 2, 16, 108>}, {pipeline_mode = #tpu.pipeline_mode<synchronous>, transform_indices = @transform_1, window_bounds = array<i64: 108, 1024>}, {pipeline_mode = #tpu.pipeline_mode<synchronous>, transform_indices = @transform_2, window_bounds = array<i64: 3, 1024, 512>}, {pipeline_mode = #tpu.pipeline_mode<synchronous>, transform_indices = @transform_3, window_bounds = array<i64: 3, 512, 256>}, {pipeline_mode = #tpu.pipeline_mode<synchronous>, transform_indices = @transform_4, window_bounds = array<i64: 1, 1024>}, {pipeline_mode = #tpu.pipeline_mode<synchronous>, transform_indices = @transform_5, window_bounds = array<i64: 1, 512>}, {pipeline_mode = #tpu.pipeline_mode<synchronous>, transform_indices = @transform_6, window_bounds = array<i64: 1, 256>}, {pipeline_mode = #tpu.pipeline_mode<synchronous>, transform_indices = @transform_7, window_bounds = array<i64: 256, 128>}, {pipeline_mode = #tpu.pipeline_mode<synchronous>, transform_indices = @transform_8, window_bounds = array<i64: 1, 128>}, {transform_indices = @transform_9, window_bounds = array<i64: 1, 2, 128>}]} {
    %cst = arith.constant 0.000000e+00 : bf16
    %0 = vector.broadcast %cst : bf16 to vector<2x1024xbf16>
    %c0 = arith.constant 0 : index
    %c0_0 = arith.constant 0 : index
    %c0_1 = arith.constant 0 : index
    %1 = vector.load %arg11[%c0, %c0_0, %c0_1] : memref<2x18x1024xbf16, #tpu.memory_space<vmem>>, vector<1x2x1024xbf16>
    %2 = vector.shape_cast %1 : vector<1x2x1024xbf16> to vector<2x1024xbf16>
    %3 = vector.shape_cast %0 : vector<2x1024xbf16> to vector<1x2x1024xbf16>
    tpu.vector_store %arg11[%c0, %c0_0, %c0_1], %3 {strides = array<i32>} : memref<2x18x1024xbf16, #tpu.memory_space<vmem>>, vector<1x2x1024xbf16>,
    %cst_2 = arith.constant 0.000000e+00 : bf16
    %4 = vector.broadcast %cst_2 : bf16 to vector<2x512xbf16>
    %c0_3 = arith.constant 0 : index
    %c0_4 = arith.constant 0 : index
    %c0_5 = arith.constant 0 : index
    %5 = vector.load %arg12[%c0_3, %c0_4, %c0_5] : memref<2x10x512xbf16, #tpu.memory_space<vmem>>, vector<1x2x512xbf16>
    %6 = vector.shape_cast %5 : vector<1x2x512xbf16> to vector<2x512xbf16>
    %7 = vector.shape_cast %4 : vector<2x512xbf16> to vector<1x2x512xbf16>
    tpu.vector_store %arg12[%c0_3, %c0_4, %c0_5], %7 {strides = array<i32>} : memref<2x10x512xbf16, #tpu.memory_space<vmem>>, vector<1x2x512xbf16>,
    %c0_6 = arith.constant 0 : index
    %c0_7 = arith.constant 0 : index
    %8 = vector.load %arg5[%c0_6, %c0_7] : memref<1x1024xf32, #tpu.memory_space<vmem>>, vector<1x1024xf32>
    %c0_8 = arith.constant 0 : index
    %c0_9 = arith.constant 0 : index
    %9 = vector.load %arg2[%c0_8, %c0_9] : memref<108x1024xbf16, #tpu.memory_space<vmem>>, vector<108x1024xbf16>
    %c0_10 = arith.constant 0 : index
    %c0_11 = arith.constant 0 : index
    %c0_12 = arith.constant 0 : index
    %c0_13 = arith.constant 0 : index
    %10 = vector.load %arg1[%c0_10, %c0_11, %c0_12, %c0_13] : memref<1x2x16x108xbf16, #tpu.memory_space<vmem>>, vector<1x1x16x108xbf16>
    %11 = vector.shape_cast %10 : vector<1x1x16x108xbf16> to vector<16x108xbf16>
    %cst_14 = arith.constant dense<0.000000e+00> : vector<16x1024xf32>
    %12 = tpu.matmul %11, %9, %cst_14 {dimension_numbers = #tpu.dot_dimension_numbers<[1], [0], [0], [1], [0, 0, 1, 1], [], []>} : vector<16x108xbf16>, vector<108x1024xbf16>, vector<16x1024xf32> -> vector<16x1024xf32>
    %13 = vector.broadcast %8 : vector<1x1024xf32> to vector<16x1024xf32>
    %14 = arith.addf %12, %13 : vector<16x1024xf32>
    %cst_15 = arith.constant 0.000000e+00 : f32
    %15 = vector.broadcast %cst_15 : f32 to vector<16x1024xf32>
    %16 = arith.maximumf %14, %15 : vector<16x1024xf32>
    %17 = arith.truncf %16 : vector<16x1024xf32> to vector<16x1024xbf16>
    %c1 = arith.constant 1 : index
    %c0_16 = arith.constant 0 : index
    %c0_17 = arith.constant 0 : index
    %18 = vector.load %arg11[%c1, %c0_16, %c0_17] : memref<2x18x1024xbf16, #tpu.memory_space<vmem>>, vector<1x16x1024xbf16>
    %19 = vector.shape_cast %18 : vector<1x16x1024xbf16> to vector<16x1024xbf16>
    %20 = vector.shape_cast %17 : vector<16x1024xbf16> to vector<1x16x1024xbf16>
    tpu.vector_store %arg11[%c1, %c0_16, %c0_17], %20 {strides = array<i32>} : memref<2x18x1024xbf16, #tpu.memory_space<vmem>>, vector<1x16x1024xbf16>,
    %c0_18 = arith.constant 0 : index
    %c1_19 = arith.constant 1 : index
    %c0_20 = arith.constant 0 : index
    %c0_21 = arith.constant 0 : index
    %21 = vector.load %arg1[%c0_18, %c1_19, %c0_20, %c0_21] : memref<1x2x16x108xbf16, #tpu.memory_space<vmem>>, vector<1x1x16x108xbf16>
    %22 = vector.shape_cast %21 : vector<1x1x16x108xbf16> to vector<16x108xbf16>
    %cst_22 = arith.constant dense<0.000000e+00> : vector<16x1024xf32>
    %23 = tpu.matmul %22, %9, %cst_22 {dimension_numbers = #tpu.dot_dimension_numbers<[1], [0], [0], [1], [0, 0, 1, 1], [], []>} : vector<16x108xbf16>, vector<108x1024xbf16>, vector<16x1024xf32> -> vector<16x1024xf32>
    %24 = vector.broadcast %8 : vector<1x1024xf32> to vector<16x1024xf32>
    %25 = arith.addf %23, %24 : vector<16x1024xf32>
    %cst_23 = arith.constant 0.000000e+00 : f32
    %26 = vector.broadcast %cst_23 : f32 to vector<16x1024xf32>
    %27 = arith.maximumf %25, %26 : vector<16x1024xf32>
    %28 = arith.truncf %27 : vector<16x1024xf32> to vector<16x1024xbf16>
    %c0_24 = arith.constant 0 : index
    %c2 = arith.constant 2 : index
    %c0_25 = arith.constant 0 : index
    %29 = vector.load %arg11[%c0_24, %c2, %c0_25] : memref<2x18x1024xbf16, #tpu.memory_space<vmem>>, vector<1x16x1024xbf16>
    %30 = vector.shape_cast %29 : vector<1x16x1024xbf16> to vector<16x1024xbf16>
    %31 = vector.shape_cast %28 : vector<16x1024xbf16> to vector<1x16x1024xbf16>
    tpu.vector_store %arg11[%c0_24, %c2, %c0_25], %31 {strides = array<i32>} : memref<2x18x1024xbf16, #tpu.memory_space<vmem>>, vector<1x16x1024xbf16>,
    %c0_26 = arith.constant 0 : index
    %c0_27 = arith.constant 0 : index
    %c0_28 = arith.constant 0 : index
    %32 = vector.load %arg11[%c0_26, %c0_27, %c0_28] : memref<2x18x1024xbf16, #tpu.memory_space<vmem>>, vector<1x16x1024xbf16>
    %33 = vector.shape_cast %32 : vector<1x16x1024xbf16> to vector<16x1024xbf16>
    %c0_29 = arith.constant 0 : index
    %c0_30 = arith.constant 0 : index
    %c0_31 = arith.constant 0 : index
    %34 = vector.load %arg3[%c0_29, %c0_30, %c0_31] : memref<3x1024x512xbf16, #tpu.memory_space<vmem>>, vector<1x1024x512xbf16>
    %35 = vector.shape_cast %34 : vector<1x1024x512xbf16> to vector<1024x512xbf16>
    %cst_32 = arith.constant dense<0.000000e+00> : vector<16x512xf32>
    %36 = tpu.matmul %33, %35, %cst_32 {dimension_numbers = #tpu.dot_dimension_numbers<[1], [0], [0], [1], [0, 0, 1, 1], [], []>} : vector<16x1024xbf16>, vector<1024x512xbf16>, vector<16x512xf32> -> vector<16x512xf32>
    %c1_33 = arith.constant 1 : index
    %c0_34 = arith.constant 0 : index
    %c0_35 = arith.constant 0 : index
    %37 = vector.load %arg11[%c1_33, %c0_34, %c0_35] : memref<2x18x1024xbf16, #tpu.memory_space<vmem>>, vector<1x16x1024xbf16>
    %38 = vector.shape_cast %37 : vector<1x16x1024xbf16> to vector<16x1024xbf16>
    %c1_36 = arith.constant 1 : index
    %c0_37 = arith.constant 0 : index
    %c0_38 = arith.constant 0 : index
    %39 = vector.load %arg3[%c1_36, %c0_37, %c0_38] : memref<3x1024x512xbf16, #tpu.memory_space<vmem>>, vector<1x1024x512xbf16>
    %40 = vector.shape_cast %39 : vector<1x1024x512xbf16> to vector<1024x512xbf16>
    %cst_39 = arith.constant dense<0.000000e+00> : vector<16x512xf32>
    %41 = tpu.matmul %38, %40, %cst_39 {dimension_numbers = #tpu.dot_dimension_numbers<[1], [0], [0], [1], [0, 0, 1, 1], [], []>} : vector<16x1024xbf16>, vector<1024x512xbf16>, vector<16x512xf32> -> vector<16x512xf32>
    %42 = arith.addf %36, %41 : vector<16x512xf32>
    %c0_40 = arith.constant 0 : index
    %c2_41 = arith.constant 2 : index
    %c0_42 = arith.constant 0 : index
    %43 = vector.load %arg11[%c0_40, %c2_41, %c0_42] : memref<2x18x1024xbf16, #tpu.memory_space<vmem>>, vector<1x16x1024xbf16>
    %44 = vector.shape_cast %43 : vector<1x16x1024xbf16> to vector<16x1024xbf16>
    %c2_43 = arith.constant 2 : index
    %c0_44 = arith.constant 0 : index
    %c0_45 = arith.constant 0 : index
    %45 = vector.load %arg3[%c2_43, %c0_44, %c0_45] : memref<3x1024x512xbf16, #tpu.memory_space<vmem>>, vector<1x1024x512xbf16>
    %46 = vector.shape_cast %45 : vector<1x1024x512xbf16> to vector<1024x512xbf16>
    %cst_46 = arith.constant dense<0.000000e+00> : vector<16x512xf32>
    %47 = tpu.matmul %44, %46, %cst_46 {dimension_numbers = #tpu.dot_dimension_numbers<[1], [0], [0], [1], [0, 0, 1, 1], [], []>} : vector<16x1024xbf16>, vector<1024x512xbf16>, vector<16x512xf32> -> vector<16x512xf32>
    %48 = arith.addf %42, %47 : vector<16x512xf32>
    %c0_47 = arith.constant 0 : index
    %c0_48 = arith.constant 0 : index
    %49 = vector.load %arg6[%c0_47, %c0_48] : memref<1x512xf32, #tpu.memory_space<vmem>>, vector<1x512xf32>
    %50 = vector.broadcast %49 : vector<1x512xf32> to vector<16x512xf32>
    %51 = arith.addf %48, %50 : vector<16x512xf32>
    %cst_49 = arith.constant 0.000000e+00 : f32
    %52 = vector.broadcast %cst_49 : f32 to vector<16x512xf32>
    %53 = arith.maximumf %51, %52 : vector<16x512xf32>
    %54 = arith.truncf %53 : vector<16x512xf32> to vector<16x512xbf16>
    %55 = vector.extract_strided_slice %54 {offsets = [0, 0], sizes = [2, 512], strides = [1, 1]} : vector<16x512xbf16> to vector<2x512xbf16>
    %c1_50 = arith.constant 1 : index
    %c0_51 = arith.constant 0 : index
    %c0_52 = arith.constant 0 : index
    %56 = vector.load %arg12[%c1_50, %c0_51, %c0_52] : memref<2x10x512xbf16, #tpu.memory_space<vmem>>, vector<1x2x512xbf16>
    %57 = vector.shape_cast %56 : vector<1x2x512xbf16> to vector<2x512xbf16>
    %58 = vector.shape_cast %55 : vector<2x512xbf16> to vector<1x2x512xbf16>
    tpu.vector_store %arg12[%c1_50, %c0_51, %c0_52], %58 {strides = array<i32>} : memref<2x10x512xbf16, #tpu.memory_space<vmem>>, vector<1x2x512xbf16>,
    %59 = vector.extract_strided_slice %54 {offsets = [2, 0], sizes = [2, 512], strides = [1, 1]} : vector<16x512xbf16> to vector<2x512xbf16>
    %c0_53 = arith.constant 0 : index
    %c2_54 = arith.constant 2 : index
    %c0_55 = arith.constant 0 : index
    %60 = vector.load %arg12[%c0_53, %c2_54, %c0_55] : memref<2x10x512xbf16, #tpu.memory_space<vmem>>, vector<1x2x512xbf16>
    %61 = vector.shape_cast %60 : vector<1x2x512xbf16> to vector<2x512xbf16>
    %62 = vector.shape_cast %59 : vector<2x512xbf16> to vector<1x2x512xbf16>
    tpu.vector_store %arg12[%c0_53, %c2_54, %c0_55], %62 {strides = array<i32>} : memref<2x10x512xbf16, #tpu.memory_space<vmem>>, vector<1x2x512xbf16>,
    %63 = vector.extract_strided_slice %54 {offsets = [4, 0], sizes = [2, 512], strides = [1, 1]} : vector<16x512xbf16> to vector<2x512xbf16>
    %c1_56 = arith.constant 1 : index
    %c2_57 = arith.constant 2 : index
    %c0_58 = arith.constant 0 : index
    %64 = vector.load %arg12[%c1_56, %c2_57, %c0_58] : memref<2x10x512xbf16, #tpu.memory_space<vmem>>, vector<1x2x512xbf16>
    %65 = vector.shape_cast %64 : vector<1x2x512xbf16> to vector<2x512xbf16>
    %66 = vector.shape_cast %63 : vector<2x512xbf16> to vector<1x2x512xbf16>
    tpu.vector_store %arg12[%c1_56, %c2_57, %c0_58], %66 {strides = array<i32>} : memref<2x10x512xbf16, #tpu.memory_space<vmem>>, vector<1x2x512xbf16>,
    %67 = vector.extract_strided_slice %54 {offsets = [6, 0], sizes = [2, 512], strides = [1, 1]} : vector<16x512xbf16> to vector<2x512xbf16>
    %c0_59 = arith.constant 0 : index
    %c4 = arith.constant 4 : index
    %c0_60 = arith.constant 0 : index
    %68 = vector.load %arg12[%c0_59, %c4, %c0_60] : memref<2x10x512xbf16, #tpu.memory_space<vmem>>, vector<1x2x512xbf16>
    %69 = vector.shape_cast %68 : vector<1x2x512xbf16> to vector<2x512xbf16>
    %70 = vector.shape_cast %67 : vector<2x512xbf16> to vector<1x2x512xbf16>
    tpu.vector_store %arg12[%c0_59, %c4, %c0_60], %70 {strides = array<i32>} : memref<2x10x512xbf16, #tpu.memory_space<vmem>>, vector<1x2x512xbf16>,
    %71 = vector.extract_strided_slice %54 {offsets = [8, 0], sizes = [2, 512], strides = [1, 1]} : vector<16x512xbf16> to vector<2x512xbf16>
    %c1_61 = arith.constant 1 : index
    %c4_62 = arith.constant 4 : index
    %c0_63 = arith.constant 0 : index
    %72 = vector.load %arg12[%c1_61, %c4_62, %c0_63] : memref<2x10x512xbf16, #tpu.memory_space<vmem>>, vector<1x2x512xbf16>
    %73 = vector.shape_cast %72 : vector<1x2x512xbf16> to vector<2x512xbf16>
    %74 = vector.shape_cast %71 : vector<2x512xbf16> to vector<1x2x512xbf16>
    tpu.vector_store %arg12[%c1_61, %c4_62, %c0_63], %74 {strides = array<i32>} : memref<2x10x512xbf16, #tpu.memory_space<vmem>>, vector<1x2x512xbf16>,
    %75 = vector.extract_strided_slice %54 {offsets = [10, 0], sizes = [2, 512], strides = [1, 1]} : vector<16x512xbf16> to vector<2x512xbf16>
    %c0_64 = arith.constant 0 : index
    %c6 = arith.constant 6 : index
    %c0_65 = arith.constant 0 : index
    %76 = vector.load %arg12[%c0_64, %c6, %c0_65] : memref<2x10x512xbf16, #tpu.memory_space<vmem>>, vector<1x2x512xbf16>
    %77 = vector.shape_cast %76 : vector<1x2x512xbf16> to vector<2x512xbf16>
    %78 = vector.shape_cast %75 : vector<2x512xbf16> to vector<1x2x512xbf16>
    tpu.vector_store %arg12[%c0_64, %c6, %c0_65], %78 {strides = array<i32>} : memref<2x10x512xbf16, #tpu.memory_space<vmem>>, vector<1x2x512xbf16>,
    %79 = vector.extract_strided_slice %54 {offsets = [12, 0], sizes = [2, 512], strides = [1, 1]} : vector<16x512xbf16> to vector<2x512xbf16>
    %c1_66 = arith.constant 1 : index
    %c6_67 = arith.constant 6 : index
    %c0_68 = arith.constant 0 : index
    %80 = vector.load %arg12[%c1_66, %c6_67, %c0_68] : memref<2x10x512xbf16, #tpu.memory_space<vmem>>, vector<1x2x512xbf16>
    %81 = vector.shape_cast %80 : vector<1x2x512xbf16> to vector<2x512xbf16>
    %82 = vector.shape_cast %79 : vector<2x512xbf16> to vector<1x2x512xbf16>
    tpu.vector_store %arg12[%c1_66, %c6_67, %c0_68], %82 {strides = array<i32>} : memref<2x10x512xbf16, #tpu.memory_space<vmem>>, vector<1x2x512xbf16>,
    %83 = vector.extract_strided_slice %54 {offsets = [14, 0], sizes = [2, 512], strides = [1, 1]} : vector<16x512xbf16> to vector<2x512xbf16>
    %c0_69 = arith.constant 0 : index
    %c8 = arith.constant 8 : index
    %c0_70 = arith.constant 0 : index
    %84 = vector.load %arg12[%c0_69, %c8, %c0_70] : memref<2x10x512xbf16, #tpu.memory_space<vmem>>, vector<1x2x512xbf16>
    %85 = vector.shape_cast %84 : vector<1x2x512xbf16> to vector<2x512xbf16>
    %86 = vector.shape_cast %83 : vector<2x512xbf16> to vector<1x2x512xbf16>
    tpu.vector_store %arg12[%c0_69, %c8, %c0_70], %86 {strides = array<i32>} : memref<2x10x512xbf16, #tpu.memory_space<vmem>>, vector<1x2x512xbf16>,
    %c0_71 = arith.constant 0 : index
    %c0_72 = arith.constant 0 : index
    %c0_73 = arith.constant 0 : index
    %87 = vector.load %arg12[%c0_71, %c0_72, %c0_73] : memref<2x10x512xbf16, #tpu.memory_space<vmem>>, vector<1x8x512xbf16>
    %88 = vector.shape_cast %87 : vector<1x8x512xbf16> to vector<8x512xbf16>
    %c0_74 = arith.constant 0 : index
    %c0_75 = arith.constant 0 : index
    %c0_76 = arith.constant 0 : index
    %89 = vector.load %arg4[%c0_74, %c0_75, %c0_76] : memref<3x512x256xbf16, #tpu.memory_space<vmem>>, vector<1x512x256xbf16>
    %90 = vector.shape_cast %89 : vector<1x512x256xbf16> to vector<512x256xbf16>
    %cst_77 = arith.constant dense<0.000000e+00> : vector<8x256xf32>
    %91 = tpu.matmul %88, %90, %cst_77 {dimension_numbers = #tpu.dot_dimension_numbers<[1], [0], [0], [1], [0, 0, 1, 1], [], []>} : vector<8x512xbf16>, vector<512x256xbf16>, vector<8x256xf32> -> vector<8x256xf32>
    %c1_78 = arith.constant 1 : index
    %c0_79 = arith.constant 0 : index
    %c0_80 = arith.constant 0 : index
    %92 = vector.load %arg12[%c1_78, %c0_79, %c0_80] : memref<2x10x512xbf16, #tpu.memory_space<vmem>>, vector<1x8x512xbf16>
    %93 = vector.shape_cast %92 : vector<1x8x512xbf16> to vector<8x512xbf16>
    %c1_81 = arith.constant 1 : index
    %c0_82 = arith.constant 0 : index
    %c0_83 = arith.constant 0 : index
    %94 = vector.load %arg4[%c1_81, %c0_82, %c0_83] : memref<3x512x256xbf16, #tpu.memory_space<vmem>>, vector<1x512x256xbf16>
    %95 = vector.shape_cast %94 : vector<1x512x256xbf16> to vector<512x256xbf16>
    %cst_84 = arith.constant dense<0.000000e+00> : vector<8x256xf32>
    %96 = tpu.matmul %93, %95, %cst_84 {dimension_numbers = #tpu.dot_dimension_numbers<[1], [0], [0], [1], [0, 0, 1, 1], [], []>} : vector<8x512xbf16>, vector<512x256xbf16>, vector<8x256xf32> -> vector<8x256xf32>
    %97 = arith.addf %91, %96 : vector<8x256xf32>
    %c0_85 = arith.constant 0 : index
    %c2_86 = arith.constant 2 : index
    %c0_87 = arith.constant 0 : index
    %98 = vector.load %arg12[%c0_85, %c2_86, %c0_87] : memref<2x10x512xbf16, #tpu.memory_space<vmem>>, vector<1x8x512xbf16>
    %99 = vector.shape_cast %98 : vector<1x8x512xbf16> to vector<8x512xbf16>
    %c2_88 = arith.constant 2 : index
    %c0_89 = arith.constant 0 : index
    %c0_90 = arith.constant 0 : index
    %100 = vector.load %arg4[%c2_88, %c0_89, %c0_90] : memref<3x512x256xbf16, #tpu.memory_space<vmem>>, vector<1x512x256xbf16>
    %101 = vector.shape_cast %100 : vector<1x512x256xbf16> to vector<512x256xbf16>
    %cst_91 = arith.constant dense<0.000000e+00> : vector<8x256xf32>
    %102 = tpu.matmul %99, %101, %cst_91 {dimension_numbers = #tpu.dot_dimension_numbers<[1], [0], [0], [1], [0, 0, 1, 1], [], []>} : vector<8x512xbf16>, vector<512x256xbf16>, vector<8x256xf32> -> vector<8x256xf32>
    %103 = arith.addf %97, %102 : vector<8x256xf32>
    %c0_92 = arith.constant 0 : index
    %c0_93 = arith.constant 0 : index
    %104 = vector.load %arg7[%c0_92, %c0_93] : memref<1x256xf32, #tpu.memory_space<vmem>>, vector<1x256xf32>
    %105 = vector.broadcast %104 : vector<1x256xf32> to vector<8x256xf32>
    %106 = arith.addf %103, %105 : vector<8x256xf32>
    %cst_94 = arith.constant 0.000000e+00 : f32
    %107 = vector.broadcast %cst_94 : f32 to vector<8x256xf32>
    %108 = arith.maximumf %106, %107 : vector<8x256xf32>
    %109 = vector.extract_strided_slice %108 {offsets = [0, 0], sizes = [2, 256], strides = [1, 1]} : vector<8x256xf32> to vector<2x256xf32>
    %110 = vector.extract_strided_slice %108 {offsets = [2, 0], sizes = [2, 256], strides = [1, 1]} : vector<8x256xf32> to vector<2x256xf32>
    %111 = arith.addf %109, %110 : vector<2x256xf32>
    %112 = vector.extract_strided_slice %108 {offsets = [4, 0], sizes = [2, 256], strides = [1, 1]} : vector<8x256xf32> to vector<2x256xf32>
    %113 = arith.addf %111, %112 : vector<2x256xf32>
    %114 = vector.extract_strided_slice %108 {offsets = [6, 0], sizes = [2, 256], strides = [1, 1]} : vector<8x256xf32> to vector<2x256xf32>
    %115 = arith.addf %113, %114 : vector<2x256xf32>
    %c0_95 = arith.constant 0 : index
    %c0_96 = arith.constant 0 : index
    %116 = vector.load %arg8[%c0_95, %c0_96] : memref<256x128xf32, #tpu.memory_space<vmem>>, vector<256x128xf32>
    %cst_97 = arith.constant dense<0.000000e+00> : vector<2x128xf32>
    %117 = tpu.matmul %115, %116, %cst_97 {dimension_numbers = #tpu.dot_dimension_numbers<[1], [0], [0], [1], [0, 0, 1, 1], [], []>} : vector<2x256xf32>, vector<256x128xf32>, vector<2x128xf32> -> vector<2x128xf32>
    %c0_98 = arith.constant 0 : index
    %c0_99 = arith.constant 0 : index
    %118 = vector.load %arg9[%c0_98, %c0_99] : memref<1x128xf32, #tpu.memory_space<vmem>>, vector<1x128xf32>
    %119 = vector.broadcast %118 : vector<1x128xf32> to vector<2x128xf32>
    %120 = arith.addf %117, %119 : vector<2x128xf32>
    %c0_100 = arith.constant 0 : index
    %c0_101 = arith.constant 0 : index
    %c0_102 = arith.constant 0 : index
    %121 = vector.load %arg10[%c0_100, %c0_101, %c0_102] : memref<1x2x128xf32, #tpu.memory_space<vmem>>, vector<1x2x128xf32>
    %122 = vector.shape_cast %121 : vector<1x2x128xf32> to vector<2x128xf32>
    %123 = vector.shape_cast %120 : vector<2x128xf32> to vector<1x2x128xf32>
    tpu.vector_store %arg10[%c0_100, %c0_101, %c0_102], %123 {strides = array<i32>} : memref<1x2x128xf32, #tpu.memory_space<vmem>>, vector<1x2x128xf32>,
    return
  }
  func.func @transform_0(%arg0: i32) -> (i32, i32, i32, i32) {
    %c0_i32 = arith.constant 0 : i32
    %c0_i32_0 = arith.constant 0 : i32
    %c0_i32_1 = arith.constant 0 : i32
    %c0_i32_2 = arith.constant 0 : i32
    return %arg0, %c0_i32, %c0_i32_0, %c0_i32_1 : i32, i32, i32, i32
  }
  func.func @transform_1(%arg0: i32) -> (i32, i32) {
    %c0_i32 = arith.constant 0 : i32
    %c0_i32_0 = arith.constant 0 : i32
    %c0_i32_1 = arith.constant 0 : i32
    return %c0_i32, %c0_i32_0 : i32, i32
  }
  func.func @transform_2(%arg0: i32) -> (i32, i32, i32) {
    %c0_i32 = arith.constant 0 : i32
    %c0_i32_0 = arith.constant 0 : i32
    %c0_i32_1 = arith.constant 0 : i32
    %c0_i32_2 = arith.constant 0 : i32
    return %c0_i32, %c0_i32_0, %c0_i32_1 : i32, i32, i32
  }
  func.func @transform_3(%arg0: i32) -> (i32, i32, i32) {
    %c0_i32 = arith.constant 0 : i32
    %c0_i32_0 = arith.constant 0 : i32
    %c0_i32_1 = arith.constant 0 : i32
    %c0_i32_2 = arith.constant 0 : i32
    return %c0_i32, %c0_i32_0, %c0_i32_1 : i32, i32, i32
  }
  func.func @transform_4(%arg0: i32) -> (i32, i32) {
    %c0_i32 = arith.constant 0 : i32
    %c0_i32_0 = arith.constant 0 : i32
    %c0_i32_1 = arith.constant 0 : i32
    return %c0_i32, %c0_i32_0 : i32, i32
  }
  func.func @transform_5(%arg0: i32) -> (i32, i32) {
    %c0_i32 = arith.constant 0 : i32
    %c0_i32_0 = arith.constant 0 : i32
    %c0_i32_1 = arith.constant 0 : i32
    return %c0_i32, %c0_i32_0 : i32, i32
  }
  func.func @transform_6(%arg0: i32) -> (i32, i32) {
    %c0_i32 = arith.constant 0 : i32
    %c0_i32_0 = arith.constant 0 : i32
    %c0_i32_1 = arith.constant 0 : i32
    return %c0_i32, %c0_i32_0 : i32, i32
  }
  func.func @transform_7(%arg0: i32) -> (i32, i32) {
    %c0_i32 = arith.constant 0 : i32
    %c0_i32_0 = arith.constant 0 : i32
    %c0_i32_1 = arith.constant 0 : i32
    return %c0_i32, %c0_i32_0 : i32, i32
  }
  func.func @transform_8(%arg0: i32) -> (i32, i32) {
    %c0_i32 = arith.constant 0 : i32
    %c0_i32_0 = arith.constant 0 : i32
    %c0_i32_1 = arith.constant 0 : i32
    return %c0_i32, %c0_i32_0 : i32, i32
  }
  func.func @transform_9(%arg0: i32) -> (i32, i32, i32) {
    %c0_i32 = arith.constant 0 : i32
    %c0_i32_0 = arith.constant 0 : i32
    %c0_i32_1 = arith.constant 0 : i32
    return %arg0, %c0_i32, %c0_i32_0 : i32, i32, i32
  }
}

</mosaic_0001>

<bundles_post_ra>
// kernel: baseline_forward.1
= control target key start
LH: loop header
LB: loop body
LE: loop exit
PB: predicated region body
PF: predicated region fallthrough
CT: control target
= control target key end

     0   :  { %v11953_v6 = vmov 0   ;;  %vm421_vm0 = vcmask 1045504   ;;  %vm417_vm1 = vcmask 883712   ;;  %vm930_vm2 = vcmask 1040384   ;;  %s15671_s0 = inlined_call_operand.vmem [shape: bf16[1,2,16,108], index: 0, kind: input, shape index: {}]   ;;  %s15672_s1 = inlined_call_operand.vmem [shape: bf16[108,1024], index: 1, kind: input, shape index: {}]   ;;  %s15673_s2 = inlined_call_operand.vmem [shape: bf16[3,1024,512], index: 2, kind: input, shape index: {}]   ;;  %s15674_s3 = inlined_call_operand.vmem [shape: bf16[3,512,256], index: 3, kind: input, shape index: {}]   ;;  %s15675_s4 = inlined_call_operand.vmem [shape: f32[1,1024], index: 4, kind: input, shape index: {}]   ;;  %s15676_s5 = inlined_call_operand.vmem [shape: f32[1,512], index: 5, kind: input, shape index: {}]   ;;  %s15677_s6 = inlined_call_operand.vmem [shape: f32[1,256], index: 6, kind: input, shape index: {}]   ;;  %s15678_s7 = inlined_call_operand.vmem [shape: f32[256,128], index: 7, kind: input, shape index: {}]   ;;  %s15679_s8 = inlined_call_operand.vmem [shape: f32[1,128], index: 8, kind: input, shape index: {}]   ;;  %s15680_s9 = inlined_call_operand.hbm [shape: f32[1,2,128], index: 9, kind: output, shape index: {}]  }
   0x1   :  { %v41_v0 = vld [vmem:[%s15672_s1] sm:$0xff]  ;;  %478 = vmatprep.mubr.bf16.mxu0 %v11953_v6  ;;  %34 = vst [vmem:[#allocation2] sm:$0x11] %v11953_v6  ;;  %35 = vst [vmem:[#allocation2 + $0x8] sm:$0x11] %v11953_v6  ;;  %521 = vmatprep.mubr.bf16.mxu1 %v11953_v6  ;;  %v42_v14 = vld [vmem:[%s15672_s1 + $0x8] sm:$0xff] }
   0x2   :  { %v45_v1 = vld [vmem:[%s15672_s1 + $0x20] sm:$0xff]  ;;  %36 = vst [vmem:[#allocation2 + $0x10] sm:$0x11] %v11953_v6  ;;  %37 = vst [vmem:[#allocation2 + $0x18] sm:$0x11] %v11953_v6  ;;  %v46_v15 = vld [vmem:[%s15672_s1 + $0x28] sm:$0xff] }
   0x3   :  { %v49_v2 = vld [vmem:[%s15672_s1 + $0x40] sm:$0xff]  ;;  %v12014_v3 = vcombine.high %v41_v0, %v45_v1  ;;  %v12016_v4 = vcombine.low %v41_v0, %v45_v1  ;;  %38 = vst [vmem:[#allocation3] sm:$0x11] %v11953_v6  ;;  %39 = vst [vmem:[#allocation3 + $0x8] sm:$0x11] %v11953_v6  ;;  %v50_v16 = vld [vmem:[%s15672_s1 + $0x48] sm:$0xff]  ;;  %v12062_v18 = vcombine.high %v42_v14, %v46_v15 }
   0x4   :  { %v53_v5 = vld [vmem:[%s15672_s1 + $0x60] sm:$0xff]  ;;  %v54_v17 = vld [vmem:[%s15672_s1 + $0x68] sm:$0xff]  ;;  %v12064_v19 = vcombine.low %v42_v14, %v46_v15  ;;  %v43_v50 = vld [vmem:[%s15672_s1 + $0x10] sm:$0xff]  ;;  %vm931_vm3 = vcmask 1044484  }
   0x5   :  { %v12029_v7 = vcombine.high %v49_v2, %v53_v5  ;;  %v57_v8 = vld [vmem:[%s15672_s1 + $0x80] sm:$0xff]  ;;  %446 = vmatprep.subr.bf16.mxu0 %v12014_v3  ;;  %v12039_v10 = vcombine.low %v49_v2, %v53_v5  ;;  %v12066_v20 = vcombine.high %v50_v16, %v54_v17  ;;  %v58_v22 = vld [vmem:[%s15672_s1 + $0x88] sm:$0xff]  ;;  %489 = vmatprep.subr.bf16.mxu1 %v12062_v18  ;;  %v47_v52 = vld [vmem:[%s15672_s1 + $0x30] sm:$0xff] }
   0x6   :  { %v61_v9 = vld [vmem:[%s15672_s1 + $0xa0] sm:$0xff]  ;;  %447 = vmatpush1.bf16.msra.mxu0 %v12016_v4  ;;  %v62_v23 = vld [vmem:[%s15672_s1 + $0xa8] sm:$0xff]  ;;  %490 = vmatpush1.bf16.msra.mxu1 %v12064_v19  ;;  %v12088_v27 = vcombine.low %v50_v16, %v54_v17  ;;  %v12177_v57 = vcombine.high %v43_v50, %v47_v52  ;;  %v51_v58 = vld [vmem:[%s15672_s1 + $0x50] sm:$0xff]  ;;  %v12197_v0 = vcombine.low %v43_v50, %v47_v52 }
   0x7   :  { %v65_v11 = vld [vmem:[%s15672_s1 + $0xc0] sm:$0xff]  ;;  %448 = vmatprep.subr.bf16.mxu0 %v12029_v7  ;;  %v12045_v12 = vcombine.high %v57_v8, %v61_v9  ;;  %v12069_v21 = vcombine.low %v57_v8, %v61_v9  ;;  %491 = vmatprep.subr.bf16.mxu1 %v12066_v20  ;;  %v12091_v28 = vcombine.high %v58_v22, %v62_v23  ;;  %v66_v30 = vld [vmem:[%s15672_s1 + $0xc8] sm:$0xff]  ;;  %v55_v60 = vld [vmem:[%s15672_s1 + $0x70] sm:$0xff] }
   0x8   :  { %v69_v13 = vld [vmem:[%s15672_s1 + $0xe0] sm:$0xff]  ;;  %v70_v31 = vld [vmem:[%s15672_s1 + $0xe8] sm:$0xff]  ;;  %v12112_v35 = vcombine.low %v58_v22, %v62_v23  ;;  %v44_v1 = vld [vmem:[%s15672_s1 + $0x18] sm:$0xff]  ;;  %v12206_v5 = vcombine.high %v51_v58, %v55_v60  ;;  %v12225_v14 = vcombine.low %v51_v58, %v55_v60 }
   0x9   :  { %v12078_v24 = vcombine.high %v65_v11, %v69_v13  ;;  %v73_v25 = vld [vmem:[%s15672_s1 + $0x100] sm:$0xff]  ;;  %v12094_v29 = vcombine.low %v65_v11, %v69_v13  ;;  %v12115_v36 = vcombine.high %v66_v30, %v70_v31  ;;  %v74_v38 = vld [vmem:[%s15672_s1 + $0x108] sm:$0xff]  ;;  %v12136_v43 = vcombine.low %v66_v30, %v70_v31  ;;  %v48_v2 = vld [vmem:[%s15672_s1 + $0x38] sm:$0xff] }
   0xa   :  { %449 = vmatpush1.bf16.msra.mxu0 %v12039_v10  ;;  %v77_v26 = vld [vmem:[%s15672_s1 + $0x120] sm:$0xff]  ;;  %492 = vmatpush1.bf16.msra.mxu1 %v12088_v27  ;;  %v78_v39 = vld [vmem:[%s15672_s1 + $0x128] sm:$0xff]  ;;  %v59_v8 = vld [vmem:[%s15672_s1 + $0x90] sm:$0xff]  ;;  %v12222_v13 = vcombine.high %v44_v1, %v48_v2  ;;  %v12241_v23 = vcombine.low %v44_v1, %v48_v2 }
   0xb   :  { %450 = vmatprep.subr.bf16.mxu0 %v12045_v12  ;;  %v12103_v32 = vcombine.high %v73_v25, %v77_v26  ;;  %v81_v33 = vld [vmem:[%s15672_s1 + $0x140] sm:$0xff]  ;;  %493 = vmatprep.subr.bf16.mxu1 %v12091_v28  ;;  %v12118_v37 = vcombine.low %v73_v25, %v77_v26  ;;  %v12139_v44 = vcombine.high %v74_v38, %v78_v39  ;;  %v82_v45 = vld [vmem:[%s15672_s1 + $0x148] sm:$0xff]  ;;  %v63_v9 = vld [vmem:[%s15672_s1 + $0xb0] sm:$0xff] }
   0xc   :  { %v85_v34 = vld [vmem:[%s15672_s1 + $0x160] sm:$0xff]  ;;  %v86_v47 = vld [vmem:[%s15672_s1 + $0x168] sm:$0xff]  ;;  %v12157_v51 = vcombine.low %v74_v38, %v78_v39  ;;  %v52_v15 = vld [vmem:[%s15672_s1 + $0x58] sm:$0xff]  ;;  %v12235_v17 = vcombine.high %v59_v8, %v63_v9  ;;  %v12250_v30 = vcombine.low %v59_v8, %v63_v9 }
   0xd   :  { %v12127_v40 = vcombine.high %v81_v33, %v85_v34  ;;  %v89_v41 = vld [vmem:[%s15672_s1 + $0x180] sm:$0xff]  ;;  %v12145_v46 = vcombine.low %v81_v33, %v85_v34  ;;  %v12163_v53 = vcombine.high %v82_v45, %v86_v47  ;;  %v90_v54 = vld [vmem:[%s15672_s1 + $0x188] sm:$0xff]  ;;  %v12183_v59 = vcombine.low %v82_v45, %v86_v47  ;;  %v56_v16 = vld [vmem:[%s15672_s1 + $0x78] sm:$0xff] }
   0xe   :  { %451 = vmatpush1.bf16.msra.mxu0 %v12069_v21  ;;  %v93_v42 = vld [vmem:[%s15672_s1 + $0x1a0] sm:$0x33]  ;;  %494 = vmatpush1.bf16.msra.mxu1 %v12112_v35  ;;  %v94_v55 = vld [vmem:[%s15672_s1 + $0x1a8] sm:$0x33]  ;;  %v67_v22 = vld [vmem:[%s15672_s1 + $0xd0] sm:$0xff]  ;;  %v12247_v26 = vcombine.high %v52_v15, %v56_v16  ;;  %v12267_v39 = vcombine.low %v52_v15, %v56_v16 }
   0xf   :  { %452 = vmatprep.subr.bf16.mxu0 %v12078_v24  ;;  %495 = vmatprep.subr.bf16.mxu1 %v12115_v36  ;;  %v12151_v48 = vcombine.high %v89_v41, %v93_v42  ;;  %v8586_v49 = vcombine.low %v89_v41, %v93_v42  ;;  %v12191_v61 = vld [vmem:[%s15671_s0] sm:$0xff]   ;;  %v12194_v62 = vcombine.high %v90_v54, %v94_v55  ;;  %v71_v25 = vld [vmem:[%s15672_s1 + $0xf0] sm:$0xff]  ;;  %v60_v31 = vld [vmem:[%s15672_s1 + $0x98] sm:$0xff] }
  0x10   :  { %v8588_v63 = vcombine.low %v90_v54, %v94_v55  ;;  %v64_v33 = vld [vmem:[%s15672_s1 + $0xb8] sm:$0xff]  ;;  %v12261_v34 = vcombine.high %v67_v22, %v71_v25  ;;  %v75_v38 = vld [vmem:[%s15672_s1 + $0x110] sm:$0xff]  ;;  %v12277_v45 = vcombine.low %v67_v22, %v71_v25  ;;  %vm12898_vm4 = vmor %vm930_vm2, %vm931_vm3 }
  0x11   :  { %v12175_v56 = vsel %vm421_vm0, %v8586_v49, 0  ;;  %v79_v41 = vld [vmem:[%s15672_s1 + $0x130] sm:$0xff]  ;;  %v12274_v42 = vcombine.high %v60_v31, %v64_v33  ;;  %v68_v47 = vld [vmem:[%s15672_s1 + $0xd8] sm:$0xff]  ;;  %v12292_v54 = vcombine.low %v60_v31, %v64_v33 }
  0x12   :  { %453 = vmatpush1.bf16.msra.mxu0 %v12094_v29  ;;  %496 = vmatpush1.bf16.msra.mxu1 %v12136_v43  ;;  %v12220_v11 = vsel %vm421_vm0, %v8588_v63, 0  ;;  %v72_v49 = vld [vmem:[%s15672_s1 + $0xf8] sm:$0xff]  ;;  %v12286_v50 = vcombine.high %v75_v38, %v79_v41  ;;  %v83_v52 = vld [vmem:[%s15672_s1 + $0x150] sm:$0xff]  ;;  %v12301_v60 = vcombine.low %v75_v38, %v79_v41 }
  0x13   :  { %454 = vmatprep.subr.bf16.mxu0 %v12103_v32  ;;  %497 = vmatprep.subr.bf16.mxu1 %v12139_v44  ;;  %v87_v55 = vld [vmem:[%s15672_s1 + $0x170] sm:$0xff]  ;;  %v12298_v58 = vcombine.high %v68_v47, %v72_v49  ;;  %v76_v63 = vld [vmem:[%s15672_s1 + $0x118] sm:$0xff]  ;;  %v12316_v9 = vcombine.low %v68_v47, %v72_v49 }
  0x14   :  { %v80_v1 = vld [vmem:[%s15672_s1 + $0x138] sm:$0xff]  ;;  %v12310_v2 = vcombine.high %v83_v52, %v87_v55  ;;  %v91_v8 = vld [vmem:[%s15672_s1 + $0x190] sm:$0xff]  ;;  %v12325_v22 = vcombine.low %v83_v52, %v87_v55 }
  0x15   :  { %v95_v15 = vld [vmem:[%s15672_s1 + $0x1b0] sm:$0x33]  ;;  %v12322_v16 = vcombine.high %v76_v63, %v80_v1  ;;  %v84_v25 = vld [vmem:[%s15672_s1 + $0x158] sm:$0xff]  ;;  %v12337_v41 = vcombine.low %v76_v63, %v80_v1 }
  0x16   :  { %455 = vmatpush1.bf16.msra.mxu0 %v12118_v37  ;;  %498 = vmatpush1.bf16.msra.mxu1 %v12157_v51  ;;  %v88_v31 = vld [vmem:[%s15672_s1 + $0x178] sm:$0xff]  ;;  %v12334_v33 = vcombine.high %v91_v8, %v95_v15  ;;  %v8590_v38 = vcombine.low %v91_v8, %v95_v15 }
  0x17   :  { %456 = vmatprep.subr.bf16.mxu0 %v12127_v40  ;;  %499 = vmatprep.subr.bf16.mxu1 %v12163_v53  ;;  %v92_v47 = vld [vmem:[%s15672_s1 + $0x198] sm:$0xff]  ;;  %v12346_v52 = vcombine.high %v84_v25, %v88_v31  ;;  %v12355_v63 = vcombine.low %v84_v25, %v88_v31  ;;  %v10537_v31 = vld [vmem:[%s15673_s2 + $0x9a4] ss:$16 sps:$4 sm:$0xff]  }
  0x18   :  { %v96_v49 = vld [vmem:[%s15672_s1 + $0x1b8] sm:$0x33]  ;;  %v12352_v55 = vsel %vm421_vm0, %v8590_v38, 0  ;;  %v10535_v38 = vld [vmem:[%s15673_s2 + $0x9a0] ss:$16 sps:$4 sm:$0xff]  }
  0x19   :  { %v12358_v1 = vcombine.high %v92_v47, %v96_v49  ;;  %v8592_v8 = vcombine.low %v92_v47, %v96_v49  ;;  %v10534_v25 = vld [vmem:[%s15673_s2 + $0x98c] ss:$16 sps:$4 sm:$0xff]   ;;  %v10543_v47 = vld [vmem:[%s15673_s2 + $0x9c4] ss:$16 sps:$4 sm:$0xff]   ;;  %v10538_v49 = vld [vmem:[%s15673_s2 + $0x9a8] ss:$16 sps:$4 sm:$0xff]  }
  0x1a   :  { %457 = vmatpush1.bf16.msra.mxu0 %v12145_v46  ;;  %500 = vmatpush1.bf16.msra.mxu1 %v12183_v59 }
  0x1b   :  { %8594 = vmatprep.subr.msk.bf16.mxu0 %vm421_vm0, %v12151_v48  ;;  %8596 = vmatprep.subr.msk.bf16.mxu1 %vm421_vm0, %v12194_v62  ;;  %v12366_v15 = vsel %vm421_vm0, %v8592_v8, 0  ;;  %v10547_v8 = vld [vmem:[%s15673_s2 + $0x9e0] ss:$16 sps:$4 sm:$0xff]  }
  0x1e   :  { %459 = vmatpush1.bf16.msra.mxu0 %v12175_v56  ;;  %502 = vmatpush1.bf16.msra.mxu1 %v12220_v11 }
  0x1f   :  { %532 = vmatprep.subr.bf16.mxu0 %v12177_v57  ;;  %575 = vmatprep.subr.bf16.mxu1 %v12222_v13 }
  0x21   :  { %8595 = vmatmul.mubr.msk.bf16.vlgmr.msra.gmra.mrb[0].mxu0 %vm417_vm1, %v12191_v61  ;;  %8597 = vmatmul.mubr.msk.bf16.vlgmr.msra.gmra.mrb[0].mxu1 %vm417_vm1, %v12191_v61 }
  0x22   :  { %533 = vmatpush1.bf16.msra.mxu0 %v12197_v0  ;;  %564 = vmatprep.mubr.bf16.mxu0 %v11953_v6 }
  0x23   :  { %534 = vmatprep.subr.bf16.mxu0 %v12206_v5  ;;  %576 = vmatpush1.bf16.msra.mxu1 %v12241_v23 }
  0x24   :  { %607 = vmatprep.mubr.bf16.mxu1 %v11953_v6  ;;  %577 = vmatprep.subr.bf16.mxu1 %v12247_v26 }
  0x26   :  { %535 = vmatpush1.bf16.msra.mxu0 %v12225_v14 }
  0x27   :  { %536 = vmatprep.subr.bf16.mxu0 %v12235_v17  ;;  %578 = vmatpush1.bf16.msra.mxu1 %v12267_v39 }
  0x28   :  { %579 = vmatprep.subr.bf16.mxu1 %v12274_v42 }
  0x2a   :  { %537 = vmatpush1.bf16.msra.mxu0 %v12250_v30 }
  0x2b   :  { %538 = vmatprep.subr.bf16.mxu0 %v12261_v34  ;;  %580 = vmatpush1.bf16.msra.mxu1 %v12292_v54 }
  0x2c   :  { %581 = vmatprep.subr.bf16.mxu1 %v12298_v58 }
  0x2e   :  { %539 = vmatpush1.bf16.msra.mxu0 %v12277_v45 }
  0x2f   :  { %540 = vmatprep.subr.bf16.mxu0 %v12286_v50  ;;  %582 = vmatpush1.bf16.msra.mxu1 %v12316_v9 }
  0x30   :  { %583 = vmatprep.subr.bf16.mxu1 %v12322_v16 }
  0x32   :  { %541 = vmatpush1.bf16.msra.mxu0 %v12301_v60 }
  0x33   :  { %542 = vmatprep.subr.bf16.mxu0 %v12310_v2  ;;  %584 = vmatpush1.bf16.msra.mxu1 %v12337_v41 }
  0x34   :  { %585 = vmatprep.subr.bf16.mxu1 %v12346_v52 }
  0x36   :  { %543 = vmatpush1.bf16.msra.mxu0 %v12325_v22 }
  0x37   :  { %8598 = vmatprep.subr.msk.bf16.mxu0 %vm421_vm0, %v12334_v33  ;;  %586 = vmatpush1.bf16.msra.mxu1 %v12355_v63 }
  0x38   :  { %8600 = vmatprep.subr.msk.bf16.mxu1 %vm421_vm0, %v12358_v1 }
  0x3a   :  { %545 = vmatpush1.bf16.msra.mxu0 %v12352_v55 }
  0x3b   :  { %702 = vmatprep.subr.bf16.mxu0 %v12014_v3  ;;  %588 = vmatpush1.bf16.msra.mxu1 %v12366_v15  ;;  %v10456_v3 = vld [vmem:[%s15671_s0 + $0x8] sm:$0xff]  }
  0x3c   :  { %745 = vmatprep.subr.bf16.mxu1 %v12062_v18  ;;  %v10463_v18 = vld [vmem:[%s15673_s2 + $0x820] ss:$16 sps:$4 sm:$0xff]  }
  0x3d   :  { %8599 = vmatmul.mubr.msk.bf16.vlgmr.msra.gmra.mrb[4].mxu0 %vm417_vm1, %v12191_v61 }
  0x3e   :  { %703 = vmatpush1.bf16.msra.mxu0 %v12016_v4  ;;  %734 = vmatprep.mubr.bf16.mxu0 %v11953_v6  ;;  %v10459_v4 = vld [vmem:[%s15673_s2 + $0x804] ss:$16 sps:$4 sm:$0xff]  }
  0x3f   :  { %704 = vmatprep.subr.bf16.mxu0 %v12029_v7  ;;  %8601 = vmatmul.mubr.msk.bf16.vlgmr.msra.gmra.mrb[4].mxu1 %vm417_vm1, %v12191_v61  ;;  %v10462_v7 = vld [vmem:[%s15673_s2 + $0x80c] ss:$16 sps:$4 sm:$0xff]   ;;  %v10501_v61 = vld [vmem:[%s15673_s2 + $0x8e4] ss:$16 sps:$4 sm:$0xff]  }
  0x40   :  { %746 = vmatpush1.bf16.msra.mxu1 %v12064_v19  ;;  %777 = vmatprep.mubr.bf16.mxu1 %v11953_v6  ;;  %v10468_v19 = vld [vmem:[%s15673_s2 + $0x82c] ss:$16 sps:$4 sm:$0xff]  }
  0x41   :  { %747 = vmatprep.subr.bf16.mxu1 %v12066_v20  ;;  %v10471_v20 = vld [vmem:[%s15673_s2 + $0x844] ss:$16 sps:$4 sm:$0xff]  }
  0x42   :  { %705 = vmatpush1.bf16.msra.mxu0 %v12039_v10  ;;  %v10465_v10 = vld [vmem:[%s15673_s2 + $0x824] ss:$16 sps:$4 sm:$0xff]  }
  0x43   :  { %706 = vmatprep.subr.bf16.mxu0 %v12045_v12  ;;  %v10460_v12 = vld [vmem:[%s15673_s2 + $0x808] ss:$16 sps:$4 sm:$0xff]  }
  0x44   :  { %748 = vmatpush1.bf16.msra.mxu1 %v12088_v27  ;;  %v10474_v27 = vld [vmem:[%s15673_s2 + $0x84c] ss:$16 sps:$4 sm:$0xff]  }
  0x45   :  { %749 = vmatprep.subr.bf16.mxu1 %v12091_v28  ;;  %v10477_v28 = vld [vmem:[%s15673_s2 + $0x864] ss:$16 sps:$4 sm:$0xff]  }
  0x46   :  { %707 = vmatpush1.bf16.msra.mxu0 %v12069_v21  ;;  %v10466_v21 = vld [vmem:[%s15673_s2 + $0x828] ss:$16 sps:$4 sm:$0xff]  }
  0x47   :  { %708 = vmatprep.subr.bf16.mxu0 %v12078_v24  ;;  %v10469_v24 = vld [vmem:[%s15673_s2 + $0x840] ss:$16 sps:$4 sm:$0xff]  }
  0x48   :  { %750 = vmatpush1.bf16.msra.mxu1 %v12112_v35  ;;  %v10480_v35 = vld [vmem:[%s15673_s2 + $0x86c] ss:$16 sps:$4 sm:$0xff]  }
  0x49   :  { %751 = vmatprep.subr.bf16.mxu1 %v12115_v36  ;;  %v10483_v36 = vld [vmem:[%s15673_s2 + $0x884] ss:$16 sps:$4 sm:$0xff]  }
  0x4a   :  { %709 = vmatpush1.bf16.msra.mxu0 %v12094_v29  ;;  %v10472_v29 = vld [vmem:[%s15673_s2 + $0x848] ss:$16 sps:$4 sm:$0xff]  }
  0x4b   :  { %710 = vmatprep.subr.bf16.mxu0 %v12103_v32  ;;  %v10475_v32 = vld [vmem:[%s15673_s2 + $0x860] ss:$16 sps:$4 sm:$0xff]  }
  0x4c   :  { %752 = vmatpush1.bf16.msra.mxu1 %v12136_v43  ;;  %v10486_v43 = vld [vmem:[%s15673_s2 + $0x88c] ss:$16 sps:$4 sm:$0xff]  }
  0x4d   :  { %753 = vmatprep.subr.bf16.mxu1 %v12139_v44  ;;  %v10489_v44 = vld [vmem:[%s15673_s2 + $0x8a4] ss:$16 sps:$4 sm:$0xff]  }
  0x4e   :  { %711 = vmatpush1.bf16.msra.mxu0 %v12118_v37  ;;  %v10478_v37 = vld [vmem:[%s15673_s2 + $0x868] ss:$16 sps:$4 sm:$0xff]  }
  0x4f   :  { %712 = vmatprep.subr.bf16.mxu0 %v12127_v40  ;;  %v10481_v40 = vld [vmem:[%s15673_s2 + $0x880] ss:$16 sps:$4 sm:$0xff]  }
  0x50   :  { %754 = vmatpush1.bf16.msra.mxu1 %v12157_v51  ;;  %v10492_v51 = vld [vmem:[%s15673_s2 + $0x8ac] ss:$16 sps:$4 sm:$0xff]  }
  0x51   :  { %755 = vmatprep.subr.bf16.mxu1 %v12163_v53  ;;  %v10495_v53 = vld [vmem:[%s15673_s2 + $0x8c4] ss:$16 sps:$4 sm:$0xff]  }
  0x52   :  { %713 = vmatpush1.bf16.msra.mxu0 %v12145_v46  ;;  %v10484_v46 = vld [vmem:[%s15673_s2 + $0x888] ss:$16 sps:$4 sm:$0xff]  }
  0x53   :  { %8613 = vmatprep.subr.msk.bf16.mxu0 %vm421_vm0, %v12151_v48  ;;  %v10487_v48 = vld [vmem:[%s15673_s2 + $0x8a0] ss:$16 sps:$4 sm:$0xff]  }
  0x54   :  { %756 = vmatpush1.bf16.msra.mxu1 %v12183_v59  ;;  %v10498_v59 = vld [vmem:[%s15673_s2 + $0x8cc] ss:$16 sps:$4 sm:$0xff]  }
  0x55   :  { %8615 = vmatprep.subr.msk.bf16.mxu1 %vm421_vm0, %v12194_v62  ;;  %v10496_v62 = vld [vmem:[%s15673_s2 + $0x8c8] ss:$16 sps:$4 sm:$0xff]  }
  0x56   :  { %715 = vmatpush1.bf16.msra.mxu0 %v12175_v56  ;;  %v10490_v56 = vld [vmem:[%s15673_s2 + $0x8a8] ss:$16 sps:$4 sm:$0xff]  }
  0x57   :  { %788 = vmatprep.subr.bf16.mxu0 %v12177_v57  ;;  %v10493_v57 = vld [vmem:[%s15673_s2 + $0x8c0] ss:$16 sps:$4 sm:$0xff]  }
  0x58   :  { %758 = vmatpush1.bf16.msra.mxu1 %v12220_v11  ;;  %v10507_v11 = vld [vmem:[%s15673_s2 + $0x904] ss:$16 sps:$4 sm:$0xff]  }
  0x59   :  { %8614 = vmatmul.mubr.msk.bf16.vlgmr.msra.gmra.mrb[8].mxu0 %vm417_vm1, %v10456_v3  ;;  %831 = vmatprep.subr.bf16.mxu1 %v12222_v13  ;;  %v10502_v13 = vld [vmem:[%s15673_s2 + $0x8e8] ss:$16 sps:$4 sm:$0xff]  }
  0x5a   :  { %789 = vmatpush1.bf16.msra.mxu0 %v12197_v0  ;;  %820 = vmatprep.mubr.bf16.mxu0 %v11953_v6  ;;  %v10499_v0 = vld [vmem:[%s15673_s2 + $0x8e0] ss:$16 sps:$4 sm:$0xff]  }
  0x5b   :  { %790 = vmatprep.subr.bf16.mxu0 %v12206_v5  ;;  %8616 = vmatmul.mubr.msk.bf16.vlgmr.msra.gmra.mrb[8].mxu1 %vm417_vm1, %v10456_v3  ;;  %v10504_v5 = vld [vmem:[%s15673_s2 + $0x8ec] ss:$16 sps:$4 sm:$0xff]  }
  0x5c   :  { %832 = vmatpush1.bf16.msra.mxu1 %v12241_v23  ;;  %863 = vmatprep.mubr.bf16.mxu1 %v11953_v6  ;;  %v10457_v6 = vld [vmem:[%s15673_s2 + $0x800] ss:$16 sps:$4 sm:$0xff]   ;;  %v10513_v23 = vld [vmem:[%s15673_s2 + $0x924] ss:$16 sps:$4 sm:$0xff]  }
  0x5d   :  { %833 = vmatprep.subr.bf16.mxu1 %v12247_v26  ;;  %v10508_v26 = vld [vmem:[%s15673_s2 + $0x908] ss:$16 sps:$4 sm:$0xff]  }
  0x5e   :  { %791 = vmatpush1.bf16.msra.mxu0 %v12225_v14  ;;  %v10505_v14 = vld [vmem:[%s15673_s2 + $0x900] ss:$16 sps:$4 sm:$0xff]  }
  0x5f   :  { %792 = vmatprep.subr.bf16.mxu0 %v12235_v17  ;;  %v10510_v17 = vld [vmem:[%s15673_s2 + $0x90c] ss:$16 sps:$4 sm:$0xff]  }
  0x60   :  { %834 = vmatpush1.bf16.msra.mxu1 %v12267_v39  ;;  %v10519_v39 = vld [vmem:[%s15673_s2 + $0x944] ss:$16 sps:$4 sm:$0xff]  }
  0x61   :  { %835 = vmatprep.subr.bf16.mxu1 %v12274_v42  ;;  %v10514_v42 = vld [vmem:[%s15673_s2 + $0x928] ss:$16 sps:$4 sm:$0xff]  }
  0x62   :  { %793 = vmatpush1.bf16.msra.mxu0 %v12250_v30  ;;  %v10511_v30 = vld [vmem:[%s15673_s2 + $0x920] ss:$16 sps:$4 sm:$0xff]  }
  0x63   :  { %794 = vmatprep.subr.bf16.mxu0 %v12261_v34  ;;  %v10516_v34 = vld [vmem:[%s15673_s2 + $0x92c] ss:$16 sps:$4 sm:$0xff]  }
  0x64   :  { %836 = vmatpush1.bf16.msra.mxu1 %v12292_v54  ;;  %v10525_v54 = vld [vmem:[%s15673_s2 + $0x964] ss:$16 sps:$4 sm:$0xff]  }
  0x65   :  { %837 = vmatprep.subr.bf16.mxu1 %v12298_v58  ;;  %v10520_v58 = vld [vmem:[%s15673_s2 + $0x948] ss:$16 sps:$4 sm:$0xff]  }
  0x66   :  { %795 = vmatpush1.bf16.msra.mxu0 %v12277_v45  ;;  %v10517_v45 = vld [vmem:[%s15673_s2 + $0x940] ss:$16 sps:$4 sm:$0xff]  }
  0x67   :  { %796 = vmatprep.subr.bf16.mxu0 %v12286_v50  ;;  %v10522_v50 = vld [vmem:[%s15673_s2 + $0x94c] ss:$16 sps:$4 sm:$0xff]  }
  0x68   :  { %838 = vmatpush1.bf16.msra.mxu1 %v12316_v9  ;;  %v10531_v9 = vld [vmem:[%s15673_s2 + $0x984] ss:$16 sps:$4 sm:$0xff]  }
  0x69   :  { %839 = vmatprep.subr.bf16.mxu1 %v12322_v16  ;;  %v10526_v16 = vld [vmem:[%s15673_s2 + $0x968] ss:$16 sps:$4 sm:$0xff]  }
  0x6a   :  { %797 = vmatpush1.bf16.msra.mxu0 %v12301_v60  ;;  %v10523_v60 = vld [vmem:[%s15673_s2 + $0x960] ss:$16 sps:$4 sm:$0xff]  }
  0x6b   :  { %798 = vmatprep.subr.bf16.mxu0 %v12310_v2  ;;  %v10528_v2 = vld [vmem:[%s15673_s2 + $0x96c] ss:$16 sps:$4 sm:$0xff]  }
  0x6c   :  { %840 = vmatpush1.bf16.msra.mxu1 %v12337_v41  ;;  %v10540_v41 = vld [vmem:[%s15673_s2 + $0x9ac] ss:$16 sps:$4 sm:$0xff]  }
  0x6d   :  { %841 = vmatprep.subr.bf16.mxu1 %v12346_v52  ;;  %v10541_v52 = vld [vmem:[%s15673_s2 + $0x9c0] ss:$16 sps:$4 sm:$0xff]  }
  0x6e   :  { %799 = vmatpush1.bf16.msra.mxu0 %v12325_v22  ;;  %v10529_v22 = vld [vmem:[%s15673_s2 + $0x980] ss:$16 sps:$4 sm:$0xff]  }
  0x6f   :  { %8617 = vmatprep.subr.msk.bf16.mxu0 %vm421_vm0, %v12334_v33  ;;  %v10532_v33 = vld [vmem:[%s15673_s2 + $0x988] ss:$16 sps:$4 sm:$0xff]  }
  0x70   :  { %842 = vmatpush1.bf16.msra.mxu1 %v12355_v63  ;;  %v10549_v63 = vld [vmem:[%s15673_s2 + $0x9e4] ss:$16 sps:$4 sm:$0xff]  }
  0x71   :  { %8619 = vmatprep.subr.msk.bf16.mxu1 %vm421_vm0, %v12358_v1  ;;  %v10544_v1 = vld [vmem:[%s15673_s2 + $0x9c8] ss:$16 sps:$4 sm:$0xff]  }
  0x72   :  { %801 = vmatpush1.bf16.msra.mxu0 %v12352_v55  ;;  %v10546_v55 = vld [vmem:[%s15673_s2 + $0x9cc] ss:$16 sps:$4 sm:$0xff]  }
  0x73   :  { %2826 = vmatprep.subr.bf16.mxu0 %v10459_v4  ;;  %v10550_v4 = vld [vmem:[%s15673_s2 + $0x9e8] ss:$16 sps:$4 sm:$0xff]  }
  0x74   :  { %844 = vmatpush1.bf16.msra.mxu1 %v12366_v15  ;;  %v10552_v15 = vld [vmem:[%s15673_s2 + $0x9ec] ss:$16 sps:$4 sm:$0xff]  }
  0x75   :  { %8618 = vmatmul.mubr.msk.bf16.vlgmr.msra.gmra.mrb[12].mxu0 %vm417_vm1, %v10456_v3  ;;  %2998 = vmatprep.subr.bf16.mxu1 %v10462_v7  ;;  %v100_v7 = vlaneseq }
  0x76   :  { %2827 = vmatpush1.bf16.msra.mxu0 %v10457_v6  ;;  %v10558_v6 = vld [vmem:[%s15673_s2 + $0xa0c] ss:$16 sps:$4 sm:$0xff]  }
  0x77   :  { %2828 = vmatprep.subr.bf16.mxu0 %v10465_v10  ;;  %8620 = vmatmul.mubr.msk.bf16.vlgmr.msra.gmra.mrb[12].mxu1 %vm417_vm1, %v10456_v3  ;;  %v10555_v3 = vld [vmem:[%s15673_s2 + $0xa04] ss:$16 sps:$4 sm:$0xff]   ;;  %v12641_v10 = vshrl.u32 %v100_v7, 7  ;;  %v10583_v7 = vld [vmem:[%s15673_s2 + $0xaa0] ss:$16 sps:$4 sm:$0xff]  }
  0x78   :  { %2999 = vmatpush1.bf16.msra.mxu1 %v10460_v12 }
  0x79   :  { %3000 = vmatprep.subr.bf16.mxu1 %v10468_v19  ;;  %v12644_v12 = vsub.s32 0, %v12641_v10  ;;  %v12652_v19 = vsub.s32 1, %v12641_v10 }
  0x7a   :  { %2829 = vmatpush1.bf16.msra.mxu0 %v10463_v18  ;;  %v12649_v18 = vld [vmem:[%s15675_s4] sm:$0xff] }
  0x7b   :  { %2830 = vmatprep.subr.bf16.mxu0 %v10471_v20  ;;  %v12656_v20 = vrot.slane %v12649_v18, %v12644_v12 }
  0x7c   :  { %3001 = vmatpush1.bf16.msra.mxu1 %v10466_v21  ;;  %v12660_v21 = vrot.slane %v12649_v18, %v12652_v19 }
  0x7d   :  { %3002 = vmatprep.subr.bf16.mxu1 %v10474_v27 }
  0x7e   :  { %2831 = vmatpush1.bf16.msra.mxu0 %v10469_v24  ;;  %v110_v24 = vsub.s32 2, %v12641_v10 }
  0x7f   :  { %2832 = vmatprep.subr.bf16.mxu0 %v10477_v28  ;;  %v114_v28 = vsub.s32 3, %v12641_v10 }
  0x80   :  { %3003 = vmatpush1.bf16.msra.mxu1 %v10472_v29 }
  0x81   :  { %3004 = vmatprep.subr.bf16.mxu1 %v10480_v35 }
  0x82   :  { %2833 = vmatpush1.bf16.msra.mxu0 %v10475_v32 }
  0x83   :  { %2834 = vmatprep.subr.bf16.mxu0 %v10483_v36 }
  0x84   :  { %3005 = vmatpush1.bf16.msra.mxu1 %v10478_v37 }
  0x85   :  { %3006 = vmatprep.subr.bf16.mxu1 %v10486_v43 }
  0x86   :  { %2835 = vmatpush1.bf16.msra.mxu0 %v10481_v40 }
  0x87   :  { %2836 = vmatprep.subr.bf16.mxu0 %v10489_v44  ;;  %v12670_v44 = vrot.slane %v12649_v18, %v110_v24 }
  0x88   :  { %3007 = vmatpush1.bf16.msra.mxu1 %v10484_v46 }
  0x89   :  { %3008 = vmatprep.subr.bf16.mxu1 %v10492_v51  ;;  %v12676_v51 = vrot.slane %v12649_v18, %v114_v28 }
  0x8a   :  { %2837 = vmatpush1.bf16.msra.mxu0 %v10487_v48 }
  0x8b   :  { %2838 = vmatprep.subr.bf16.mxu0 %v10495_v53 }
  0x8c   :  { %3009 = vmatpush1.bf16.msra.mxu1 %v10490_v56 }
  0x8d   :  { %3010 = vmatprep.subr.bf16.mxu1 %v10498_v59 }
  0x8e   :  { %2839 = vmatpush1.bf16.msra.mxu0 %v10493_v57 }
  0x8f   :  { %2840 = vmatprep.subr.bf16.mxu0 %v10501_v61 }
  0x90   :  { %3011 = vmatpush1.bf16.msra.mxu1 %v10496_v62  ;;  %v10553_v62 = vld [vmem:[%s15673_s2 + $0xa00] ss:$16 sps:$4 sm:$0xff]  }
  0x91   :  { %3012 = vmatprep.subr.bf16.mxu1 %v10504_v5 }
  0x92   :  { %2841 = vmatpush1.bf16.msra.mxu0 %v10499_v0  ;;  %v10556_v0 = vld [vmem:[%s15673_s2 + $0xa08] ss:$16 sps:$4 sm:$0xff]  }
  0x93   :  { %2842 = vmatprep.subr.bf16.mxu0 %v10507_v11 }
  0x94   :  { %3013 = vmatpush1.bf16.msra.mxu1 %v10502_v13 }
  0x95   :  { %3014 = vmatprep.subr.bf16.mxu1 %v10510_v17 }
  0x96   :  { %2843 = vmatpush1.bf16.msra.mxu0 %v10505_v14 }
  0x97   :  { %2844 = vmatprep.subr.bf16.mxu0 %v10513_v23 }
  0x98   :  { %3015 = vmatpush1.bf16.msra.mxu1 %v10508_v26 }
  0x99   :  { %3016 = vmatprep.subr.bf16.mxu1 %v10516_v34 }
  0x9a   :  { %2845 = vmatpush1.bf16.msra.mxu0 %v10511_v30 }
  0x9b   :  { %2846 = vmatprep.subr.bf16.mxu0 %v10519_v39  ;;  %v10561_v39 = vld [vmem:[%s15673_s2 + $0xa24] ss:$16 sps:$4 sm:$0xff]  }
  0x9c   :  { %3017 = vmatpush1.bf16.msra.mxu1 %v10514_v42  ;;  %v10564_v42 = vld [vmem:[%s15673_s2 + $0xa2c] ss:$16 sps:$4 sm:$0xff]  }
  0x9d   :  { %3018 = vmatprep.subr.bf16.mxu1 %v10522_v50  ;;  %v10559_v50 = vld [vmem:[%s15673_s2 + $0xa20] ss:$16 sps:$4 sm:$0xff]  }
  0x9e   :  { %2847 = vmatpush1.bf16.msra.mxu0 %v10517_v45 }
  0x9f   :  { %2848 = vmatprep.subr.bf16.mxu0 %v10525_v54  ;;  %v10562_v54 = vld [vmem:[%s15673_s2 + $0xa28] ss:$16 sps:$4 sm:$0xff]  }
  0xa0   :  { %3019 = vmatpush1.bf16.msra.mxu1 %v10520_v58 }
  0xa1   :  { %3020 = vmatprep.subr.bf16.mxu1 %v10528_v2  ;;  %v10570_v2 = vld [vmem:[%s15673_s2 + $0xa4c] ss:$16 sps:$4 sm:$0xff]  }
  0xa2   :  { %2849 = vmatpush1.bf16.msra.mxu0 %v10523_v60  ;;  %v10567_v60 = vld [vmem:[%s15673_s2 + $0xa44] ss:$16 sps:$4 sm:$0xff]  }
  0xa3   :  { %2850 = vmatprep.subr.bf16.mxu0 %v10531_v9  ;;  %v10565_v9 = vld [vmem:[%s15673_s2 + $0xa40] ss:$16 sps:$4 sm:$0xff]  }
  0xa4   :  { %3021 = vmatpush1.bf16.msra.mxu1 %v10526_v16  ;;  %v10568_v16 = vld [vmem:[%s15673_s2 + $0xa48] ss:$16 sps:$4 sm:$0xff]  }
  0xa5   :  { %3022 = vmatprep.subr.bf16.mxu1 %v10534_v25 }
  0xa6   :  { %2851 = vmatpush1.bf16.msra.mxu0 %v10529_v22 }
  0xa7   :  { %2852 = vmatprep.subr.bf16.mxu0 %v10537_v31  ;;  %v10573_v31 = vld [vmem:[%s15673_s2 + $0xa64] ss:$16 sps:$4 sm:$0xff]  }
  0xa8   :  { %3023 = vmatpush1.bf16.msra.mxu1 %v10532_v33  ;;  %v10576_v33 = vld [vmem:[%s15673_s2 + $0xa6c] ss:$16 sps:$4 sm:$0xff]  }
  0xa9   :  { %3024 = vmatprep.subr.bf16.mxu1 %v10540_v41  ;;  %v10574_v41 = vld [vmem:[%s15673_s2 + $0xa68] ss:$16 sps:$4 sm:$0xff]  }
  0xaa   :  { %2853 = vmatpush1.bf16.msra.mxu0 %v10535_v38  ;;  %v10571_v38 = vld [vmem:[%s15673_s2 + $0xa60] ss:$16 sps:$4 sm:$0xff]  }
  0xab   :  { %2854 = vmatprep.subr.bf16.mxu0 %v10543_v47  ;;  %v118_v47 = vsub.s32 4, %v12641_v10 }
  0xac   :  { %3025 = vmatpush1.bf16.msra.mxu1 %v10538_v49  ;;  %v122_v49 = vsub.s32 5, %v12641_v10 }
  0xad   :  { %3026 = vmatprep.subr.bf16.mxu1 %v10546_v55  ;;  %v10582_v55 = vld [vmem:[%s15673_s2 + $0xa8c] ss:$16 sps:$4 sm:$0xff]  }
  0xae   :  { %2855 = vmatpush1.bf16.msra.mxu0 %v10541_v52  ;;  %v10579_v52 = vld [vmem:[%s15673_s2 + $0xa84] ss:$16 sps:$4 sm:$0xff]  }
  0xaf   :  { %2856 = vmatprep.subr.bf16.mxu0 %v10549_v63  ;;  %v10577_v63 = vld [vmem:[%s15673_s2 + $0xa80] ss:$16 sps:$4 sm:$0xff]  }
  0xb0   :  { %3027 = vmatpush1.bf16.msra.mxu1 %v10544_v1  ;;  %v10580_v1 = vld [vmem:[%s15673_s2 + $0xa88] ss:$16 sps:$4 sm:$0xff]  }
  0xb1   :  { %3028 = vmatprep.subr.bf16.mxu1 %v10552_v15  ;;  %v12744_v15 = vrot.slane %v12649_v18, %v122_v49  ;;  %v10612_v49 = vld [vmem:[%s15673_s2 + $0xb2c] ss:$16 sps:$4 sm:$0xff]  }
  0xb2   :  { %2857 = vmatpush1.bf16.msra.mxu0 %v10547_v8  ;;  %v12741_v8 = vrot.slane %v12649_v18, %v118_v47  ;;  %v10609_v47 = vld [vmem:[%s15673_s2 + $0xb24] ss:$16 sps:$4 sm:$0xff]  }
  0xb3   :  { %2869 = vmatprep.subr.bf16.mxu0 %v10555_v3  ;;  %v10585_v3 = vld [vmem:[%s15673_s2 + $0xaa4] ss:$16 sps:$4 sm:$0xff]  }
  0xb4   :  { %3029 = vmatpush1.bf16.msra.mxu1 %v10550_v4  ;;  %v10588_v4 = vld [vmem:[%s15673_s2 + $0xaac] ss:$16 sps:$4 sm:$0xff]  }
  0xb5   :  { %3041 = vmatprep.subr.bf16.mxu1 %v10558_v6  ;;  %v126_v6 = vsub.s32 6, %v12641_v10 }
  0xf4   :  { %v480_v27 = vpop.f32.mrb[0].mxu0  ;;  %v523_v57 = vpop.f32.mrb[0].mxu1 }
  0xf5   :  { %v481_v29 = vadd.f32 %v480_v27, %v12656_v20  ;;  %v482_v32 = vpop.f32.mrb[1].mxu0  ;;  %v524_v59 = vadd.f32 %v523_v57, %v12670_v44  ;;  %v525_v61 = vpop.f32.mrb[1].mxu1  ;;  %v10586_v27 = vld [vmem:[%s15673_s2 + $0xaa8] ss:$16 sps:$4 sm:$0xff]  }
  0xf6   :  { %v483_v35 = vadd.f32 %v482_v32, %v12660_v21  ;;  %v484_v36 = vpop.f32.mrb[2].mxu0  ;;  %v526_v5 = vadd.f32 %v525_v61, %v12676_v51  ;;  %v527_v11 = vpop.f32.mrb[2].mxu1  ;;  %v130_v32 = vsub.s32 7, %v12641_v10  ;;  %v10592_v61 = vld [vmem:[%s15673_s2 + $0xac8] ss:$16 sps:$4 sm:$0xff]  }
  0xf7   :  { %v618_v37 = vmax.f32 %v481_v29, 0.0  ;;  %v485_v40 = vadd.f32 %v484_v36, %v12656_v20  ;;  %v486_v43 = vpop.f32.mrb[3].mxu0  ;;  %v620_v13 = vmax.f32 %v524_v59, 0.0  ;;  %v528_v14 = vadd.f32 %v527_v11, %v12670_v44  ;;  %v529_v17 = vpop.f32.mrb[3].mxu1  ;;  %v10589_v59 = vld [vmem:[%s15673_s2 + $0xac0] ss:$16 sps:$4 sm:$0xff]  }
  0xf8   :  { %v619_v46 = vmax.f32 %v483_v35, 0.0  ;;  %v487_v48 = vadd.f32 %v486_v43, %v12660_v21  ;;  %v621_v30 = vmax.f32 %v526_v5, 0.0  ;;  %v530_v34 = vadd.f32 %v529_v17, %v12676_v51  ;;  %v10591_v43 = vld [vmem:[%s15673_s2 + $0xac4] ss:$16 sps:$4 sm:$0xff]  }
  0xf9   :  { %v626_v53 = vmax.f32 %v485_v40, 0.0  ;;  %v628_v45 = vmax.f32 %v528_v14, 0.0  ;;  %v10597_v17 = vld [vmem:[%s15673_s2 + $0xae4] ss:$16 sps:$4 sm:$0xff]  }
  0xfa   :  { %v627_v56 = vmax.f32 %v487_v48, 0.0  ;;  %v629_v58 = vmax.f32 %v530_v34, 0.0  ;;  %v10598_v34 = vld [vmem:[%s15673_s2 + $0xae8] ss:$16 sps:$4 sm:$0xff]  }
  0xfb   :  { %v11921_v23 = vpack.c.bf16 %v626_v53, %v618_v37  ;;  %v12712_v22 = vpack.c.bf16 %v628_v45, %v620_v13  ;;  %v12769_v53 = vrot.slane %v12649_v18, %v126_v6  ;;  %v10613_v6 = vld [vmem:[%s15673_s2 + $0xb40] ss:$16 sps:$4 sm:$0xff]  }
  0xfc   :  { %v11922_v26 = vpack.c.bf16 %v627_v56, %v619_v46  ;;  %v11924_v25 = vpack.c.bf16 %v629_v58, %v621_v30  ;;  %v10594_v46 = vld [vmem:[%s15673_s2 + $0xacc] ss:$16 sps:$4 sm:$0xff]   ;;  %v10595_v30 = vld [vmem:[%s15673_s2 + $0xae0] ss:$16 sps:$4 sm:$0xff]  }
  0xfe   :  { %2858 = vmatprep.mubr.bf16.mxu0 %v11922_v26  ;;  %3030 = vmatprep.mubr.bf16.mxu1 %v11922_v26 }
  0xff   :  { %2859 = vmatmul.mubr.bf16.vlgmr.msra.gmra.mrb[16].mxu0 %v11921_v23  ;;  %3031 = vmatmul.mubr.bf16.vlgmr.msra.gmra.mrb[16].mxu1 %v11921_v23  ;;  %v10600_v23 = vld [vmem:[%s15673_s2 + $0xaec] ss:$16 sps:$4 sm:$0xff]  }
 0x100   :  { %2870 = vmatpush1.bf16.msra.mxu0 %v10553_v62  ;;  %3042 = vmatpush1.bf16.msra.mxu1 %v10556_v0  ;;  %v12779_v0 = vrot.slane %v12649_v18, %v130_v32  ;;  %v10619_v32 = vld [vmem:[%s15673_s2 + $0xb60] ss:$16 sps:$4 sm:$0xff]  }
 0x101   :  { %2871 = vmatprep.subr.bf16.mxu0 %v10561_v39  ;;  %3043 = vmatprep.subr.bf16.mxu1 %v10564_v42 }
 0x102   :  { %2901 = vmatprep.mubr.bf16.mxu0 %v11924_v25  ;;  %3073 = vmatprep.mubr.bf16.mxu1 %v11924_v25  ;;  %v10606_v25 = vld [vmem:[%s15673_s2 + $0xb0c] ss:$16 sps:$4 sm:$0xff]  }
 0x104   :  { %2872 = vmatpush1.bf16.msra.mxu0 %v10559_v50  ;;  %3044 = vmatpush1.bf16.msra.mxu1 %v10562_v54 }
 0x105   :  { %2873 = vmatprep.subr.bf16.mxu0 %v10567_v60  ;;  %3045 = vmatprep.subr.bf16.mxu1 %v10570_v2 }
 0x108   :  { %2874 = vmatpush1.bf16.msra.mxu0 %v10565_v9  ;;  %3046 = vmatpush1.bf16.msra.mxu1 %v10568_v16  ;;  %v10603_v16 = vld [vmem:[%s15673_s2 + $0xb04] ss:$16 sps:$4 sm:$0xff]  }
 0x109   :  { %2875 = vmatprep.subr.bf16.mxu0 %v10573_v31  ;;  %3047 = vmatprep.subr.bf16.mxu1 %v10576_v33  ;;  %v10601_v33 = vld [vmem:[%s15673_s2 + $0xb00] ss:$16 sps:$4 sm:$0xff]  }
 0x10c   :  { %2876 = vmatpush1.bf16.msra.mxu0 %v10571_v38  ;;  %3048 = vmatpush1.bf16.msra.mxu1 %v10574_v41  ;;  %v10604_v38 = vld [vmem:[%s15673_s2 + $0xb08] ss:$16 sps:$4 sm:$0xff]  }
 0x10d   :  { %2877 = vmatprep.subr.bf16.mxu0 %v10579_v52  ;;  %3049 = vmatprep.subr.bf16.mxu1 %v10582_v55  ;;  %v10607_v52 = vld [vmem:[%s15673_s2 + $0xb20] ss:$16 sps:$4 sm:$0xff]   ;;  %v10610_v55 = vld [vmem:[%s15673_s2 + $0xb28] ss:$16 sps:$4 sm:$0xff]  }
 0x110   :  { %v566_v29 = vpop.f32.mrb[4].mxu0  ;;  %2878 = vmatpush1.bf16.msra.mxu0 %v10577_v63  ;;  %3050 = vmatpush1.bf16.msra.mxu1 %v10580_v1 }
 0x111   :  { %v567_v35 = vadd.f32 %v566_v29, %v12741_v8  ;;  %v568_v36 = vpop.f32.mrb[5].mxu0  ;;  %2879 = vmatprep.subr.bf16.mxu0 %v10585_v3  ;;  %3051 = vmatprep.subr.bf16.mxu1 %v10588_v4  ;;  %v10615_v3 = vld [vmem:[%s15673_s2 + $0xb44] ss:$16 sps:$4 sm:$0xff]   ;;  %v10618_v4 = vld [vmem:[%s15673_s2 + $0xb4c] ss:$16 sps:$4 sm:$0xff]  }
 0x112   :  { %v569_v37 = vadd.f32 %v568_v36, %v12744_v15  ;;  %v570_v40 = vpop.f32.mrb[6].mxu0  ;;  %v609_v13 = vpop.f32.mrb[4].mxu1  ;;  %v10624_v29 = vld [vmem:[%s15673_s2 + $0xb6c] ss:$16 sps:$4 sm:$0xff]   ;;  %v10627_v36 = vld [vmem:[%s15673_s2 + $0xb84] ss:$16 sps:$4 sm:$0xff]  }
 0x113   :  { %v622_v48 = vmax.f32 %v567_v35, 0.0  ;;  %v571_v56 = vadd.f32 %v570_v40, %v12741_v8  ;;  %v572_v57 = vpop.f32.mrb[7].mxu0  ;;  %v610_v18 = vadd.f32 %v609_v13, %v12769_v53  ;;  %v611_v26 = vpop.f32.mrb[5].mxu1  ;;  %v10622_v35 = vld [vmem:[%s15673_s2 + $0xb68] ss:$16 sps:$4 sm:$0xff]  }
 0x114   :  { %v623_v62 = vmax.f32 %v569_v37, 0.0  ;;  %v573_v5 = vadd.f32 %v572_v57, %v12744_v15  ;;  %2880 = vmatpush1.bf16.msra.mxu0 %v10583_v7  ;;  %3052 = vmatpush1.bf16.msra.mxu1 %v10586_v27  ;;  %v612_v39 = vadd.f32 %v611_v26, %v12779_v0  ;;  %v613_v42 = vpop.f32.mrb[6].mxu1  ;;  %v10616_v7 = vld [vmem:[%s15673_s2 + $0xb48] ss:$16 sps:$4 sm:$0xff]   ;;  %v10621_v27 = vld [vmem:[%s15673_s2 + $0xb64] ss:$16 sps:$4 sm:$0xff]  }
 0x115   :  { %v630_v11 = vmax.f32 %v571_v56, 0.0  ;;  %2881 = vmatprep.subr.bf16.mxu0 %v10591_v43  ;;  %3053 = vmatprep.subr.bf16.mxu1 %v10594_v46  ;;  %v624_v45 = vmax.f32 %v610_v18, 0.0  ;;  %v614_v50 = vadd.f32 %v613_v42, %v12769_v53  ;;  %v615_v54 = vpop.f32.mrb[7].mxu1  ;;  %v10630_v37 = vld [vmem:[%s15673_s2 + $0xb8c] ss:$16 sps:$4 sm:$0xff]  }
 0x116   :  { %v631_v14 = vmax.f32 %v573_v5, 0.0  ;;  %v625_v58 = vmax.f32 %v612_v39, 0.0  ;;  %v616_v60 = vadd.f32 %v615_v54, %v12779_v0  ;;  %v10625_v40 = vld [vmem:[%s15673_s2 + $0xb80] ss:$16 sps:$4 sm:$0xff]   ;;  %v10628_v43 = vld [vmem:[%s15673_s2 + $0xb88] ss:$16 sps:$4 sm:$0xff]  }
 0x117   :  { %v12798_v2 = vpack.c.bf16 %v630_v11, %v622_v48  ;;  %v632_v31 = vmax.f32 %v614_v50, 0.0  ;;  %v10639_v39 = vld [vmem:[%s15673_s2 + $0xbc4] ss:$16 sps:$4 sm:$0xff]   ;;  %v10642_v42 = vld [vmem:[%s15673_s2 + $0xbcc] ss:$16 sps:$4 sm:$0xff]  }
 0x118   :  { %2882 = vmatpush1.bf16.msra.mxu0 %v10589_v59  ;;  %3054 = vmatpush1.bf16.msra.mxu1 %v10592_v61  ;;  %v12800_v9 = vpack.c.bf16 %v631_v14, %v623_v62  ;;  %v633_v41 = vmax.f32 %v616_v60, 0.0  ;;  %v10633_v61 = vld [vmem:[%s15673_s2 + $0xba4] ss:$16 sps:$4 sm:$0xff]   ;;  %v10636_v62 = vld [vmem:[%s15673_s2 + $0xbac] ss:$16 sps:$4 sm:$0xff]  }
 0x119   :  { %2883 = vmatprep.subr.bf16.mxu0 %v10597_v17  ;;  %3055 = vmatprep.subr.bf16.mxu1 %v10600_v23  ;;  %v12826_v63 = vpack.c.bf16 %v632_v31, %v624_v45  ;;  %v10631_v14 = vld [vmem:[%s15673_s2 + $0xba0] ss:$16 sps:$4 sm:$0xff]   ;;  %v10634_v17 = vld [vmem:[%s15673_s2 + $0xba8] ss:$16 sps:$4 sm:$0xff]  }
 0x11a   :  { %v12828_v1 = vpack.c.bf16 %v633_v41, %v625_v58  ;;  %v10637_v50 = vld [vmem:[%s15673_s2 + $0xbc0] ss:$16 sps:$4 sm:$0xff]   ;;  %v10640_v54 = vld [vmem:[%s15673_s2 + $0xbc8] ss:$16 sps:$4 sm:$0xff]  }
 0x11b   :  { %v10700_v31 = vld [vmem:[%s15673_s2 + $0xd08] ss:$16 sps:$4 sm:$0xff]  }
 0x11c   :  { %2884 = vmatpush1.bf16.msra.mxu0 %v10595_v30  ;;  %3056 = vmatpush1.bf16.msra.mxu1 %v10598_v34 }
 0x11d   :  { %2885 = vmatprep.subr.bf16.mxu0 %v10603_v16  ;;  %3057 = vmatprep.subr.bf16.mxu1 %v10606_v25 }
 0x120   :  { %2886 = vmatpush1.bf16.msra.mxu0 %v10601_v33  ;;  %3058 = vmatpush1.bf16.msra.mxu1 %v10604_v38 }
 0x121   :  { %2887 = vmatprep.subr.bf16.mxu0 %v10609_v47  ;;  %3059 = vmatprep.subr.bf16.mxu1 %v10612_v49 }
 0x124   :  { %2888 = vmatpush1.bf16.msra.mxu0 %v10607_v52  ;;  %3060 = vmatpush1.bf16.msra.mxu1 %v10610_v55 }
 0x125   :  { %2889 = vmatprep.subr.bf16.mxu0 %v10615_v3  ;;  %3061 = vmatprep.subr.bf16.mxu1 %v10618_v4  ;;  %v10645_v3 = vld [vmem:[%s15673_s2 + $0xbe4] ss:$16 sps:$4 sm:$0xff]   ;;  %v10648_v4 = vld [vmem:[%s15673_s2 + $0xbec] ss:$16 sps:$4 sm:$0xff]  }
 0x128   :  { %2890 = vmatpush1.bf16.msra.mxu0 %v10613_v6  ;;  %3062 = vmatpush1.bf16.msra.mxu1 %v10616_v7  ;;  %v10643_v6 = vld [vmem:[%s15673_s2 + $0xbe0] ss:$16 sps:$4 sm:$0xff]   ;;  %v10646_v7 = vld [vmem:[%s15673_s2 + $0xbe8] ss:$16 sps:$4 sm:$0xff]  }
 0x129   :  { %2891 = vmatprep.subr.bf16.mxu0 %v10621_v27  ;;  %3063 = vmatprep.subr.bf16.mxu1 %v10624_v29 }
 0x12c   :  { %v736_v46 = vpop.f32.mrb[8].mxu0  ;;  %2892 = vmatpush1.bf16.msra.mxu0 %v10619_v32  ;;  %3064 = vmatpush1.bf16.msra.mxu1 %v10622_v35 }
 0x12d   :  { %v737_v48 = vadd.f32 %v736_v46, %v12656_v20  ;;  %v738_v56 = vpop.f32.mrb[9].mxu0  ;;  %2893 = vmatprep.subr.bf16.mxu0 %v10627_v36  ;;  %3065 = vmatprep.subr.bf16.mxu1 %v10630_v37  ;;  %v10651_v37 = vld [vmem:[%s15673_s2 + $0xc04] ss:$16 sps:$4 sm:$0xff]   ;;  %v10652_v46 = vld [vmem:[%s15673_s2 + $0xc08] ss:$16 sps:$4 sm:$0xff]  }
 0x12e   :  { %v739_v57 = vadd.f32 %v738_v56, %v12660_v21  ;;  %v740_v59 = vpop.f32.mrb[10].mxu0  ;;  %v779_v30 = vpop.f32.mrb[8].mxu1 }
 0x12f   :  { %v874_v5 = vmax.f32 %v737_v48, 0.0  ;;  %v741_v11 = vadd.f32 %v740_v59, %v12656_v20  ;;  %v742_v13 = vpop.f32.mrb[11].mxu0  ;;  %v781_v45 = vpop.f32.mrb[9].mxu1  ;;  %v10660_v59 = vld [vmem:[%s15673_s2 + $0xc2c] ss:$16 sps:$4 sm:$0xff]  }
 0x130   :  { %v875_v23 = vmax.f32 %v739_v57, 0.0  ;;  %v743_v18 = vadd.f32 %v742_v13, %v12660_v21  ;;  %2894 = vmatpush1.bf16.msra.mxu0 %v10625_v40  ;;  %3066 = vmatpush1.bf16.msra.mxu1 %v10628_v43  ;;  %v780_v21 = vadd.f32 %v779_v30, %v12670_v44  ;;  %v782_v60 = vadd.f32 %v781_v45, %v12676_v51  ;;  %v783_v16 = vpop.f32.mrb[10].mxu1  ;;  %v10654_v40 = vld [vmem:[%s15673_s2 + $0xc0c] ss:$16 sps:$4 sm:$0xff]   ;;  %v10649_v43 = vld [vmem:[%s15673_s2 + $0xc00] ss:$16 sps:$4 sm:$0xff]  }
 0x131   :  { %v882_v26 = vmax.f32 %v741_v11, 0.0  ;;  %2895 = vmatprep.subr.bf16.mxu0 %v10633_v61  ;;  %3067 = vmatprep.subr.bf16.mxu1 %v10636_v62  ;;  %v784_v38 = vadd.f32 %v783_v16, %v12670_v44  ;;  %v785_v41 = vpop.f32.mrb[11].mxu1  ;;  %v10657_v57 = vld [vmem:[%s15673_s2 + $0xc24] ss:$16 sps:$4 sm:$0xff]   ;;  %v10658_v11 = vld [vmem:[%s15673_s2 + $0xc28] ss:$16 sps:$4 sm:$0xff]  }
 0x132   :  { %v10286_v34 = vpack.c.bf16 %v875_v23, %v874_v5  ;;  %v883_v20 = vmax.f32 %v743_v18, 0.0  ;;  %v876_v33 = vmax.f32 %v780_v21, 0.0  ;;  %v877_v49 = vmax.f32 %v782_v60, 0.0  ;;  %v10655_v5 = vld [vmem:[%s15673_s2 + $0xc20] ss:$16 sps:$4 sm:$0xff]  }
 0x133   :  { %v786_v55 = vadd.f32 %v785_v41, %v12676_v51  ;;  %v884_v44 = vmax.f32 %v784_v38, 0.0  ;;  %v10663_v13 = vld [vmem:[%s15673_s2 + $0xc44] ss:$16 sps:$4 sm:$0xff]   ;;  %v10667_v18 = vld [vmem:[%s15673_s2 + $0xc60] ss:$16 sps:$4 sm:$0xff]  }
 0x134   :  { %v933_v58 = vrot.slane %v10286_v34, 7  ;;  %v10290_v25 = vpack.c.bf16 %v883_v20, %v882_v26  ;;  %2896 = vmatpush1.bf16.msra.mxu0 %v10631_v14  ;;  %3068 = vmatpush1.bf16.msra.mxu1 %v10634_v17  ;;  %v10287_v51 = vpack.c.bf16 %v877_v49, %v876_v33  ;;  %v10661_v14 = vld [vmem:[%s15673_s2 + $0xc40] ss:$16 sps:$4 sm:$0xff]   ;;  %v10664_v17 = vld [vmem:[%s15673_s2 + $0xc48] ss:$16 sps:$4 sm:$0xff]  }
 0x135   :  { %2897 = vmatprep.subr.bf16.mxu0 %v10639_v39  ;;  %3069 = vmatprep.subr.bf16.mxu1 %v10642_v42  ;;  %v885_v32 = vmax.f32 %v786_v55, 0.0  ;;  %v10669_v23 = vld [vmem:[%s15673_s2 + $0xc64] ss:$16 sps:$4 sm:$0xff]   ;;  %v10670_v26 = vld [vmem:[%s15673_s2 + $0xc68] ss:$16 sps:$4 sm:$0xff]  }
 0x136   :  { %v937_v47 = vrot.slane %v933_v58, 4  ;;  %965 = vst [vmem:[#allocation2] sm:$0xee] %v933_v58  ;;  %v938_v52 = vrot.slane %v10290_v25, 7  ;;  %v934_v35 = vrot.slane %v10287_v51, 7 }
 0x137   :  { %v10291_v36 = vpack.c.bf16 %v885_v32, %v884_v44  ;;  %v10675_v21 = vld [vmem:[%s15673_s2 + $0xc84] ss:$16 sps:$4 sm:$0xff]   ;;  %v10678_v45 = vld [vmem:[%s15673_s2 + $0xc8c] ss:$16 sps:$4 sm:$0xff]   ;;  %v10673_v60 = vld [vmem:[%s15673_s2 + $0xc80] ss:$16 sps:$4 sm:$0xff]  }
 0x138   :  { %v939_v27 = vsel %vm12898_vm4, %v937_v47, %v938_v52  ;;  %v949_v29 = vrot.slane %v938_v52, 4  ;;  %2898 = vmatpush1.bf16.msra.mxu0 %v10637_v50  ;;  %3070 = vmatpush1.bf16.msra.mxu1 %v10640_v54  ;;  %v940_v48 = vrot.slane %v934_v35, 4  ;;  %966 = vst [vmem:[#allocation2 + $0x8] sm:$0xee] %v934_v35  ;;  %v10676_v16 = vld [vmem:[%s15673_s2 + $0xc88] ss:$16 sps:$4 sm:$0xff]  }
 0x139   :  { %969 = vst [vmem:[#allocation2 + $0x20] sm:$0xff] %v939_v27  ;;  %2899 = vmatprep.subr.bf16.mxu0 %v10645_v3  ;;  %3071 = vmatprep.subr.bf16.mxu1 %v10648_v4  ;;  %v941_v56 = vrot.slane %v10291_v36, 7  ;;  %v10684_v52 = vld [vmem:[%s15673_s2 + $0xcac] ss:$16 sps:$4 sm:$0xff]   ;;  %v10682_v4 = vld [vmem:[%s15673_s2 + $0xca8] ss:$16 sps:$4 sm:$0xff]  }
 0x13a   :  { %973 = vst [vmem:[#allocation2 + $0x40] sm:$0x11] %v949_v29 }
 0x13b   :  { %v942_v61 = vsel %vm12898_vm4, %v940_v48, %v941_v56  ;;  %v950_v62 = vrot.slane %v941_v56, 4  ;;  %v10685_v48 = vld [vmem:[%s15673_s2 + $0xcc0] ss:$16 sps:$4 sm:$0xff]   ;;  %v10688_v56 = vld [vmem:[%s15673_s2 + $0xcc8] ss:$16 sps:$4 sm:$0xff]  }
 0x13c   :  { %2900 = vmatpush1.bf16.msra.mxu0 %v10643_v6  ;;  %3072 = vmatpush1.bf16.msra.mxu1 %v10646_v7  ;;  %970 = vst [vmem:[#allocation2 + $0x28] sm:$0xff] %v942_v61 }
 0x13d   :  { %2912 = vmatprep.subr.bf16.mxu0 %v10651_v37  ;;  %3084 = vmatprep.subr.bf16.mxu1 %v10654_v40  ;;  %974 = vst [vmem:[#allocation2 + $0x48] sm:$0x11] %v950_v62 }
 0x13f   :  { %2902 = vmatmul.mubr.bf16.vlgmr.msra.gmra.mrb[16].mxu0 %v12712_v22  ;;  %3074 = vmatmul.mubr.bf16.vlgmr.msra.gmra.mrb[16].mxu1 %v12712_v22  ;;  %v10666_v22 = vld [vmem:[%s15673_s2 + $0xc4c] ss:$16 sps:$4 sm:$0xff]  }
 0x140   :  { %2913 = vmatpush1.bf16.msra.mxu0 %v10649_v43  ;;  %3085 = vmatpush1.bf16.msra.mxu1 %v10652_v46  ;;  %v10687_v43 = vld [vmem:[%s15673_s2 + $0xcc4] ss:$16 sps:$4 sm:$0xff]   ;;  %v10690_v46 = vld [vmem:[%s15673_s2 + $0xccc] ss:$16 sps:$4 sm:$0xff]  }
 0x141   :  { %2914 = vmatprep.subr.bf16.mxu0 %v10657_v57  ;;  %3086 = vmatprep.subr.bf16.mxu1 %v10660_v59 }
 0x142   :  { %2944 = vmatprep.mubr.bf16.mxu0 %v12800_v9  ;;  %3116 = vmatprep.mubr.bf16.mxu1 %v12800_v9  ;;  %v10672_v9 = vld [vmem:[%s15673_s2 + $0xc6c] ss:$16 sps:$4 sm:$0xff]  }
 0x144   :  { %2915 = vmatpush1.bf16.msra.mxu0 %v10655_v5  ;;  %3087 = vmatpush1.bf16.msra.mxu1 %v10658_v11  ;;  %v10693_v11 = vld [vmem:[%s15673_s2 + $0xce4] ss:$16 sps:$4 sm:$0xff]  }
 0x145   :  { %2916 = vmatprep.subr.bf16.mxu0 %v10663_v13  ;;  %3088 = vmatprep.subr.bf16.mxu1 %v10666_v22  ;;  %v10696_v13 = vld [vmem:[%s15673_s2 + $0xcec] ss:$16 sps:$4 sm:$0xff]  }
 0x148   :  { %v822_v30 = vpop.f32.mrb[12].mxu0  ;;  %2917 = vmatpush1.bf16.msra.mxu0 %v10661_v14  ;;  %3089 = vmatpush1.bf16.msra.mxu1 %v10664_v17  ;;  %v10691_v17 = vld [vmem:[%s15673_s2 + $0xce0] ss:$16 sps:$4 sm:$0xff]  }
 0x149   :  { %v823_v34 = vadd.f32 %v822_v30, %v12741_v8  ;;  %v824_v20 = vpop.f32.mrb[13].mxu0  ;;  %2918 = vmatprep.subr.bf16.mxu0 %v10669_v23  ;;  %3090 = vmatprep.subr.bf16.mxu1 %v10672_v9  ;;  %v10694_v23 = vld [vmem:[%s15673_s2 + $0xce8] ss:$16 sps:$4 sm:$0xff]   ;;  %v10702_v30 = vld [vmem:[%s15673_s2 + $0xd0c] ss:$16 sps:$4 sm:$0xff]  }
 0x14a   :  { %v825_v39 = vadd.f32 %v824_v20, %v12744_v15  ;;  %v826_v42 = vpop.f32.mrb[14].mxu0  ;;  %v865_v41 = vpop.f32.mrb[12].mxu1  ;;  %v10705_v20 = vld [vmem:[%s15673_s2 + $0xd24] ss:$16 sps:$4 sm:$0xff]  }
 0x14b   :  { %v878_v50 = vmax.f32 %v823_v34, 0.0  ;;  %v827_v54 = vadd.f32 %v826_v42, %v12741_v8  ;;  %v828_v58 = vpop.f32.mrb[15].mxu0  ;;  %v10681_v8 = vld [vmem:[%s15673_s2 + $0xca4] ss:$16 sps:$4 sm:$0xff]   ;;  %v866_v55 = vadd.f32 %v865_v41, %v12769_v53  ;;  %v867_v3 = vpop.f32.mrb[13].mxu1 }
 0x14c   :  { %v879_v25 = vmax.f32 %v825_v39, 0.0  ;;  %v829_v33 = vadd.f32 %v828_v58, %v12744_v15  ;;  %2919 = vmatpush1.bf16.msra.mxu0 %v10667_v18  ;;  %3091 = vmatpush1.bf16.msra.mxu1 %v10670_v26  ;;  %v10679_v15 = vld [vmem:[%s15673_s2 + $0xca0] ss:$16 sps:$4 sm:$0xff]   ;;  %v868_v6 = vadd.f32 %v867_v3, %v12779_v0  ;;  %v869_v7 = vpop.f32.mrb[14].mxu1  ;;  %v10699_v26 = vld [vmem:[%s15673_s2 + $0xd04] ss:$16 sps:$4 sm:$0xff]  }
 0x14d   :  { %v886_v38 = vmax.f32 %v827_v54, 0.0  ;;  %2920 = vmatprep.subr.bf16.mxu0 %v10675_v21  ;;  %3092 = vmatprep.subr.bf16.mxu1 %v10678_v45  ;;  %v880_v27 = vmax.f32 %v866_v55, 0.0  ;;  %v870_v29 = vadd.f32 %v869_v7, %v12769_v53  ;;  %v871_v32 = vpop.f32.mrb[15].mxu1  ;;  %v10697_v34 = vld [vmem:[%s15673_s2 + $0xd00] ss:$16 sps:$4 sm:$0xff]  }
 0x14e   :  { %v10288_v47 = vpack.c.bf16 %v879_v25, %v878_v50  ;;  %v887_v49 = vmax.f32 %v829_v33, 0.0  ;;  %v881_v36 = vmax.f32 %v868_v6, 0.0  ;;  %v872_v40 = vadd.f32 %v871_v32, %v12779_v0  ;;  %v10708_v39 = vld [vmem:[%s15673_s2 + $0xd2c] ss:$16 sps:$4 sm:$0xff]   ;;  %v10703_v42 = vld [vmem:[%s15673_s2 + $0xd20] ss:$16 sps:$4 sm:$0xff]  }
 0x14f   :  { %v888_v53 = vmax.f32 %v870_v29, 0.0  ;;  %v10706_v21 = vld [vmem:[%s15673_s2 + $0xd28] ss:$16 sps:$4 sm:$0xff]   ;;  %v10711_v45 = vld [vmem:[%s15673_s2 + $0xd44] ss:$16 sps:$4 sm:$0xff]  }
 0x150   :  { %v935_v44 = vrot.slane %v10288_v47, 7  ;;  %v10292_v51 = vpack.c.bf16 %v887_v49, %v886_v38  ;;  %2921 = vmatpush1.bf16.msra.mxu0 %v10673_v60  ;;  %3093 = vmatpush1.bf16.msra.mxu1 %v10676_v16  ;;  %v10289_v0 = vpack.c.bf16 %v881_v36, %v880_v27  ;;  %v889_v61 = vmax.f32 %v872_v40, 0.0  ;;  %v10714_v50 = vld [vmem:[%s15673_s2 + $0xd4c] ss:$16 sps:$4 sm:$0xff]   ;;  %v10709_v54 = vld [vmem:[%s15673_s2 + $0xd40] ss:$16 sps:$4 sm:$0xff]  }
 0x151   :  { %2922 = vmatprep.subr.bf16.mxu0 %v10681_v8  ;;  %3094 = vmatprep.subr.bf16.mxu1 %v10684_v52  ;;  %v10712_v58 = vld [vmem:[%s15673_s2 + $0xd48] ss:$16 sps:$4 sm:$0xff]   ;;  %v10717_v60 = vld [vmem:[%s15673_s2 + $0xd64] ss:$16 sps:$4 sm:$0xff]   ;;  %v10720_v16 = vld [vmem:[%s15673_s2 + $0xd6c] ss:$16 sps:$4 sm:$0xff]  }
 0x152   :  { %v943_v35 = vrot.slane %v935_v44, 4  ;;  %967 = vst [vmem:[#allocation2 + $0x10] sm:$0xee] %v935_v44  ;;  %v944_v37 = vrot.slane %v10292_v51, 7  ;;  %v936_v62 = vrot.slane %v10289_v0, 7  ;;  %v10293_v5 = vpack.c.bf16 %v889_v61, %v888_v53 }
 0x153   :  { %v10715_v25 = vld [vmem:[%s15673_s2 + $0xd60] ss:$16 sps:$4 sm:$0xff]   ;;  %v10718_v33 = vld [vmem:[%s15673_s2 + $0xd68] ss:$16 sps:$4 sm:$0xff]   ;;  %v10723_v38 = vld [vmem:[%s15673_s2 + $0xd84] ss:$16 sps:$4 sm:$0xff]  }
 0x154   :  { %v945_v57 = vsel %vm12898_vm4, %v943_v35, %v944_v37  ;;  %v951_v59 = vrot.slane %v944_v37, 4  ;;  %2923 = vmatpush1.bf16.msra.mxu0 %v10679_v15  ;;  %3095 = vmatpush1.bf16.msra.mxu1 %v10682_v4  ;;  %v946_v22 = vrot.slane %v936_v62, 4  ;;  %968 = vst [vmem:[#allocation2 + $0x18] sm:$0xee] %v936_v62  ;;  %v947_v14 = vrot.slane %v10293_v5, 7 }
 0x155   :  { %971 = vst [vmem:[#allocation2 + $0x30] sm:$0xff] %v945_v57  ;;  %2924 = vmatprep.subr.bf16.mxu0 %v10687_v43  ;;  %3096 = vmatprep.subr.bf16.mxu1 %v10690_v46  ;;  %v10726_v41 = vld [vmem:[%s15673_s2 + $0xd8c] ss:$16 sps:$4 sm:$0xff]   ;;  %v10721_v47 = vld [vmem:[%s15673_s2 + $0xd80] ss:$16 sps:$4 sm:$0xff]  }
 0x156   :  { %975 = vst [vmem:[#allocation2 + $0x50] sm:$0x11] %v951_v59  ;;  %v948_v9 = vsel %vm12898_vm4, %v946_v22, %v947_v14  ;;  %v952_v18 = vrot.slane %v947_v14, 4  ;;  %v10724_v49 = vld [vmem:[%s15673_s2 + $0xd88] ss:$16 sps:$4 sm:$0xff]  }
 0x157   :  { %972 = vst [vmem:[#allocation2 + $0x38] sm:$0xff] %v948_v9  ;;  %v10729_v8 = vld [vmem:[%s15673_s2 + $0xda4] ss:$16 sps:$4 sm:$0xff]   ;;  %v10732_v52 = vld [vmem:[%s15673_s2 + $0xdac] ss:$16 sps:$4 sm:$0xff]  }
 0x158   :  { %2925 = vmatpush1.bf16.msra.mxu0 %v10685_v48  ;;  %3097 = vmatpush1.bf16.msra.mxu1 %v10688_v56  ;;  %976 = vst [vmem:[#allocation2 + $0x58] sm:$0x11] %v952_v18  ;;  %v10727_v55 = vld [vmem:[%s15673_s2 + $0xda0] ss:$16 sps:$4 sm:$0xff]   ;;  %v10730_v3 = vld [vmem:[%s15673_s2 + $0xda8] ss:$16 sps:$4 sm:$0xff]  }
 0x159   :  { %2926 = vmatprep.subr.bf16.mxu0 %v10693_v11  ;;  %3098 = vmatprep.subr.bf16.mxu1 %v10696_v13  ;;  %v10735_v15 = vld [vmem:[%s15673_s2 + $0xdc4] ss:$16 sps:$4 sm:$0xff]   ;;  %v10738_v4 = vld [vmem:[%s15673_s2 + $0xdcc] ss:$16 sps:$4 sm:$0xff]   ;;  %v10733_v44 = vld [vmem:[%s15673_s2 + $0xdc0] ss:$16 sps:$4 sm:$0xff]  }
 0x15a   :  { %v10736_v6 = vld [vmem:[%s15673_s2 + $0xdc8] ss:$16 sps:$4 sm:$0xff]   ;;  %v10741_v7 = vld [vmem:[%s15673_s2 + $0xde4] ss:$16 sps:$4 sm:$0xff]   ;;  %v10744_v51 = vld [vmem:[%s15673_s2 + $0xdec] ss:$16 sps:$4 sm:$0xff]  }
 0x15b   :  { %v10739_v27 = vld [vmem:[%s15673_s2 + $0xde0] ss:$16 sps:$4 sm:$0xff]   ;;  %v10742_v29 = vld [vmem:[%s15673_s2 + $0xde8] ss:$16 sps:$4 sm:$0xff]   ;;  %v10747_v32 = vld [vmem:[%s15673_s2 + $0xe04] ss:$16 sps:$4 sm:$0xff]  }
 0x15c   :  { %2927 = vmatpush1.bf16.msra.mxu0 %v10691_v17  ;;  %3099 = vmatpush1.bf16.msra.mxu1 %v10694_v23  ;;  %v10750_v35 = vld [vmem:[%s15673_s2 + $0xe0c] ss:$16 sps:$4 sm:$0xff]   ;;  %v10745_v36 = vld [vmem:[%s15673_s2 + $0xe00] ss:$16 sps:$4 sm:$0xff]   ;;  %v10748_v37 = vld [vmem:[%s15673_s2 + $0xe08] ss:$16 sps:$4 sm:$0xff]  }
 0x15d   :  { %2928 = vmatprep.subr.bf16.mxu0 %v10699_v26  ;;  %3100 = vmatprep.subr.bf16.mxu1 %v10702_v30  ;;  %v10753_v40 = vld [vmem:[%s15673_s2 + $0xe24] ss:$16 sps:$4 sm:$0xff]   ;;  %v10756_v43 = vld [vmem:[%s15673_s2 + $0xe2c] ss:$16 sps:$4 sm:$0xff]   ;;  %v10751_v46 = vld [vmem:[%s15673_s2 + $0xe20] ss:$16 sps:$4 sm:$0xff]  }
 0x15e   :  { %v10754_v53 = vld [vmem:[%s15673_s2 + $0xe28] ss:$16 sps:$4 sm:$0xff]   ;;  %v10759_v48 = vld [vmem:[%s15673_s2 + $0xe44] ss:$16 sps:$4 sm:$0xff]   ;;  %v10757_v56 = vld [vmem:[%s15673_s2 + $0xe40] ss:$16 sps:$4 sm:$0xff]  }
 0x15f   :  { %v10760_v0 = vld [vmem:[%s15673_s2 + $0xe48] ss:$16 sps:$4 sm:$0xff]   ;;  %v10763_v57 = vld [vmem:[%s15673_s2 + $0xe60] ss:$16 sps:$4 sm:$0xff]   ;;  %v10768_v59 = vld [vmem:[%s15673_s2 + $0xe6c] ss:$16 sps:$4 sm:$0xff]  }
 0x160   :  { %2929 = vmatpush1.bf16.msra.mxu0 %v10697_v34  ;;  %3101 = vmatpush1.bf16.msra.mxu1 %v10700_v31  ;;  %v10766_v61 = vld [vmem:[%s15673_s2 + $0xe68] ss:$16 sps:$4 sm:$0xff]   ;;  %v10771_v62 = vld [vmem:[%s15673_s2 + $0xe84] ss:$16 sps:$4 sm:$0xff]   ;;  %v10769_v5 = vld [vmem:[%s15673_s2 + $0xe80] ss:$16 sps:$4 sm:$0xff]  }
 0x161   :  { %2930 = vmatprep.subr.bf16.mxu0 %v10705_v20  ;;  %3102 = vmatprep.subr.bf16.mxu1 %v10708_v39  ;;  %v10774_v11 = vld [vmem:[%s15673_s2 + $0xe8c] ss:$16 sps:$4 sm:$0xff]   ;;  %v10772_v13 = vld [vmem:[%s15673_s2 + $0xe88] ss:$16 sps:$4 sm:$0xff]   ;;  %v10777_v22 = vld [vmem:[%s15673_s2 + $0xea4] ss:$16 sps:$4 sm:$0xff]  }
 0x162   :  { %v10775_v14 = vld [vmem:[%s15673_s2 + $0xea0] ss:$16 sps:$4 sm:$0xff]   ;;  %v10780_v17 = vld [vmem:[%s15673_s2 + $0xeac] ss:$16 sps:$4 sm:$0xff]   ;;  %v10778_v23 = vld [vmem:[%s15673_s2 + $0xea8] ss:$16 sps:$4 sm:$0xff]  }
 0x163   :  { %v10783_v9 = vld [vmem:[%s15673_s2 + $0xec4] ss:$16 sps:$4 sm:$0xff]   ;;  %v10781_v18 = vld [vmem:[%s15673_s2 + $0xec0] ss:$16 sps:$4 sm:$0xff]   ;;  %v10786_v26 = vld [vmem:[%s15673_s2 + $0xecc] ss:$16 sps:$4 sm:$0xff]  }
 0x164   :  { %2931 = vmatpush1.bf16.msra.mxu0 %v10703_v42  ;;  %3103 = vmatpush1.bf16.msra.mxu1 %v10706_v21  ;;  %v10784_v30 = vld [vmem:[%s15673_s2 + $0xec8] ss:$16 sps:$4 sm:$0xff]   ;;  %v10789_v34 = vld [vmem:[%s15673_s2 + $0xee4] ss:$16 sps:$4 sm:$0xff]   ;;  %v10787_v31 = vld [vmem:[%s15673_s2 + $0xee0] ss:$16 sps:$4 sm:$0xff]  }
 0x165   :  { %2932 = vmatprep.subr.bf16.mxu0 %v10711_v45  ;;  %3104 = vmatprep.subr.bf16.mxu1 %v10714_v50  ;;  %v10792_v20 = vld [vmem:[%s15673_s2 + $0xeec] ss:$16 sps:$4 sm:$0xff]   ;;  %v10790_v39 = vld [vmem:[%s15673_s2 + $0xee8] ss:$16 sps:$4 sm:$0xff]   ;;  %v10795_v42 = vld [vmem:[%s15673_s2 + $0xf04] ss:$16 sps:$4 sm:$0xff]  }
 0x166   :  { %v10793_v21 = vld [vmem:[%s15673_s2 + $0xf00] ss:$16 sps:$4 sm:$0xff]   ;;  %v10798_v45 = vld [vmem:[%s15673_s2 + $0xf0c] ss:$16 sps:$4 sm:$0xff]   ;;  %v10796_v50 = vld [vmem:[%s15673_s2 + $0xf08] ss:$16 sps:$4 sm:$0xff]  }
 0x168   :  { %2933 = vmatpush1.bf16.msra.mxu0 %v10709_v54  ;;  %3105 = vmatpush1.bf16.msra.mxu1 %v10712_v58  ;;  %v10801_v54 = vld [vmem:[%s15673_s2 + $0xf24] ss:$16 sps:$4 sm:$0xff]   ;;  %v10799_v58 = vld [vmem:[%s15673_s2 + $0xf20] ss:$16 sps:$4 sm:$0xff]  }
 0x169   :  { %2934 = vmatprep.subr.bf16.mxu0 %v10717_v60  ;;  %3106 = vmatprep.subr.bf16.mxu1 %v10720_v16  ;;  %v10804_v60 = vld [vmem:[%s15673_s2 + $0xf2c] ss:$16 sps:$4 sm:$0xff]   ;;  %v10802_v16 = vld [vmem:[%s15673_s2 + $0xf28] ss:$16 sps:$4 sm:$0xff]  }
 0x16c   :  { %2935 = vmatpush1.bf16.msra.mxu0 %v10715_v25  ;;  %3107 = vmatpush1.bf16.msra.mxu1 %v10718_v33  ;;  %v10807_v25 = vld [vmem:[%s15673_s2 + $0xf44] ss:$16 sps:$4 sm:$0xff]   ;;  %v10805_v33 = vld [vmem:[%s15673_s2 + $0xf40] ss:$16 sps:$4 sm:$0xff]  }
 0x16d   :  { %2936 = vmatprep.subr.bf16.mxu0 %v10723_v38  ;;  %3108 = vmatprep.subr.bf16.mxu1 %v10726_v41  ;;  %v10810_v38 = vld [vmem:[%s15673_s2 + $0xf4c] ss:$16 sps:$4 sm:$0xff]   ;;  %v10808_v41 = vld [vmem:[%s15673_s2 + $0xf48] ss:$16 sps:$4 sm:$0xff]  }
 0x170   :  { %2937 = vmatpush1.bf16.msra.mxu0 %v10721_v47  ;;  %3109 = vmatpush1.bf16.msra.mxu1 %v10724_v49  ;;  %v10813_v47 = vld [vmem:[%s15673_s2 + $0xf64] ss:$16 sps:$4 sm:$0xff]   ;;  %v10811_v49 = vld [vmem:[%s15673_s2 + $0xf60] ss:$16 sps:$4 sm:$0xff]  }
 0x171   :  { %2938 = vmatprep.subr.bf16.mxu0 %v10729_v8  ;;  %3110 = vmatprep.subr.bf16.mxu1 %v10732_v52  ;;  %v10816_v8 = vld [vmem:[%s15673_s2 + $0xf6c] ss:$16 sps:$4 sm:$0xff]   ;;  %v10814_v52 = vld [vmem:[%s15673_s2 + $0xf68] ss:$16 sps:$4 sm:$0xff]  }
 0x174   :  { %2939 = vmatpush1.bf16.msra.mxu0 %v10727_v55  ;;  %3111 = vmatpush1.bf16.msra.mxu1 %v10730_v3  ;;  %v10819_v55 = vld [vmem:[%s15673_s2 + $0xf84] ss:$16 sps:$4 sm:$0xff]   ;;  %v10817_v3 = vld [vmem:[%s15673_s2 + $0xf80] ss:$16 sps:$4 sm:$0xff]  }
 0x175   :  { %2940 = vmatprep.subr.bf16.mxu0 %v10735_v15  ;;  %3112 = vmatprep.subr.bf16.mxu1 %v10738_v4  ;;  %v10822_v15 = vld [vmem:[%s15673_s2 + $0xf8c] ss:$16 sps:$4 sm:$0xff]   ;;  %v10820_v4 = vld [vmem:[%s15673_s2 + $0xf88] ss:$16 sps:$4 sm:$0xff]  }
 0x178   :  { %2941 = vmatpush1.bf16.msra.mxu0 %v10733_v44  ;;  %3113 = vmatpush1.bf16.msra.mxu1 %v10736_v6  ;;  %v10825_v44 = vld [vmem:[%s15673_s2 + $0xfa4] ss:$16 sps:$4 sm:$0xff]   ;;  %v10823_v6 = vld [vmem:[%s15673_s2 + $0xfa0] ss:$16 sps:$4 sm:$0xff]  }
 0x179   :  { %2942 = vmatprep.subr.bf16.mxu0 %v10741_v7  ;;  %3114 = vmatprep.subr.bf16.mxu1 %v10744_v51  ;;  %v10828_v7 = vld [vmem:[%s15673_s2 + $0xfac] ss:$16 sps:$4 sm:$0xff]   ;;  %v10826_v51 = vld [vmem:[%s15673_s2 + $0xfa8] ss:$16 sps:$4 sm:$0xff]  }
 0x17c   :  { %2943 = vmatpush1.bf16.msra.mxu0 %v10739_v27  ;;  %3115 = vmatpush1.bf16.msra.mxu1 %v10742_v29  ;;  %v10831_v27 = vld [vmem:[%s15673_s2 + $0xfc4] ss:$16 sps:$4 sm:$0xff]   ;;  %v10829_v29 = vld [vmem:[%s15673_s2 + $0xfc0] ss:$16 sps:$4 sm:$0xff]  }
 0x17d   :  { %2955 = vmatprep.subr.bf16.mxu0 %v10747_v32  ;;  %3127 = vmatprep.subr.bf16.mxu1 %v10750_v35  ;;  %v10834_v32 = vld [vmem:[%s15673_s2 + $0xfcc] ss:$16 sps:$4 sm:$0xff]   ;;  %v10832_v35 = vld [vmem:[%s15673_s2 + $0xfc8] ss:$16 sps:$4 sm:$0xff]  }
 0x17f   :  { %2945 = vmatmul.mubr.bf16.vlgmr.msra.gmra.mrb[16].mxu0 %v12798_v2  ;;  %3117 = vmatmul.mubr.bf16.vlgmr.msra.gmra.mrb[16].mxu1 %v12798_v2  ;;  %v10762_v2 = vld [vmem:[%s15673_s2 + $0xe4c] ss:$16 sps:$4 sm:$0xff]  }
 0x180   :  { %2956 = vmatpush1.bf16.msra.mxu0 %v10745_v36  ;;  %2987 = vmatprep.mubr.bf16.mxu0 %v12828_v1  ;;  %v10837_v36 = vld [vmem:[%s15673_s2 + $0xfe4] ss:$16 sps:$4 sm:$0xff]  }
 0x181   :  { %3128 = vmatpush1.bf16.msra.mxu1 %v10748_v37  ;;  %3159 = vmatprep.mubr.bf16.mxu1 %v12828_v1  ;;  %v10765_v1 = vld [vmem:[%s15673_s2 + $0xe64] ss:$16 sps:$4 sm:$0xff]   ;;  %v10835_v37 = vld [vmem:[%s15673_s2 + $0xfe0] ss:$16 sps:$4 sm:$0xff]  }
 0x182   :  { %2957 = vmatprep.subr.bf16.mxu0 %v10753_v40  ;;  %3129 = vmatprep.subr.bf16.mxu1 %v10756_v43  ;;  %v10840_v40 = vld [vmem:[%s15673_s2 + $0xfec] ss:$16 sps:$4 sm:$0xff]   ;;  %v10838_v43 = vld [vmem:[%s15673_s2 + $0xfe8] ss:$16 sps:$4 sm:$0xff]  }
 0x184   :  { %2958 = vmatpush1.bf16.msra.mxu0 %v10751_v46  ;;  %v10843_v46 = vld [vmem:[%s15673_s2 + $0x4] ss:$16 sps:$4 sm:$0xff]  }
 0x185   :  { %3130 = vmatpush1.bf16.msra.mxu1 %v10754_v53  ;;  %2959 = vmatprep.subr.bf16.mxu0 %v10759_v48  ;;  %v10846_v53 = vld [vmem:[%s15673_s2 + $0xc] ss:$16 sps:$4 sm:$0xff]   ;;  %v10841_v48 = vld [vmem:[%s15673_s2] ss:$16 sps:$4 sm:$0xff]  }
 0x186   :  { %3131 = vmatprep.subr.bf16.mxu1 %v10762_v2  ;;  %v13333_v2 = vld [vmem:[#allocation2] sm:$0xff] }
 0x188   :  { %2960 = vmatpush1.bf16.msra.mxu0 %v10757_v56  ;;  %v10844_v56 = vld [vmem:[%s15673_s2 + $0x8] ss:$16 sps:$4 sm:$0xff]  }
 0x189   :  { %3132 = vmatpush1.bf16.msra.mxu1 %v10760_v0  ;;  %2961 = vmatprep.subr.bf16.mxu0 %v10765_v1  ;;  %v10849_v0 = vld [vmem:[%s15673_s2 + $0x24] ss:$16 sps:$4 sm:$0xff]  }
 0x18a   :  { %3133 = vmatprep.subr.bf16.mxu1 %v10768_v59  ;;  %v13342_v1 = vld [vmem:[#allocation2 + $0x20] sm:$0xff] }
 0x18b   :  { %v10847_v59 = vld [vmem:[%s15673_s2 + $0x20] ss:$16 sps:$4 sm:$0xff]  }
 0x18c   :  { %2962 = vmatpush1.bf16.msra.mxu0 %v10763_v57  ;;  %v9150_v57 = vcombine.high %v13333_v2, %v13342_v1 }
 0x18d   :  { %3134 = vmatpush1.bf16.msra.mxu1 %v10766_v61  ;;  %2963 = vmatprep.subr.bf16.mxu0 %v10771_v62  ;;  %v10850_v61 = vld [vmem:[%s15673_s2 + $0x28] ss:$16 sps:$4 sm:$0xff]   ;;  %v10852_v62 = vld [vmem:[%s15673_s2 + $0x2c] ss:$16 sps:$4 sm:$0xff]  }
 0x18e   :  { %3135 = vmatprep.subr.bf16.mxu1 %v10774_v11  ;;  %v10858_v11 = vld [vmem:[%s15673_s2 + $0x4c] ss:$16 sps:$4 sm:$0xff]  }
 0x190   :  { %2964 = vmatpush1.bf16.msra.mxu0 %v10769_v5  ;;  %v10855_v5 = vld [vmem:[%s15673_s2 + $0x44] ss:$16 sps:$4 sm:$0xff]  }
 0x191   :  { %3136 = vmatpush1.bf16.msra.mxu1 %v10772_v13  ;;  %2965 = vmatprep.subr.bf16.mxu0 %v10777_v22  ;;  %v10853_v13 = vld [vmem:[%s15673_s2 + $0x40] ss:$16 sps:$4 sm:$0xff]   ;;  %v10861_v22 = vld [vmem:[%s15673_s2 + $0x64] ss:$16 sps:$4 sm:$0xff]  }
 0x192   :  { %3137 = vmatprep.subr.bf16.mxu1 %v10780_v17  ;;  %v10864_v17 = vld [vmem:[%s15673_s2 + $0x6c] ss:$16 sps:$4 sm:$0xff]  }
 0x194   :  { %2966 = vmatpush1.bf16.msra.mxu0 %v10775_v14  ;;  %v10859_v14 = vld [vmem:[%s15673_s2 + $0x60] ss:$16 sps:$4 sm:$0xff]  }
 0x195   :  { %3138 = vmatpush1.bf16.msra.mxu1 %v10778_v23  ;;  %2967 = vmatprep.subr.bf16.mxu0 %v10783_v9  ;;  %v10862_v23 = vld [vmem:[%s15673_s2 + $0x68] ss:$16 sps:$4 sm:$0xff]   ;;  %v10867_v9 = vld [vmem:[%s15673_s2 + $0x84] ss:$16 sps:$4 sm:$0xff]  }
 0x196   :  { %3139 = vmatprep.subr.bf16.mxu1 %v10786_v26  ;;  %v10870_v26 = vld [vmem:[%s15673_s2 + $0x8c] ss:$16 sps:$4 sm:$0xff]  }
 0x198   :  { %2968 = vmatpush1.bf16.msra.mxu0 %v10781_v18  ;;  %v10865_v18 = vld [vmem:[%s15673_s2 + $0x80] ss:$16 sps:$4 sm:$0xff]  }
 0x199   :  { %3140 = vmatpush1.bf16.msra.mxu1 %v10784_v30  ;;  %2969 = vmatprep.subr.bf16.mxu0 %v10789_v34  ;;  %v10868_v30 = vld [vmem:[%s15673_s2 + $0x88] ss:$16 sps:$4 sm:$0xff]   ;;  %v10873_v34 = vld [vmem:[%s15673_s2 + $0xa4] ss:$16 sps:$4 sm:$0xff]  }
 0x19a   :  { %3141 = vmatprep.subr.bf16.mxu1 %v10792_v20  ;;  %v10876_v20 = vld [vmem:[%s15673_s2 + $0xac] ss:$16 sps:$4 sm:$0xff]  }
 0x19c   :  { %2970 = vmatpush1.bf16.msra.mxu0 %v10787_v31  ;;  %v10871_v31 = vld [vmem:[%s15673_s2 + $0xa0] ss:$16 sps:$4 sm:$0xff]  }
 0x19d   :  { %3142 = vmatpush1.bf16.msra.mxu1 %v10790_v39  ;;  %2971 = vmatprep.subr.bf16.mxu0 %v10795_v42  ;;  %v10874_v39 = vld [vmem:[%s15673_s2 + $0xa8] ss:$16 sps:$4 sm:$0xff]   ;;  %v10879_v42 = vld [vmem:[%s15673_s2 + $0xc4] ss:$16 sps:$4 sm:$0xff]  }
 0x19e   :  { %3143 = vmatprep.subr.bf16.mxu1 %v10798_v45  ;;  %v10882_v45 = vld [vmem:[%s15673_s2 + $0xcc] ss:$16 sps:$4 sm:$0xff]  }
 0x1a0   :  { %2972 = vmatpush1.bf16.msra.mxu0 %v10793_v21  ;;  %v10877_v21 = vld [vmem:[%s15673_s2 + $0xc0] ss:$16 sps:$4 sm:$0xff]  }
 0x1a1   :  { %3144 = vmatpush1.bf16.msra.mxu1 %v10796_v50  ;;  %2973 = vmatprep.subr.bf16.mxu0 %v10801_v54  ;;  %v10880_v50 = vld [vmem:[%s15673_s2 + $0xc8] ss:$16 sps:$4 sm:$0xff]   ;;  %v10885_v54 = vld [vmem:[%s15673_s2 + $0xe4] ss:$16 sps:$4 sm:$0xff]  }
 0x1a2   :  { %3145 = vmatprep.subr.bf16.mxu1 %v10804_v60  ;;  %v10888_v60 = vld [vmem:[%s15673_s2 + $0xec] ss:$16 sps:$4 sm:$0xff]  }
 0x1a4   :  { %2974 = vmatpush1.bf16.msra.mxu0 %v10799_v58  ;;  %v10883_v58 = vld [vmem:[%s15673_s2 + $0xe0] ss:$16 sps:$4 sm:$0xff]  }
 0x1a5   :  { %3146 = vmatpush1.bf16.msra.mxu1 %v10802_v16  ;;  %2975 = vmatprep.subr.bf16.mxu0 %v10807_v25  ;;  %v10886_v16 = vld [vmem:[%s15673_s2 + $0xe8] ss:$16 sps:$4 sm:$0xff]   ;;  %v10891_v25 = vld [vmem:[%s15673_s2 + $0x104] ss:$16 sps:$4 sm:$0xff]  }
 0x1a6   :  { %3147 = vmatprep.subr.bf16.mxu1 %v10810_v38  ;;  %v10894_v38 = vld [vmem:[%s15673_s2 + $0x10c] ss:$16 sps:$4 sm:$0xff]  }
 0x1a8   :  { %2976 = vmatpush1.bf16.msra.mxu0 %v10805_v33  ;;  %v10889_v33 = vld [vmem:[%s15673_s2 + $0x100] ss:$16 sps:$4 sm:$0xff]  }
 0x1a9   :  { %3148 = vmatpush1.bf16.msra.mxu1 %v10808_v41  ;;  %2977 = vmatprep.subr.bf16.mxu0 %v10813_v47  ;;  %v10892_v41 = vld [vmem:[%s15673_s2 + $0x108] ss:$16 sps:$4 sm:$0xff]   ;;  %v10897_v47 = vld [vmem:[%s15673_s2 + $0x124] ss:$16 sps:$4 sm:$0xff]  }
 0x1aa   :  { %3149 = vmatprep.subr.bf16.mxu1 %v10816_v8  ;;  %v10900_v8 = vld [vmem:[%s15673_s2 + $0x12c] ss:$16 sps:$4 sm:$0xff]  }
 0x1ac   :  { %2978 = vmatpush1.bf16.msra.mxu0 %v10811_v49  ;;  %v10895_v49 = vld [vmem:[%s15673_s2 + $0x120] ss:$16 sps:$4 sm:$0xff]  }
 0x1ad   :  { %3150 = vmatpush1.bf16.msra.mxu1 %v10814_v52  ;;  %2979 = vmatprep.subr.bf16.mxu0 %v10819_v55  ;;  %v10898_v52 = vld [vmem:[%s15673_s2 + $0x128] ss:$16 sps:$4 sm:$0xff]   ;;  %v10903_v55 = vld [vmem:[%s15673_s2 + $0x144] ss:$16 sps:$4 sm:$0xff]  }
 0x1ae   :  { %3151 = vmatprep.subr.bf16.mxu1 %v10822_v15  ;;  %v10906_v15 = vld [vmem:[%s15673_s2 + $0x14c] ss:$16 sps:$4 sm:$0xff]  }
 0x1b0   :  { %2980 = vmatpush1.bf16.msra.mxu0 %v10817_v3  ;;  %v10901_v3 = vld [vmem:[%s15673_s2 + $0x140] ss:$16 sps:$4 sm:$0xff]  }
 0x1b1   :  { %3152 = vmatpush1.bf16.msra.mxu1 %v10820_v4  ;;  %2981 = vmatprep.subr.bf16.mxu0 %v10825_v44  ;;  %v10904_v4 = vld [vmem:[%s15673_s2 + $0x148] ss:$16 sps:$4 sm:$0xff]   ;;  %v10909_v44 = vld [vmem:[%s15673_s2 + $0x164] ss:$16 sps:$4 sm:$0xff]  }
 0x1b2   :  { %3153 = vmatprep.subr.bf16.mxu1 %v10828_v7  ;;  %v10912_v7 = vld [vmem:[%s15673_s2 + $0x16c] ss:$16 sps:$4 sm:$0xff]  }
 0x1b4   :  { %2982 = vmatpush1.bf16.msra.mxu0 %v10823_v6  ;;  %v10907_v6 = vld [vmem:[%s15673_s2 + $0x160] ss:$16 sps:$4 sm:$0xff]  }
 0x1b5   :  { %3154 = vmatpush1.bf16.msra.mxu1 %v10826_v51  ;;  %2983 = vmatprep.subr.bf16.mxu0 %v10831_v27  ;;  %v10910_v51 = vld [vmem:[%s15673_s2 + $0x168] ss:$16 sps:$4 sm:$0xff]   ;;  %v10915_v27 = vld [vmem:[%s15673_s2 + $0x184] ss:$16 sps:$4 sm:$0xff]  }
 0x1b6   :  { %3155 = vmatprep.subr.bf16.mxu1 %v10834_v32  ;;  %v10918_v32 = vld [vmem:[%s15673_s2 + $0x18c] ss:$16 sps:$4 sm:$0xff]  }
 0x1b8   :  { %2984 = vmatpush1.bf16.msra.mxu0 %v10829_v29  ;;  %v10913_v29 = vld [vmem:[%s15673_s2 + $0x180] ss:$16 sps:$4 sm:$0xff]  }
 0x1b9   :  { %3156 = vmatpush1.bf16.msra.mxu1 %v10832_v35  ;;  %2985 = vmatprep.subr.bf16.mxu0 %v10837_v36  ;;  %v10916_v35 = vld [vmem:[%s15673_s2 + $0x188] ss:$16 sps:$4 sm:$0xff]   ;;  %v10921_v36 = vld [vmem:[%s15673_s2 + $0x1a4] ss:$16 sps:$4 sm:$0xff]  }
 0x1ba   :  { %3157 = vmatprep.subr.bf16.mxu1 %v10840_v40  ;;  %v10924_v40 = vld [vmem:[%s15673_s2 + $0x1ac] ss:$16 sps:$4 sm:$0xff]  }
 0x1bc   :  { %2986 = vmatpush1.bf16.msra.mxu0 %v10835_v37  ;;  %v10919_v37 = vld [vmem:[%s15673_s2 + $0x1a0] ss:$16 sps:$4 sm:$0xff]  }
 0x1bd   :  { %3158 = vmatpush1.bf16.msra.mxu1 %v10838_v43  ;;  %4490 = vmatprep.subr.bf16.mxu0 %v10843_v46 }
 0x1be   :  { %4662 = vmatprep.subr.bf16.mxu1 %v10846_v53 }
 0x1bf   :  { %2988 = vmatmul.mubr.bf16.vlgmr.msra.gmra.mrb[16].mxu0 %v12826_v63 }
 0x1c0   :  { %3160 = vmatmul.mubr.bf16.vlgmr.msra.gmra.mrb[16].mxu1 %v12826_v63  ;;  %4491 = vmatpush1.bf16.msra.mxu0 %v10841_v48  ;;  %v10856_v63 = vld [vmem:[%s15673_s2 + $0x48] ss:$16 sps:$4 sm:$0xff]  }
 0x1c1   :  { %4522 = vmatprep.mubr.bf16.mxu0 %v9150_v57  ;;  %4663 = vmatpush1.bf16.msra.mxu1 %v10844_v56 }
 0x1c2   :  { %4694 = vmatprep.mubr.bf16.mxu1 %v9150_v57  ;;  %4492 = vmatprep.subr.bf16.mxu0 %v10849_v0 }
 0x1c3   :  { %4664 = vmatprep.subr.bf16.mxu1 %v10852_v62 }
 0x1c4   :  { %4493 = vmatpush1.bf16.msra.mxu0 %v10847_v59 }
 0x1c5   :  { %4665 = vmatpush1.bf16.msra.mxu1 %v10850_v61  ;;  %4494 = vmatprep.subr.bf16.mxu0 %v10855_v5 }
 0x1c6   :  { %4666 = vmatprep.subr.bf16.mxu1 %v10858_v11 }
 0x1c8   :  { %4495 = vmatpush1.bf16.msra.mxu0 %v10853_v13 }
 0x1c9   :  { %4667 = vmatpush1.bf16.msra.mxu1 %v10856_v63  ;;  %4496 = vmatprep.subr.bf16.mxu0 %v10861_v22 }
 0x1ca   :  { %4668 = vmatprep.subr.bf16.mxu1 %v10864_v17 }
 0x1cc   :  { %4497 = vmatpush1.bf16.msra.mxu0 %v10859_v14 }
 0x1cd   :  { %4669 = vmatpush1.bf16.msra.mxu1 %v10862_v23  ;;  %4498 = vmatprep.subr.bf16.mxu0 %v10867_v9 }
 0x1ce   :  { %4670 = vmatprep.subr.bf16.mxu1 %v10870_v26 }
 0x1d0   :  { %4499 = vmatpush1.bf16.msra.mxu0 %v10865_v18 }
 0x1d1   :  { %4671 = vmatpush1.bf16.msra.mxu1 %v10868_v30  ;;  %4500 = vmatprep.subr.bf16.mxu0 %v10873_v34 }
 0x1d2   :  { %4672 = vmatprep.subr.bf16.mxu1 %v10876_v20 }
 0x1d4   :  { %4501 = vmatpush1.bf16.msra.mxu0 %v10871_v31 }
 0x1d5   :  { %4673 = vmatpush1.bf16.msra.mxu1 %v10874_v39  ;;  %4502 = vmatprep.subr.bf16.mxu0 %v10879_v42 }
 0x1d6   :  { %4674 = vmatprep.subr.bf16.mxu1 %v10882_v45 }
 0x1d8   :  { %4503 = vmatpush1.bf16.msra.mxu0 %v10877_v21 }
 0x1d9   :  { %4675 = vmatpush1.bf16.msra.mxu1 %v10880_v50  ;;  %4504 = vmatprep.subr.bf16.mxu0 %v10885_v54 }
 0x1da   :  { %4676 = vmatprep.subr.bf16.mxu1 %v10888_v60 }
 0x1dc   :  { %4505 = vmatpush1.bf16.msra.mxu0 %v10883_v58 }
 0x1dd   :  { %4677 = vmatpush1.bf16.msra.mxu1 %v10886_v16  ;;  %4506 = vmatprep.subr.bf16.mxu0 %v10891_v25 }
 0x1de   :  { %4678 = vmatprep.subr.bf16.mxu1 %v10894_v38 }
 0x1e0   :  { %4507 = vmatpush1.bf16.msra.mxu0 %v10889_v33 }
 0x1e1   :  { %4679 = vmatpush1.bf16.msra.mxu1 %v10892_v41  ;;  %4508 = vmatprep.subr.bf16.mxu0 %v10897_v47 }
 0x1e2   :  { %4680 = vmatprep.subr.bf16.mxu1 %v10900_v8 }
 0x1e4   :  { %4509 = vmatpush1.bf16.msra.mxu0 %v10895_v49 }
 0x1e5   :  { %4681 = vmatpush1.bf16.msra.mxu1 %v10898_v52  ;;  %4510 = vmatprep.subr.bf16.mxu0 %v10903_v55 }
 0x1e6   :  { %4682 = vmatprep.subr.bf16.mxu1 %v10906_v15 }
 0x1e8   :  { %4511 = vmatpush1.bf16.msra.mxu0 %v10901_v3 }
 0x1e9   :  { %4683 = vmatpush1.bf16.msra.mxu1 %v10904_v4  ;;  %4512 = vmatprep.subr.bf16.mxu0 %v10909_v44 }
 0x1ea   :  { %4684 = vmatprep.subr.bf16.mxu1 %v10912_v7 }
 0x1ec   :  { %4513 = vmatpush1.bf16.msra.mxu0 %v10907_v6 }
 0x1ed   :  { %4685 = vmatpush1.bf16.msra.mxu1 %v10910_v51  ;;  %4514 = vmatprep.subr.bf16.mxu0 %v10915_v27 }
 0x1ee   :  { %4686 = vmatprep.subr.bf16.mxu1 %v10918_v32 }
 0x1f0   :  { %4515 = vmatpush1.bf16.msra.mxu0 %v10913_v29 }
 0x1f1   :  { %14 = vsyncpa [#allocation5], 0  ;;  %4687 = vmatpush1.bf16.msra.mxu1 %v10916_v35  ;;  %4516 = vmatprep.subr.bf16.mxu0 %v10921_v36  ;;  %v10922_v43 = vld [vmem:[%s15673_s2 + $0x1a8] ss:$16 sps:$4 sm:$0xff]   ;;  %v10927_v46 = vld [vmem:[%s15673_s2 + $0x1c4] ss:$16 sps:$4 sm:$0xff]   ;;  %v9149_v63 = vcombine.low %v13333_v2, %v13342_v1 }
 0x1f2   :  { %4688 = vmatprep.subr.bf16.mxu1 %v10924_v40  ;;  %v10930_v53 = vld [vmem:[%s15673_s2 + $0x1cc] ss:$16 sps:$4 sm:$0xff]   ;;  %v10925_v48 = vld [vmem:[%s15673_s2 + $0x1c0] ss:$16 sps:$4 sm:$0xff]   ;;  %v10928_v56 = vld [vmem:[%s15673_s2 + $0x1c8] ss:$16 sps:$4 sm:$0xff]  }
 0x1f3   :  { %v10933_v0 = vld [vmem:[%s15673_s2 + $0x1e4] ss:$16 sps:$4 sm:$0xff]   ;;  %v10936_v57 = vld [vmem:[%s15673_s2 + $0x1ec] ss:$16 sps:$4 sm:$0xff]   ;;  %v10931_v59 = vld [vmem:[%s15673_s2 + $0x1e0] ss:$16 sps:$4 sm:$0xff]  }
 0x1f4   :  { %4517 = vmatpush1.bf16.msra.mxu0 %v10919_v37  ;;  %v10934_v61 = vld [vmem:[%s15673_s2 + $0x1e8] ss:$16 sps:$4 sm:$0xff]   ;;  %v10939_v62 = vld [vmem:[%s15673_s2 + $0x204] ss:$16 sps:$4 sm:$0xff]   ;;  %v10942_v5 = vld [vmem:[%s15673_s2 + $0x20c] ss:$16 sps:$4 sm:$0xff]  }
 0x1f5   :  { %4689 = vmatpush1.bf16.msra.mxu1 %v10922_v43  ;;  %4518 = vmatprep.subr.bf16.mxu0 %v10927_v46  ;;  %v10937_v11 = vld [vmem:[%s15673_s2 + $0x200] ss:$16 sps:$4 sm:$0xff]   ;;  %v13533_v13 = vld [vmem:[#allocation2 + $0x8] sm:$0xff]  ;;  %v10945_v14 = vld [vmem:[%s15673_s2 + $0x224] ss:$16 sps:$4 sm:$0xff]   ;;  %vm5155_vm5 = vcmask 1046528  }
 0x1f6   :  { %4690 = vmatprep.subr.bf16.mxu1 %v10930_v53  ;;  %v10940_v22 = vld [vmem:[%s15673_s2 + $0x208] ss:$16 sps:$4 sm:$0xff]   ;;  %v10948_v2 = vld [vmem:[%s15673_s2 + $0x22c] ss:$16 sps:$4 sm:$0xff]   ;;  %v10943_v1 = vld [vmem:[%s15673_s2 + $0x220] ss:$16 sps:$4 sm:$0xff]  }
 0x1f7   :  { %v13543_v17 = vld [vmem:[#allocation2 + $0x28] sm:$0xff]  ;;  %v10951_v18 = vld [vmem:[%s15673_s2 + $0x244] ss:$16 sps:$4 sm:$0xff]   ;;  %v10949_v30 = vld [vmem:[%s15673_s2 + $0x240] ss:$16 sps:$4 sm:$0xff]   ;;  %s11954_s14 = smov [#allocation4]  }
 0x1f8   :  { %4519 = vmatpush1.bf16.msra.mxu0 %v10925_v48  ;;  %v9152_v23 = vcombine.high %v13533_v13, %v13543_v17  ;;  %v10946_v9 = vld [vmem:[%s15673_s2 + $0x228] ss:$16 sps:$4 sm:$0xff]   ;;  %v10954_v26 = vld [vmem:[%s15673_s2 + $0x24c] ss:$16 sps:$4 sm:$0xff]   ;;  %v10957_v31 = vld [vmem:[%s15673_s2 + $0x264] ss:$16 sps:$4 sm:$0xff]  }
 0x1f9   :  { %4691 = vmatpush1.bf16.msra.mxu1 %v10928_v56  ;;  %4520 = vmatprep.subr.bf16.mxu0 %v10933_v0  ;;  %v10952_v34 = vld [vmem:[%s15673_s2 + $0x248] ss:$16 sps:$4 sm:$0xff]   ;;  %v10960_v20 = vld [vmem:[%s15673_s2 + $0x26c] ss:$16 sps:$4 sm:$0xff]   ;;  %v10955_v39 = vld [vmem:[%s15673_s2 + $0x260] ss:$16 sps:$4 sm:$0xff]  }
 0x1fa   :  { %4692 = vmatprep.subr.bf16.mxu1 %v10936_v57  ;;  %v10958_v42 = vld [vmem:[%s15673_s2 + $0x268] ss:$16 sps:$4 sm:$0xff]   ;;  %v10963_v21 = vld [vmem:[%s15673_s2 + $0x284] ss:$16 sps:$4 sm:$0xff]   ;;  %v10966_v45 = vld [vmem:[%s15673_s2 + $0x28c] ss:$16 sps:$4 sm:$0xff]  }
 0x1fb   :  { %v10961_v50 = vld [vmem:[%s15673_s2 + $0x280] ss:$16 sps:$4 sm:$0xff]   ;;  %v10964_v54 = vld [vmem:[%s15673_s2 + $0x288] ss:$16 sps:$4 sm:$0xff]   ;;  %v10969_v58 = vld [vmem:[%s15673_s2 + $0x2a4] ss:$16 sps:$4 sm:$0xff]  }
 0x1fc   :  { %4521 = vmatpush1.bf16.msra.mxu0 %v10931_v59  ;;  %v10972_v60 = vld [vmem:[%s15673_s2 + $0x2ac] ss:$16 sps:$4 sm:$0xff]   ;;  %v10967_v16 = vld [vmem:[%s15673_s2 + $0x2a0] ss:$16 sps:$4 sm:$0xff]   ;;  %v10970_v25 = vld [vmem:[%s15673_s2 + $0x2a8] ss:$16 sps:$4 sm:$0xff]  }
 0x1fd   :  { %4693 = vmatpush1.bf16.msra.mxu1 %v10934_v61  ;;  %4533 = vmatprep.subr.bf16.mxu0 %v10939_v62  ;;  %v10975_v33 = vld [vmem:[%s15673_s2 + $0x2c4] ss:$16 sps:$4 sm:$0xff]   ;;  %v10978_v38 = vld [vmem:[%s15673_s2 + $0x2cc] ss:$16 sps:$4 sm:$0xff]   ;;  %v10973_v41 = vld [vmem:[%s15673_s2 + $0x2c0] ss:$16 sps:$4 sm:$0xff]  }
 0x1fe   :  { %4705 = vmatprep.subr.bf16.mxu1 %v10942_v5  ;;  %v10976_v47 = vld [vmem:[%s15673_s2 + $0x2c8] ss:$16 sps:$4 sm:$0xff]   ;;  %v10981_v49 = vld [vmem:[%s15673_s2 + $0x2e4] ss:$16 sps:$4 sm:$0xff]   ;;  %v10984_v8 = vld [vmem:[%s15673_s2 + $0x2ec] ss:$16 sps:$4 sm:$0xff]  }
 0x1ff   :  { %4523 = vmatmul.mubr.bf16.vlgmr.msra.gmra.mrb[16].mxu0 %v9149_v63  ;;  %v10979_v52 = vld [vmem:[%s15673_s2 + $0x2e0] ss:$16 sps:$4 sm:$0xff]   ;;  %v10982_v55 = vld [vmem:[%s15673_s2 + $0x2e8] ss:$16 sps:$4 sm:$0xff]   ;;  %v10987_v3 = vld [vmem:[%s15673_s2 + $0x304] ss:$16 sps:$4 sm:$0xff]  }
 0x200   :  { %4695 = vmatmul.mubr.bf16.vlgmr.msra.gmra.mrb[16].mxu1 %v9149_v63  ;;  %4534 = vmatpush1.bf16.msra.mxu0 %v10937_v11  ;;  %v10990_v15 = vld [vmem:[%s15673_s2 + $0x30c] ss:$16 sps:$4 sm:$0xff]   ;;  %v10985_v4 = vld [vmem:[%s15673_s2 + $0x300] ss:$16 sps:$4 sm:$0xff]   ;;  %v10988_v44 = vld [vmem:[%s15673_s2 + $0x308] ss:$16 sps:$4 sm:$0xff]  }
 0x201   :  { %4565 = vmatprep.mubr.bf16.mxu0 %v9152_v23  ;;  %4706 = vmatpush1.bf16.msra.mxu1 %v10940_v22  ;;  %v10993_v6 = vld [vmem:[%s15673_s2 + $0x324] ss:$16 sps:$4 sm:$0xff]   ;;  %v10996_v7 = vld [vmem:[%s15673_s2 + $0x32c] ss:$16 sps:$4 sm:$0xff]   ;;  %v10991_v51 = vld [vmem:[%s15673_s2 + $0x320] ss:$16 sps:$4 sm:$0xff]  }
 0x202   :  { %4737 = vmatprep.mubr.bf16.mxu1 %v9152_v23  ;;  %4535 = vmatprep.subr.bf16.mxu0 %v10945_v14  ;;  %v10994_v27 = vld [vmem:[%s15673_s2 + $0x328] ss:$16 sps:$4 sm:$0xff]   ;;  %v10999_v29 = vld [vmem:[%s15673_s2 + $0x344] ss:$16 sps:$4 sm:$0xff]   ;;  %v11002_v32 = vld [vmem:[%s15673_s2 + $0x34c] ss:$16 sps:$4 sm:$0xff]  }
 0x203   :  { %4707 = vmatprep.subr.bf16.mxu1 %v10948_v2  ;;  %v10997_v35 = vld [vmem:[%s15673_s2 + $0x340] ss:$16 sps:$4 sm:$0xff]   ;;  %v11000_v36 = vld [vmem:[%s15673_s2 + $0x348] ss:$16 sps:$4 sm:$0xff]   ;;  %v11005_v37 = vld [vmem:[%s15673_s2 + $0x364] ss:$16 sps:$4 sm:$0xff]  }
 0x204   :  { %4536 = vmatpush1.bf16.msra.mxu0 %v10943_v1  ;;  %v11008_v40 = vld [vmem:[%s15673_s2 + $0x36c] ss:$16 sps:$4 sm:$0xff]   ;;  %v11003_v43 = vld [vmem:[%s15673_s2 + $0x360] ss:$16 sps:$4 sm:$0xff]   ;;  %v11006_v46 = vld [vmem:[%s15673_s2 + $0x368] ss:$16 sps:$4 sm:$0xff]  }
 0x205   :  { %4708 = vmatpush1.bf16.msra.mxu1 %v10946_v9  ;;  %4537 = vmatprep.subr.bf16.mxu0 %v10951_v18  ;;  %v11011_v53 = vld [vmem:[%s15673_s2 + $0x384] ss:$16 sps:$4 sm:$0xff]   ;;  %v11014_v48 = vld [vmem:[%s15673_s2 + $0x38c] ss:$16 sps:$4 sm:$0xff]   ;;  %v11009_v56 = vld [vmem:[%s15673_s2 + $0x380] ss:$16 sps:$4 sm:$0xff]  }
 0x206   :  { %4709 = vmatprep.subr.bf16.mxu1 %v10954_v26  ;;  %v11012_v0 = vld [vmem:[%s15673_s2 + $0x388] ss:$16 sps:$4 sm:$0xff]   ;;  %v11017_v57 = vld [vmem:[%s15673_s2 + $0x3a4] ss:$16 sps:$4 sm:$0xff]   ;;  %v11020_v59 = vld [vmem:[%s15673_s2 + $0x3ac] ss:$16 sps:$4 sm:$0xff]  }
 0x207   :  { %v11015_v61 = vld [vmem:[%s15673_s2 + $0x3a0] ss:$16 sps:$4 sm:$0xff]   ;;  %v11018_v62 = vld [vmem:[%s15673_s2 + $0x3a8] ss:$16 sps:$4 sm:$0xff]   ;;  %v11023_v5 = vld [vmem:[%s15673_s2 + $0x3c4] ss:$16 sps:$4 sm:$0xff]  }
 0x208   :  { %4538 = vmatpush1.bf16.msra.mxu0 %v10949_v30  ;;  %v11026_v11 = vld [vmem:[%s15673_s2 + $0x3cc] ss:$16 sps:$4 sm:$0xff]   ;;  %v11021_v63 = vld [vmem:[%s15673_s2 + $0x3c0] ss:$16 sps:$4 sm:$0xff]   ;;  %v11024_v22 = vld [vmem:[%s15673_s2 + $0x3c8] ss:$16 sps:$4 sm:$0xff]  }
 0x209   :  { %4710 = vmatpush1.bf16.msra.mxu1 %v10952_v34  ;;  %4539 = vmatprep.subr.bf16.mxu0 %v10957_v31  ;;  %v11029_v14 = vld [vmem:[%s15673_s2 + $0x3e4] ss:$16 sps:$4 sm:$0xff]   ;;  %v11032_v23 = vld [vmem:[%s15673_s2 + $0x3ec] ss:$16 sps:$4 sm:$0xff]   ;;  %v11027_v2 = vld [vmem:[%s15673_s2 + $0x3e0] ss:$16 sps:$4 sm:$0xff]   ;;  %v9151_v31 = vcombine.low %v13533_v13, %v13543_v17 }
 0x20a   :  { %4711 = vmatprep.subr.bf16.mxu1 %v10960_v20  ;;  %v11030_v1 = vld [vmem:[%s15673_s2 + $0x3e8] ss:$16 sps:$4 sm:$0xff]   ;;  %v11035_v9 = vld [vmem:[%s15673_s2 + $0x404] ss:$16 sps:$4 sm:$0xff]   ;;  %v11038_v18 = vld [vmem:[%s15673_s2 + $0x40c] ss:$16 sps:$4 sm:$0xff]  }
 0x20b   :  { %v11033_v26 = vld [vmem:[%s15673_s2 + $0x400] ss:$16 sps:$4 sm:$0xff]   ;;  %v11036_v20 = vld [vmem:[%s15673_s2 + $0x408] ss:$16 sps:$4 sm:$0xff]   ;;  %s8529_s15 = sshll.u32 %s11954_s14, 4  ;;  %s8530_s15 = int_to_ptr.vmem [resolvable:$true] %s8529_s15 }
 0x20c   :  { %4540 = vmatpush1.bf16.msra.mxu0 %v10955_v39  ;;  %v13733_v30 = vld [vmem:[#allocation2 + $0x10] sm:$0xff]  ;;  %v11042_v17 = vld [vmem:[%s15673_s2 + $0x428] ss:$16 sps:$4 sm:$0xff]   ;;  %s11929_s4 = scalar_lea.vmem %s8530_s15, 32  ;;  %p11934_p1 = scmp.lt.s32.totalorder %s8530_s15, %s8530_s15 }
 0x20d   :  { %4712 = vmatpush1.bf16.msra.mxu1 %v10958_v42  ;;  %4541 = vmatprep.subr.bf16.mxu0 %v10963_v21  ;;  %v13735_v34 = vld [vmem:[#allocation2 + $0x30] sm:$0xff]  ;;  %v11044_v21 = vld [vmem:[%s15673_s2 + $0x42c] ss:$16 sps:$4 sm:$0xff]   ;;  %p11930_p0 = scmp.ne.s32.totalorder %s8530_s15, %s11929_s4  ;;  %p11935_p2 = scmp.lt.s32.totalorder %s11929_s4, %s11929_s4 }
 0x20e   :  { %4713 = vmatprep.subr.bf16.mxu1 %v10966_v45  ;;  %v11041_v39 = vld [vmem:[%s15673_s2 + $0x424] ss:$16 sps:$4 sm:$0xff]   ;;  %v9154_v42 = vcombine.high %v13733_v30, %v13735_v34  ;;  %v11039_v13 = vld [vmem:[%s15673_s2 + $0x420] ss:$16 sps:$4 sm:$0xff]  }
 0x20f   :  { %v11047_v45 = vld [vmem:[%s15673_s2 + $0x444] ss:$16 sps:$4 sm:$0xff]   ;;  %p11936_p3 = por %p11935_p2, %p11934_p1 }
 0x210   :  { %4542 = vmatpush1.bf16.msra.mxu0 %v10961_v50  ;;  %v11050_v50 = vld [vmem:[%s15673_s2 + $0x44c] ss:$16 sps:$4 sm:$0xff]  }
 0x211   :  { %4714 = vmatpush1.bf16.msra.mxu1 %v10964_v54  ;;  %4543 = vmatprep.subr.bf16.mxu0 %v10969_v58  ;;  %v11045_v54 = vld [vmem:[%s15673_s2 + $0x440] ss:$16 sps:$4 sm:$0xff]   ;;  %v11048_v58 = vld [vmem:[%s15673_s2 + $0x448] ss:$16 sps:$4 sm:$0xff]   ;;  %p11937_p4 = pnand %p11936_p3, %p11930_p0 }
 0x212   :  { %4715 = vmatprep.subr.bf16.mxu1 %v10972_v60  ;;  %v11053_v60 = vld [vmem:[%s15673_s2 + $0x464] ss:$16 sps:$4 sm:$0xff]  }
 0x214   :  { %4544 = vmatpush1.bf16.msra.mxu0 %v10967_v16  ;;  %v11056_v16 = vld [vmem:[%s15673_s2 + $0x46c] ss:$16 sps:$4 sm:$0xff]  }
 0x215   :  { %4716 = vmatpush1.bf16.msra.mxu1 %v10970_v25  ;;  %4545 = vmatprep.subr.bf16.mxu0 %v10975_v33  ;;  %v11051_v25 = vld [vmem:[%s15673_s2 + $0x460] ss:$16 sps:$4 sm:$0xff]   ;;  %v11054_v33 = vld [vmem:[%s15673_s2 + $0x468] ss:$16 sps:$4 sm:$0xff]  }
 0x216   :  { %4717 = vmatprep.subr.bf16.mxu1 %v10978_v38  ;;  %v11059_v38 = vld [vmem:[%s15673_s2 + $0x484] ss:$16 sps:$4 sm:$0xff]  }
 0x218   :  { %4546 = vmatpush1.bf16.msra.mxu0 %v10973_v41  ;;  %v11062_v41 = vld [vmem:[%s15673_s2 + $0x48c] ss:$16 sps:$4 sm:$0xff]  }
 0x219   :  { %4718 = vmatpush1.bf16.msra.mxu1 %v10976_v47  ;;  %4547 = vmatprep.subr.bf16.mxu0 %v10981_v49  ;;  %v11057_v47 = vld [vmem:[%s15673_s2 + $0x480] ss:$16 sps:$4 sm:$0xff]   ;;  %v11060_v49 = vld [vmem:[%s15673_s2 + $0x488] ss:$16 sps:$4 sm:$0xff]  }
 0x21a   :  { %4719 = vmatprep.subr.bf16.mxu1 %v10984_v8  ;;  %v11065_v8 = vld [vmem:[%s15673_s2 + $0x4a4] ss:$16 sps:$4 sm:$0xff]  }
 0x21c   :  { %4548 = vmatpush1.bf16.msra.mxu0 %v10979_v52  ;;  %v11068_v52 = vld [vmem:[%s15673_s2 + $0x4ac] ss:$16 sps:$4 sm:$0xff]  }
 0x21d   :  { %4720 = vmatpush1.bf16.msra.mxu1 %v10982_v55  ;;  %4549 = vmatprep.subr.bf16.mxu0 %v10987_v3  ;;  %v11063_v55 = vld [vmem:[%s15673_s2 + $0x4a0] ss:$16 sps:$4 sm:$0xff]   ;;  %v11066_v3 = vld [vmem:[%s15673_s2 + $0x4a8] ss:$16 sps:$4 sm:$0xff]  }
 0x21e   :  { %4721 = vmatprep.subr.bf16.mxu1 %v10990_v15  ;;  %v11071_v15 = vld [vmem:[%s15673_s2 + $0x4c4] ss:$16 sps:$4 sm:$0xff]  }
 0x220   :  { %4550 = vmatpush1.bf16.msra.mxu0 %v10985_v4  ;;  %v11074_v4 = vld [vmem:[%s15673_s2 + $0x4cc] ss:$16 sps:$4 sm:$0xff]  }
 0x221   :  { %4722 = vmatpush1.bf16.msra.mxu1 %v10988_v44  ;;  %4551 = vmatprep.subr.bf16.mxu0 %v10993_v6  ;;  %v11069_v44 = vld [vmem:[%s15673_s2 + $0x4c0] ss:$16 sps:$4 sm:$0xff]   ;;  %v11072_v6 = vld [vmem:[%s15673_s2 + $0x4c8] ss:$16 sps:$4 sm:$0xff]  }
 0x222   :  { %4723 = vmatprep.subr.bf16.mxu1 %v10996_v7  ;;  %v11077_v7 = vld [vmem:[%s15673_s2 + $0x4e4] ss:$16 sps:$4 sm:$0xff]  }
 0x224   :  { %4552 = vmatpush1.bf16.msra.mxu0 %v10991_v51  ;;  %v11080_v51 = vld [vmem:[%s15673_s2 + $0x4ec] ss:$16 sps:$4 sm:$0xff]  }
 0x225   :  { %4724 = vmatpush1.bf16.msra.mxu1 %v10994_v27  ;;  %4553 = vmatprep.subr.bf16.mxu0 %v10999_v29  ;;  %v11075_v27 = vld [vmem:[%s15673_s2 + $0x4e0] ss:$16 sps:$4 sm:$0xff]   ;;  %v11078_v29 = vld [vmem:[%s15673_s2 + $0x4e8] ss:$16 sps:$4 sm:$0xff]  }
 0x226   :  { %4725 = vmatprep.subr.bf16.mxu1 %v11002_v32  ;;  %v11083_v32 = vld [vmem:[%s15673_s2 + $0x504] ss:$16 sps:$4 sm:$0xff]  }
 0x228   :  { %4554 = vmatpush1.bf16.msra.mxu0 %v10997_v35  ;;  %v11086_v35 = vld [vmem:[%s15673_s2 + $0x50c] ss:$16 sps:$4 sm:$0xff]  }
 0x229   :  { %4726 = vmatpush1.bf16.msra.mxu1 %v11000_v36  ;;  %4555 = vmatprep.subr.bf16.mxu0 %v11005_v37  ;;  %v11081_v36 = vld [vmem:[%s15673_s2 + $0x500] ss:$16 sps:$4 sm:$0xff]   ;;  %v11084_v37 = vld [vmem:[%s15673_s2 + $0x508] ss:$16 sps:$4 sm:$0xff]  }
 0x22a   :  { %4727 = vmatprep.subr.bf16.mxu1 %v11008_v40  ;;  %v11089_v40 = vld [vmem:[%s15673_s2 + $0x524] ss:$16 sps:$4 sm:$0xff]  }
 0x22c   :  { %4556 = vmatpush1.bf16.msra.mxu0 %v11003_v43  ;;  %v11092_v43 = vld [vmem:[%s15673_s2 + $0x52c] ss:$16 sps:$4 sm:$0xff]  }
 0x22d   :  { %4728 = vmatpush1.bf16.msra.mxu1 %v11006_v46  ;;  %4557 = vmatprep.subr.bf16.mxu0 %v11011_v53  ;;  %v11087_v46 = vld [vmem:[%s15673_s2 + $0x520] ss:$16 sps:$4 sm:$0xff]   ;;  %v11090_v53 = vld [vmem:[%s15673_s2 + $0x528] ss:$16 sps:$4 sm:$0xff]  }
 0x22e   :  { %4729 = vmatprep.subr.bf16.mxu1 %v11014_v48  ;;  %v11095_v48 = vld [vmem:[%s15673_s2 + $0x544] ss:$16 sps:$4 sm:$0xff]  }
 0x230   :  { %4558 = vmatpush1.bf16.msra.mxu0 %v11009_v56  ;;  %v11098_v56 = vld [vmem:[%s15673_s2 + $0x54c] ss:$16 sps:$4 sm:$0xff]  }
 0x231   :  { %4730 = vmatpush1.bf16.msra.mxu1 %v11012_v0  ;;  %4559 = vmatprep.subr.bf16.mxu0 %v11017_v57  ;;  %v11093_v0 = vld [vmem:[%s15673_s2 + $0x540] ss:$16 sps:$4 sm:$0xff]   ;;  %v11096_v57 = vld [vmem:[%s15673_s2 + $0x548] ss:$16 sps:$4 sm:$0xff]  }
 0x232   :  { %4731 = vmatprep.subr.bf16.mxu1 %v11020_v59  ;;  %v11101_v59 = vld [vmem:[%s15673_s2 + $0x564] ss:$16 sps:$4 sm:$0xff]  }
 0x234   :  { %4560 = vmatpush1.bf16.msra.mxu0 %v11015_v61  ;;  %v11104_v61 = vld [vmem:[%s15673_s2 + $0x56c] ss:$16 sps:$4 sm:$0xff]  }
 0x235   :  { %4732 = vmatpush1.bf16.msra.mxu1 %v11018_v62  ;;  %4561 = vmatprep.subr.bf16.mxu0 %v11023_v5  ;;  %v11099_v62 = vld [vmem:[%s15673_s2 + $0x560] ss:$16 sps:$4 sm:$0xff]   ;;  %v11102_v5 = vld [vmem:[%s15673_s2 + $0x568] ss:$16 sps:$4 sm:$0xff]  }
 0x236   :  { %4733 = vmatprep.subr.bf16.mxu1 %v11026_v11  ;;  %v11107_v11 = vld [vmem:[%s15673_s2 + $0x584] ss:$16 sps:$4 sm:$0xff]  }
 0x238   :  { %4562 = vmatpush1.bf16.msra.mxu0 %v11021_v63  ;;  %v11110_v63 = vld [vmem:[%s15673_s2 + $0x58c] ss:$16 sps:$4 sm:$0xff]  }
 0x239   :  { %4734 = vmatpush1.bf16.msra.mxu1 %v11024_v22  ;;  %4563 = vmatprep.subr.bf16.mxu0 %v11029_v14  ;;  %v11105_v22 = vld [vmem:[%s15673_s2 + $0x580] ss:$16 sps:$4 sm:$0xff]   ;;  %v11108_v14 = vld [vmem:[%s15673_s2 + $0x588] ss:$16 sps:$4 sm:$0xff]  }
 0x23a   :  { %4735 = vmatprep.subr.bf16.mxu1 %v11032_v23  ;;  %v11113_v23 = vld [vmem:[%s15673_s2 + $0x5a4] ss:$16 sps:$4 sm:$0xff]  }
 0x23c   :  { %4564 = vmatpush1.bf16.msra.mxu0 %v11027_v2  ;;  %v11116_v2 = vld [vmem:[%s15673_s2 + $0x5ac] ss:$16 sps:$4 sm:$0xff]  }
 0x23d   :  { %4736 = vmatpush1.bf16.msra.mxu1 %v11030_v1  ;;  %4576 = vmatprep.subr.bf16.mxu0 %v11035_v9  ;;  %v11111_v1 = vld [vmem:[%s15673_s2 + $0x5a0] ss:$16 sps:$4 sm:$0xff]   ;;  %v11114_v9 = vld [vmem:[%s15673_s2 + $0x5a8] ss:$16 sps:$4 sm:$0xff]  }
 0x23e   :  { %4748 = vmatprep.subr.bf16.mxu1 %v11038_v18  ;;  %v11119_v18 = vld [vmem:[%s15673_s2 + $0x5c4] ss:$16 sps:$4 sm:$0xff]  }
 0x23f   :  { %4566 = vmatmul.mubr.bf16.vlgmr.msra.gmra.mrb[16].mxu0 %v9151_v31 }
 0x240   :  { %4738 = vmatmul.mubr.bf16.vlgmr.msra.gmra.mrb[16].mxu1 %v9151_v31  ;;  %4577 = vmatpush1.bf16.msra.mxu0 %v11033_v26  ;;  %v11122_v26 = vld [vmem:[%s15673_s2 + $0x5cc] ss:$16 sps:$4 sm:$0xff]   ;;  %v11117_v31 = vld [vmem:[%s15673_s2 + $0x5c0] ss:$16 sps:$4 sm:$0xff]  }
 0x241   :  { %4608 = vmatprep.mubr.bf16.mxu0 %v9154_v42  ;;  %4749 = vmatpush1.bf16.msra.mxu1 %v11036_v20  ;;  %v11120_v20 = vld [vmem:[%s15673_s2 + $0x5c8] ss:$16 sps:$4 sm:$0xff]  }
 0x242   :  { %4780 = vmatprep.mubr.bf16.mxu1 %v9154_v42  ;;  %4578 = vmatprep.subr.bf16.mxu0 %v11041_v39  ;;  %v11125_v39 = vld [vmem:[%s15673_s2 + $0x5e4] ss:$16 sps:$4 sm:$0xff]   ;;  %v11128_v42 = vld [vmem:[%s15673_s2 + $0x5ec] ss:$16 sps:$4 sm:$0xff]  }
 0x243   :  { %4750 = vmatprep.subr.bf16.mxu1 %v11044_v21  ;;  %v11123_v21 = vld [vmem:[%s15673_s2 + $0x5e0] ss:$16 sps:$4 sm:$0xff]  }
 0x244   :  { %4579 = vmatpush1.bf16.msra.mxu0 %v11039_v13  ;;  %v11126_v13 = vld [vmem:[%s15673_s2 + $0x5e8] ss:$16 sps:$4 sm:$0xff]  }
 0x245   :  { %4751 = vmatpush1.bf16.msra.mxu1 %v11042_v17  ;;  %4580 = vmatprep.subr.bf16.mxu0 %v11047_v45  ;;  %v11131_v17 = vld [vmem:[%s15673_s2 + $0x604] ss:$16 sps:$4 sm:$0xff]   ;;  %v11134_v45 = vld [vmem:[%s15673_s2 + $0x60c] ss:$16 sps:$4 sm:$0xff]  }
 0x246   :  { %4752 = vmatprep.subr.bf16.mxu1 %v11050_v50  ;;  %v11129_v50 = vld [vmem:[%s15673_s2 + $0x600] ss:$16 sps:$4 sm:$0xff]  }
 0x248   :  { %4581 = vmatpush1.bf16.msra.mxu0 %v11045_v54  ;;  %v13933_v54 = vld [vmem:[#allocation2 + $0x18] sm:$0xff] }
 0x249   :  { %4753 = vmatpush1.bf16.msra.mxu1 %v11048_v58  ;;  %4582 = vmatprep.subr.bf16.mxu0 %v11053_v60  ;;  %v13935_v58 = vld [vmem:[#allocation2 + $0x38] sm:$0xff]  ;;  %v9153_v60 = vcombine.low %v13733_v30, %v13735_v34  ;;  %v11135_v30 = vld [vmem:[%s15673_s2 + $0x620] ss:$16 sps:$4 sm:$0xff]  }
 0x24a   :  { %4754 = vmatprep.subr.bf16.mxu1 %v11056_v16  ;;  %v11132_v16 = vld [vmem:[%s15673_s2 + $0x608] ss:$16 sps:$4 sm:$0xff]  }
 0x24b   :  { %v11138_v34 = vld [vmem:[%s15673_s2 + $0x628] ss:$16 sps:$4 sm:$0xff]  }
 0x24c   :  { %4583 = vmatpush1.bf16.msra.mxu0 %v11051_v25  ;;  %v11137_v25 = vld [vmem:[%s15673_s2 + $0x624] ss:$16 sps:$4 sm:$0xff]  }
 0x24d   :  { %4755 = vmatpush1.bf16.msra.mxu1 %v11054_v33  ;;  %4584 = vmatprep.subr.bf16.mxu0 %v11059_v38  ;;  %v9156_v33 = vcombine.high %v13933_v54, %v13935_v58  ;;  %v11140_v38 = vld [vmem:[%s15673_s2 + $0x62c] ss:$16 sps:$4 sm:$0xff]  }
 0x24e   :  { %4756 = vmatprep.subr.bf16.mxu1 %v11062_v41  ;;  %v11143_v41 = vld [vmem:[%s15673_s2 + $0x644] ss:$16 sps:$4 sm:$0xff]  }
 0x250   :  { %4585 = vmatpush1.bf16.msra.mxu0 %v11057_v47  ;;  %v11146_v47 = vld [vmem:[%s15673_s2 + $0x64c] ss:$16 sps:$4 sm:$0xff]  }
 0x251   :  { %4757 = vmatpush1.bf16.msra.mxu1 %v11060_v49  ;;  %4586 = vmatprep.subr.bf16.mxu0 %v11065_v8  ;;  %v11141_v49 = vld [vmem:[%s15673_s2 + $0x640] ss:$16 sps:$4 sm:$0xff]   ;;  %v11144_v8 = vld [vmem:[%s15673_s2 + $0x648] ss:$16 sps:$4 sm:$0xff]  }
 0x252   :  { %4758 = vmatprep.subr.bf16.mxu1 %v11068_v52  ;;  %v11149_v52 = vld [vmem:[%s15673_s2 + $0x664] ss:$16 sps:$4 sm:$0xff]  }
 0x254   :  { %4587 = vmatpush1.bf16.msra.mxu0 %v11063_v55  ;;  %v11152_v55 = vld [vmem:[%s15673_s2 + $0x66c] ss:$16 sps:$4 sm:$0xff]  }
 0x255   :  { %4759 = vmatpush1.bf16.msra.mxu1 %v11066_v3  ;;  %4588 = vmatprep.subr.bf16.mxu0 %v11071_v15  ;;  %v11147_v3 = vld [vmem:[%s15673_s2 + $0x660] ss:$16 sps:$4 sm:$0xff]   ;;  %v11150_v15 = vld [vmem:[%s15673_s2 + $0x668] ss:$16 sps:$4 sm:$0xff]  }
 0x256   :  { %4760 = vmatprep.subr.bf16.mxu1 %v11074_v4  ;;  %v11155_v4 = vld [vmem:[%s15673_s2 + $0x684] ss:$16 sps:$4 sm:$0xff]  }
 0x258   :  { %4589 = vmatpush1.bf16.msra.mxu0 %v11069_v44  ;;  %v11158_v44 = vld [vmem:[%s15673_s2 + $0x68c] ss:$16 sps:$4 sm:$0xff]  }
 0x259   :  { %4761 = vmatpush1.bf16.msra.mxu1 %v11072_v6  ;;  %4590 = vmatprep.subr.bf16.mxu0 %v11077_v7  ;;  %v11153_v6 = vld [vmem:[%s15673_s2 + $0x680] ss:$16 sps:$4 sm:$0xff]   ;;  %v11156_v7 = vld [vmem:[%s15673_s2 + $0x688] ss:$16 sps:$4 sm:$0xff]  }
 0x25a   :  { %4762 = vmatprep.subr.bf16.mxu1 %v11080_v51  ;;  %v11161_v51 = vld [vmem:[%s15673_s2 + $0x6a4] ss:$16 sps:$4 sm:$0xff]  }
 0x25c   :  { %4591 = vmatpush1.bf16.msra.mxu0 %v11075_v27  ;;  %v11164_v27 = vld [vmem:[%s15673_s2 + $0x6ac] ss:$16 sps:$4 sm:$0xff]  }
 0x25d   :  { %4763 = vmatpush1.bf16.msra.mxu1 %v11078_v29  ;;  %4592 = vmatprep.subr.bf16.mxu0 %v11083_v32  ;;  %v11159_v29 = vld [vmem:[%s15673_s2 + $0x6a0] ss:$16 sps:$4 sm:$0xff]   ;;  %v11162_v32 = vld [vmem:[%s15673_s2 + $0x6a8] ss:$16 sps:$4 sm:$0xff]  }
 0x25e   :  { %4764 = vmatprep.subr.bf16.mxu1 %v11086_v35  ;;  %v11167_v35 = vld [vmem:[%s15673_s2 + $0x6c4] ss:$16 sps:$4 sm:$0xff]  }
 0x260   :  { %4593 = vmatpush1.bf16.msra.mxu0 %v11081_v36  ;;  %v11170_v36 = vld [vmem:[%s15673_s2 + $0x6cc] ss:$16 sps:$4 sm:$0xff]  }
 0x261   :  { %4765 = vmatpush1.bf16.msra.mxu1 %v11084_v37  ;;  %4594 = vmatprep.subr.bf16.mxu0 %v11089_v40  ;;  %v11165_v37 = vld [vmem:[%s15673_s2 + $0x6c0] ss:$16 sps:$4 sm:$0xff]   ;;  %v11168_v40 = vld [vmem:[%s15673_s2 + $0x6c8] ss:$16 sps:$4 sm:$0xff]  }
 0x262   :  { %4766 = vmatprep.subr.bf16.mxu1 %v11092_v43  ;;  %v11173_v43 = vld [vmem:[%s15673_s2 + $0x6e4] ss:$16 sps:$4 sm:$0xff]  }
 0x264   :  { %4595 = vmatpush1.bf16.msra.mxu0 %v11087_v46  ;;  %v11176_v46 = vld [vmem:[%s15673_s2 + $0x6ec] ss:$16 sps:$4 sm:$0xff]  }
 0x265   :  { %4767 = vmatpush1.bf16.msra.mxu1 %v11090_v53  ;;  %4596 = vmatprep.subr.bf16.mxu0 %v11095_v48  ;;  %v11171_v53 = vld [vmem:[%s15673_s2 + $0x6e0] ss:$16 sps:$4 sm:$0xff]   ;;  %v11174_v48 = vld [vmem:[%s15673_s2 + $0x6e8] ss:$16 sps:$4 sm:$0xff]  }
 0x266   :  { %4768 = vmatprep.subr.bf16.mxu1 %v11098_v56  ;;  %v11179_v56 = vld [vmem:[%s15673_s2 + $0x704] ss:$16 sps:$4 sm:$0xff]  }
 0x268   :  { %4597 = vmatpush1.bf16.msra.mxu0 %v11093_v0  ;;  %v11182_v0 = vld [vmem:[%s15673_s2 + $0x70c] ss:$16 sps:$4 sm:$0xff]  }
 0x269   :  { %4769 = vmatpush1.bf16.msra.mxu1 %v11096_v57  ;;  %4598 = vmatprep.subr.bf16.mxu0 %v11101_v59  ;;  %v11177_v57 = vld [vmem:[%s15673_s2 + $0x700] ss:$16 sps:$4 sm:$0xff]   ;;  %v11180_v59 = vld [vmem:[%s15673_s2 + $0x708] ss:$16 sps:$4 sm:$0xff]  }
 0x26a   :  { %4770 = vmatprep.subr.bf16.mxu1 %v11104_v61  ;;  %v11185_v61 = vld [vmem:[%s15673_s2 + $0x724] ss:$16 sps:$4 sm:$0xff]  }
 0x26c   :  { %4599 = vmatpush1.bf16.msra.mxu0 %v11099_v62  ;;  %v11188_v62 = vld [vmem:[%s15673_s2 + $0x72c] ss:$16 sps:$4 sm:$0xff]  }
 0x26d   :  { %4771 = vmatpush1.bf16.msra.mxu1 %v11102_v5  ;;  %4600 = vmatprep.subr.bf16.mxu0 %v11107_v11  ;;  %v11183_v5 = vld [vmem:[%s15673_s2 + $0x720] ss:$16 sps:$4 sm:$0xff]   ;;  %v11186_v11 = vld [vmem:[%s15673_s2 + $0x728] ss:$16 sps:$4 sm:$0xff]  }
 0x26e   :  { %4772 = vmatprep.subr.bf16.mxu1 %v11110_v63  ;;  %v11191_v63 = vld [vmem:[%s15673_s2 + $0x744] ss:$16 sps:$4 sm:$0xff]  }
 0x270   :  { %4601 = vmatpush1.bf16.msra.mxu0 %v11105_v22  ;;  %v11194_v22 = vld [vmem:[%s15673_s2 + $0x74c] ss:$16 sps:$4 sm:$0xff]  }
 0x271   :  { %4773 = vmatpush1.bf16.msra.mxu1 %v11108_v14  ;;  %4602 = vmatprep.subr.bf16.mxu0 %v11113_v23  ;;  %v11189_v14 = vld [vmem:[%s15673_s2 + $0x740] ss:$16 sps:$4 sm:$0xff]   ;;  %v11192_v23 = vld [vmem:[%s15673_s2 + $0x748] ss:$16 sps:$4 sm:$0xff]  }
 0x272   :  { %4774 = vmatprep.subr.bf16.mxu1 %v11116_v2  ;;  %v11197_v2 = vld [vmem:[%s15673_s2 + $0x764] ss:$16 sps:$4 sm:$0xff]  }
 0x274   :  { %4603 = vmatpush1.bf16.msra.mxu0 %v11111_v1  ;;  %v11200_v1 = vld [vmem:[%s15673_s2 + $0x76c] ss:$16 sps:$4 sm:$0xff]  }
 0x275   :  { %4775 = vmatpush1.bf16.msra.mxu1 %v11114_v9  ;;  %4604 = vmatprep.subr.bf16.mxu0 %v11119_v18  ;;  %v11195_v9 = vld [vmem:[%s15673_s2 + $0x760] ss:$16 sps:$4 sm:$0xff]   ;;  %v11198_v18 = vld [vmem:[%s15673_s2 + $0x768] ss:$16 sps:$4 sm:$0xff]  }
 0x276   :  { %4776 = vmatprep.subr.bf16.mxu1 %v11122_v26  ;;  %v11203_v26 = vld [vmem:[%s15673_s2 + $0x784] ss:$16 sps:$4 sm:$0xff]  }
 0x278   :  { %4605 = vmatpush1.bf16.msra.mxu0 %v11117_v31  ;;  %v11206_v31 = vld [vmem:[%s15673_s2 + $0x78c] ss:$16 sps:$4 sm:$0xff]  }
 0x279   :  { %4777 = vmatpush1.bf16.msra.mxu1 %v11120_v20  ;;  %4606 = vmatprep.subr.bf16.mxu0 %v11125_v39  ;;  %v11201_v20 = vld [vmem:[%s15673_s2 + $0x780] ss:$16 sps:$4 sm:$0xff]   ;;  %v11204_v39 = vld [vmem:[%s15673_s2 + $0x788] ss:$16 sps:$4 sm:$0xff]  }
 0x27a   :  { %4778 = vmatprep.subr.bf16.mxu1 %v11128_v42  ;;  %v11209_v42 = vld [vmem:[%s15673_s2 + $0x7a4] ss:$16 sps:$4 sm:$0xff]  }
 0x27c   :  { %4607 = vmatpush1.bf16.msra.mxu0 %v11123_v21  ;;  %v11212_v21 = vld [vmem:[%s15673_s2 + $0x7ac] ss:$16 sps:$4 sm:$0xff]  }
 0x27d   :  { %4779 = vmatpush1.bf16.msra.mxu1 %v11126_v13  ;;  %4619 = vmatprep.subr.bf16.mxu0 %v11131_v17  ;;  %v11207_v13 = vld [vmem:[%s15673_s2 + $0x7a0] ss:$16 sps:$4 sm:$0xff]   ;;  %v11210_v17 = vld [vmem:[%s15673_s2 + $0x7a8] ss:$16 sps:$4 sm:$0xff]  }
 0x27e   :  { %4791 = vmatprep.subr.bf16.mxu1 %v11134_v45  ;;  %v11215_v45 = vld [vmem:[%s15673_s2 + $0x7c4] ss:$16 sps:$4 sm:$0xff]  }
 0x27f   :  { %4609 = vmatmul.mubr.bf16.vlgmr.msra.gmra.mrb[16].mxu0 %v9153_v60 }
 0x280   :  { %4781 = vmatmul.mubr.bf16.vlgmr.msra.gmra.mrb[16].mxu1 %v9153_v60  ;;  %4620 = vmatpush1.bf16.msra.mxu0 %v11129_v50  ;;  %v11218_v50 = vld [vmem:[%s15673_s2 + $0x7cc] ss:$16 sps:$4 sm:$0xff]   ;;  %v11213_v60 = vld [vmem:[%s15673_s2 + $0x7c0] ss:$16 sps:$4 sm:$0xff]  }
 0x281   :  { %4651 = vmatprep.mubr.bf16.mxu0 %v9156_v33  ;;  %4792 = vmatpush1.bf16.msra.mxu1 %v11132_v16  ;;  %v14109_v16 = vld [vmem:[#allocation2] sm:$0xee] }
 0x282   :  { %4823 = vmatprep.mubr.bf16.mxu1 %v9156_v33  ;;  %4621 = vmatprep.subr.bf16.mxu0 %v11137_v25  ;;  %v14111_v25 = vld [vmem:[#allocation2 + $0x20] sm:$0xff]  ;;  %v11216_v33 = vld [vmem:[%s15673_s2 + $0x7c8] ss:$16 sps:$4 sm:$0xff]  }
 0x283   :  { %4793 = vmatprep.subr.bf16.mxu1 %v11140_v38  ;;  %v11221_v38 = vld [vmem:[%s15673_s2 + $0x7e4] ss:$16 sps:$4 sm:$0xff]  }
 0x284   :  { %4622 = vmatpush1.bf16.msra.mxu0 %v11135_v30  ;;  %v14119_v30 = vld [vmem:[#allocation2 + $0x40] sm:$0x11] }
 0x285   :  { %4794 = vmatpush1.bf16.msra.mxu1 %v11138_v34  ;;  %4623 = vmatprep.subr.bf16.mxu0 %v11143_v41  ;;  %v11224_v34 = vld [vmem:[%s15673_s2 + $0x7ec] ss:$16 sps:$4 sm:$0xff]   ;;  %v11219_v41 = vld [vmem:[%s15673_s2 + $0x7e0] ss:$16 sps:$4 sm:$0xff]  }
 0x286   :  { %4795 = vmatprep.subr.bf16.mxu1 %v11146_v47  ;;  %v9670_v47 = vcombine.high %v14109_v16, %v14111_v25 }
 0x288   :  { %4624 = vmatpush1.bf16.msra.mxu0 %v11141_v49  ;;  %v9678_v49 = vcombine.high %v14119_v30, %v14119_v30 }
 0x289   :  { %4796 = vmatpush1.bf16.msra.mxu1 %v11144_v8  ;;  %4625 = vmatprep.subr.bf16.mxu0 %v11149_v52  ;;  %v11222_v8 = vld [vmem:[%s15673_s2 + $0x7e8] ss:$16 sps:$4 sm:$0xff]   ;;  %v11227_v52 = vld [vmem:[%s15673_s2 + $0x1004] ss:$16 sps:$4 sm:$0xff]  }
 0x28a   :  { %4797 = vmatprep.subr.bf16.mxu1 %v11152_v55  ;;  %v11230_v55 = vld [vmem:[%s15673_s2 + $0x100c] ss:$16 sps:$4 sm:$0xff]  }
 0x28c   :  { %4626 = vmatpush1.bf16.msra.mxu0 %v11147_v3  ;;  %v11225_v3 = vld [vmem:[%s15673_s2 + $0x1000] ss:$16 sps:$4 sm:$0xff]  }
 0x28d   :  { %4798 = vmatpush1.bf16.msra.mxu1 %v11150_v15  ;;  %4627 = vmatprep.subr.bf16.mxu0 %v11155_v4  ;;  %v5159_v15 = vrot.slane %v9670_v47, 1  ;;  %v5160_v4 = vrot.slane %v9678_v49, 1  ;;  %v11303_v47 = vld [vmem:[%s15673_s2 + $0x118c] ss:$16 sps:$4 sm:$0xff]   ;;  %v11298_v49 = vld [vmem:[%s15673_s2 + $0x1180] ss:$16 sps:$4 sm:$0xff]  }
 0x28e   :  { %4799 = vmatprep.subr.bf16.mxu1 %v11158_v44  ;;  %v9155_v44 = vcombine.low %v13933_v54, %v13935_v58  ;;  %v11232_v58 = vld [vmem:[%s15673_s2 + $0x1020] ss:$16 sps:$4 sm:$0xff]  }
 0x28f   :  { %v5161_v54 = vsel %vm5155_vm5, %v5159_v15, %v5160_v4  ;;  %v11307_v15 = vld [vmem:[%s15673_s2 + $0x11a8] ss:$16 sps:$4 sm:$0xff]   ;;  %v11312_v4 = vld [vmem:[%s15673_s2 + $0x11c4] ss:$16 sps:$4 sm:$0xff]  }
 0x290   :  { %4628 = vmatpush1.bf16.msra.mxu0 %v11153_v6  ;;  %v11228_v6 = vld [vmem:[%s15673_s2 + $0x1008] ss:$16 sps:$4 sm:$0xff]  }
 0x291   :  { %4800 = vmatpush1.bf16.msra.mxu1 %v11156_v7  ;;  %4629 = vmatprep.subr.bf16.mxu0 %v11161_v51  ;;  %v11234_v7 = vld [vmem:[%s15673_s2 + $0x1024] ss:$16 sps:$4 sm:$0xff]   ;;  %v11237_v51 = vld [vmem:[%s15673_s2 + $0x102c] ss:$16 sps:$4 sm:$0xff]  }
 0x292   :  { %4801 = vmatprep.subr.bf16.mxu1 %v11164_v27  ;;  %v11235_v27 = vld [vmem:[%s15673_s2 + $0x1028] ss:$16 sps:$4 sm:$0xff]  }
 0x294   :  { %4630 = vmatpush1.bf16.msra.mxu0 %v11159_v29  ;;  %v11240_v29 = vld [vmem:[%s15673_s2 + $0x1044] ss:$16 sps:$4 sm:$0xff]  }
 0x295   :  { %4802 = vmatpush1.bf16.msra.mxu1 %v11162_v32  ;;  %4631 = vmatprep.subr.bf16.mxu0 %v11167_v35  ;;  %v11243_v32 = vld [vmem:[%s15673_s2 + $0x104c] ss:$16 sps:$4 sm:$0xff]   ;;  %v11238_v35 = vld [vmem:[%s15673_s2 + $0x1040] ss:$16 sps:$4 sm:$0xff]  }
 0x296   :  { %4803 = vmatprep.subr.bf16.mxu1 %v11170_v36  ;;  %v11241_v36 = vld [vmem:[%s15673_s2 + $0x1048] ss:$16 sps:$4 sm:$0xff]  }
 0x298   :  { %4632 = vmatpush1.bf16.msra.mxu0 %v11165_v37  ;;  %v11246_v37 = vld [vmem:[%s15673_s2 + $0x1064] ss:$16 sps:$4 sm:$0xff]  }
 0x299   :  { %4804 = vmatpush1.bf16.msra.mxu1 %v11168_v40  ;;  %4633 = vmatprep.subr.bf16.mxu0 %v11173_v43  ;;  %v11249_v40 = vld [vmem:[%s15673_s2 + $0x106c] ss:$16 sps:$4 sm:$0xff]   ;;  %v11244_v43 = vld [vmem:[%s15673_s2 + $0x1060] ss:$16 sps:$4 sm:$0xff]  }
 0x29a   :  { %4805 = vmatprep.subr.bf16.mxu1 %v11176_v46  ;;  %v11247_v46 = vld [vmem:[%s15673_s2 + $0x1068] ss:$16 sps:$4 sm:$0xff]  }
 0x29c   :  { %4634 = vmatpush1.bf16.msra.mxu0 %v11171_v53  ;;  %v11252_v53 = vld [vmem:[%s15673_s2 + $0x1084] ss:$16 sps:$4 sm:$0xff]  }
 0x29d   :  { %4806 = vmatpush1.bf16.msra.mxu1 %v11174_v48  ;;  %4635 = vmatprep.subr.bf16.mxu0 %v11179_v56  ;;  %v11255_v48 = vld [vmem:[%s15673_s2 + $0x108c] ss:$16 sps:$4 sm:$0xff]   ;;  %v11250_v56 = vld [vmem:[%s15673_s2 + $0x1080] ss:$16 sps:$4 sm:$0xff]  }
 0x29e   :  { %4807 = vmatprep.subr.bf16.mxu1 %v11182_v0  ;;  %v11253_v0 = vld [vmem:[%s15673_s2 + $0x1088] ss:$16 sps:$4 sm:$0xff]  }
 0x2a0   :  { %4636 = vmatpush1.bf16.msra.mxu0 %v11177_v57  ;;  %v11258_v57 = vld [vmem:[%s15673_s2 + $0x10a4] ss:$16 sps:$4 sm:$0xff]  }
 0x2a1   :  { %4808 = vmatpush1.bf16.msra.mxu1 %v11180_v59  ;;  %4637 = vmatprep.subr.bf16.mxu0 %v11185_v61  ;;  %v11261_v59 = vld [vmem:[%s15673_s2 + $0x10ac] ss:$16 sps:$4 sm:$0xff]   ;;  %v11256_v61 = vld [vmem:[%s15673_s2 + $0x10a0] ss:$16 sps:$4 sm:$0xff]  }
 0x2a2   :  { %4809 = vmatprep.subr.bf16.mxu1 %v11188_v62  ;;  %v11259_v62 = vld [vmem:[%s15673_s2 + $0x10a8] ss:$16 sps:$4 sm:$0xff]  }
 0x2a4   :  { %4638 = vmatpush1.bf16.msra.mxu0 %v11183_v5  ;;  %v11264_v5 = vld [vmem:[%s15673_s2 + $0x10c4] ss:$16 sps:$4 sm:$0xff]  }
 0x2a5   :  { %4810 = vmatpush1.bf16.msra.mxu1 %v11186_v11  ;;  %4639 = vmatprep.subr.bf16.mxu0 %v11191_v63  ;;  %v11267_v11 = vld [vmem:[%s15673_s2 + $0x10cc] ss:$16 sps:$4 sm:$0xff]   ;;  %v11262_v63 = vld [vmem:[%s15673_s2 + $0x10c0] ss:$16 sps:$4 sm:$0xff]  }
 0x2a6   :  { %4811 = vmatprep.subr.bf16.mxu1 %v11194_v22  ;;  %v11265_v22 = vld [vmem:[%s15673_s2 + $0x10c8] ss:$16 sps:$4 sm:$0xff]  }
 0x2a8   :  { %4640 = vmatpush1.bf16.msra.mxu0 %v11189_v14  ;;  %v11270_v14 = vld [vmem:[%s15673_s2 + $0x10e4] ss:$16 sps:$4 sm:$0xff]  }
 0x2a9   :  { %4812 = vmatpush1.bf16.msra.mxu1 %v11192_v23  ;;  %4641 = vmatprep.subr.bf16.mxu0 %v11197_v2  ;;  %v11273_v23 = vld [vmem:[%s15673_s2 + $0x10ec] ss:$16 sps:$4 sm:$0xff]   ;;  %v11268_v2 = vld [vmem:[%s15673_s2 + $0x10e0] ss:$16 sps:$4 sm:$0xff]  }
 0x2aa   :  { %4813 = vmatprep.subr.bf16.mxu1 %v11200_v1  ;;  %v11271_v1 = vld [vmem:[%s15673_s2 + $0x10e8] ss:$16 sps:$4 sm:$0xff]  }
 0x2ac   :  { %4642 = vmatpush1.bf16.msra.mxu0 %v11195_v9  ;;  %v11276_v9 = vld [vmem:[%s15673_s2 + $0x1104] ss:$16 sps:$4 sm:$0xff]  }
 0x2ad   :  { %4814 = vmatpush1.bf16.msra.mxu1 %v11198_v18  ;;  %4643 = vmatprep.subr.bf16.mxu0 %v11203_v26  ;;  %v11279_v18 = vld [vmem:[%s15673_s2 + $0x110c] ss:$16 sps:$4 sm:$0xff]   ;;  %v11274_v26 = vld [vmem:[%s15673_s2 + $0x1100] ss:$16 sps:$4 sm:$0xff]  }
 0x2ae   :  { %4815 = vmatprep.subr.bf16.mxu1 %v11206_v31  ;;  %v11277_v31 = vld [vmem:[%s15673_s2 + $0x1108] ss:$16 sps:$4 sm:$0xff]  }
 0x2b0   :  { %4644 = vmatpush1.bf16.msra.mxu0 %v11201_v20  ;;  %v11282_v20 = vld [vmem:[%s15673_s2 + $0x1124] ss:$16 sps:$4 sm:$0xff]  }
 0x2b1   :  { %4816 = vmatpush1.bf16.msra.mxu1 %v11204_v39  ;;  %4645 = vmatprep.subr.bf16.mxu0 %v11209_v42  ;;  %v11285_v39 = vld [vmem:[%s15673_s2 + $0x112c] ss:$16 sps:$4 sm:$0xff]   ;;  %v11280_v42 = vld [vmem:[%s15673_s2 + $0x1120] ss:$16 sps:$4 sm:$0xff]  }
 0x2b2   :  { %4817 = vmatprep.subr.bf16.mxu1 %v11212_v21  ;;  %v11283_v21 = vld [vmem:[%s15673_s2 + $0x1128] ss:$16 sps:$4 sm:$0xff]  }
 0x2b4   :  { %4646 = vmatpush1.bf16.msra.mxu0 %v11207_v13  ;;  %v11288_v13 = vld [vmem:[%s15673_s2 + $0x1144] ss:$16 sps:$4 sm:$0xff]  }
 0x2b5   :  { %4818 = vmatpush1.bf16.msra.mxu1 %v11210_v17  ;;  %4647 = vmatprep.subr.bf16.mxu0 %v11215_v45  ;;  %v11291_v17 = vld [vmem:[%s15673_s2 + $0x114c] ss:$16 sps:$4 sm:$0xff]   ;;  %v11286_v45 = vld [vmem:[%s15673_s2 + $0x1140] ss:$16 sps:$4 sm:$0xff]  }
 0x2b6   :  { %4819 = vmatprep.subr.bf16.mxu1 %v11218_v50  ;;  %v11289_v50 = vld [vmem:[%s15673_s2 + $0x1148] ss:$16 sps:$4 sm:$0xff]  }
 0x2b8   :  { %4648 = vmatpush1.bf16.msra.mxu0 %v11213_v60  ;;  %v11294_v60 = vld [vmem:[%s15673_s2 + $0x1164] ss:$16 sps:$4 sm:$0xff]  }
 0x2b9   :  { %4820 = vmatpush1.bf16.msra.mxu1 %v11216_v33  ;;  %4649 = vmatprep.subr.bf16.mxu0 %v11221_v38  ;;  %v11297_v33 = vld [vmem:[%s15673_s2 + $0x116c] ss:$16 sps:$4 sm:$0xff]   ;;  %v11292_v38 = vld [vmem:[%s15673_s2 + $0x1160] ss:$16 sps:$4 sm:$0xff]  }
 0x2ba   :  { %4821 = vmatprep.subr.bf16.mxu1 %v11224_v34  ;;  %v11295_v34 = vld [vmem:[%s15673_s2 + $0x1168] ss:$16 sps:$4 sm:$0xff]  }
 0x2bc   :  { %4650 = vmatpush1.bf16.msra.mxu0 %v11219_v41  ;;  %v11300_v41 = vld [vmem:[%s15673_s2 + $0x1184] ss:$16 sps:$4 sm:$0xff]  }
 0x2bd   :  { %4822 = vmatpush1.bf16.msra.mxu1 %v11222_v8  ;;  %6468 = vmatprep.subr.bf16.mxu0 %v11227_v52  ;;  %v11301_v8 = vld [vmem:[%s15673_s2 + $0x1188] ss:$16 sps:$4 sm:$0xff]   ;;  %v11306_v52 = vld [vmem:[%s15673_s2 + $0x11a4] ss:$16 sps:$4 sm:$0xff]  }
 0x2be   :  { %6640 = vmatprep.subr.bf16.mxu1 %v11230_v55  ;;  %v11309_v55 = vld [vmem:[%s15673_s2 + $0x11ac] ss:$16 sps:$4 sm:$0xff]  }
 0x2bf   :  { %4652 = vmatmul.mubr.bf16.vlgmr.msra.gmra.mrb[16].mxu0 %v9155_v44 }
 0x2c0   :  { %4824 = vmatmul.mubr.bf16.vlgmr.msra.gmra.mrb[16].mxu1 %v9155_v44  ;;  %6469 = vmatpush1.bf16.msra.mxu0 %v11225_v3  ;;  %v11304_v3 = vld [vmem:[%s15673_s2 + $0x11a0] ss:$16 sps:$4 sm:$0xff]   ;;  %v11315_v44 = vld [vmem:[%s15673_s2 + $0x11cc] ss:$16 sps:$4 sm:$0xff]  }
 0x2c1   :  { %6500 = vmatprep.mubr.bf16.mxu0 %v5161_v54  ;;  %6641 = vmatpush1.bf16.msra.mxu1 %v11228_v6  ;;  %v11310_v6 = vld [vmem:[%s15673_s2 + $0x11c0] ss:$16 sps:$4 sm:$0xff]  }
 0x2c2   :  { %6672 = vmatprep.mubr.bf16.mxu1 %v5161_v54  ;;  %6470 = vmatprep.subr.bf16.mxu0 %v11234_v7  ;;  %v14314_v7 = vld [vmem:[#allocation2 + $0x8] sm:$0xee] }
 0x2c3   :  { %6642 = vmatprep.subr.bf16.mxu1 %v11237_v51  ;;  %v14316_v51 = vld [vmem:[#allocation2 + $0x28] sm:$0xff] }
 0x2c4   :  { %6471 = vmatpush1.bf16.msra.mxu0 %v11232_v58  ;;  %v11313_v54 = vld [vmem:[%s15673_s2 + $0x11c8] ss:$16 sps:$4 sm:$0xff]   ;;  %v11318_v58 = vld [vmem:[%s15673_s2 + $0x11e4] ss:$16 sps:$4 sm:$0xff]  }
 0x2c5   :  { %6643 = vmatpush1.bf16.msra.mxu1 %v11235_v27  ;;  %6472 = vmatprep.subr.bf16.mxu0 %v11240_v29  ;;  %v14324_v27 = vld [vmem:[#allocation2 + $0x48] sm:$0x11] }
 0x2c6   :  { %6644 = vmatprep.subr.bf16.mxu1 %v11243_v32  ;;  %v11321_v29 = vld [vmem:[%s15673_s2 + $0x11ec] ss:$16 sps:$4 sm:$0xff]   ;;  %v9669_v32 = vcombine.low %v14109_v16, %v14111_v25  ;;  %v11319_v16 = vld [vmem:[%s15673_s2 + $0x11e8] ss:$16 sps:$4 sm:$0xff]   ;;  %v11325_v25 = vld [vmem:[%s15673_s2 + $0x1204] ss:$16 sps:$4 sm:$0xff]  }
 0x2c8   :  { %6473 = vmatpush1.bf16.msra.mxu0 %v11238_v35  ;;  %v9677_v35 = vcombine.low %v14119_v30, %v14119_v30  ;;  %v5156_v30 = vrot.slane %v9669_v32, 1  ;;  %v11392_v32 = vld [vmem:[%s15673_s2 + $0x1364] ss:$16 sps:$4 sm:$0xff]  }
 0x2c9   :  { %6645 = vmatpush1.bf16.msra.mxu1 %v11241_v36  ;;  %6474 = vmatprep.subr.bf16.mxu0 %v11246_v37  ;;  %v11316_v36 = vld [vmem:[%s15673_s2 + $0x11e0] ss:$16 sps:$4 sm:$0xff]   ;;  %v9672_v37 = vcombine.high %v14314_v7, %v14316_v51 }
 0x2ca   :  { %6646 = vmatprep.subr.bf16.mxu1 %v11249_v40  ;;  %v9680_v40 = vcombine.high %v14324_v27, %v14324_v27 }
 0x2cc   :  { %6475 = vmatpush1.bf16.msra.mxu0 %v11244_v43  ;;  %v5157_v43 = vrot.slane %v9677_v35, 1  ;;  %v11395_v35 = vld [vmem:[%s15673_s2 + $0x136c] ss:$16 sps:$4 sm:$0xff]  }
 0x2cd   :  { %6647 = vmatpush1.bf16.msra.mxu1 %v11247_v46  ;;  %6476 = vmatprep.subr.bf16.mxu0 %v11252_v53  ;;  %v11328_v46 = vld [vmem:[%s15673_s2 + $0x120c] ss:$16 sps:$4 sm:$0xff]   ;;  %v11323_v53 = vld [vmem:[%s15673_s2 + $0x1200] ss:$16 sps:$4 sm:$0xff]  }
 0x2ce   :  { %6648 = vmatprep.subr.bf16.mxu1 %v11255_v48  ;;  %v5165_v48 = vrot.slane %v9672_v37, 1  ;;  %v11393_v37 = vld [vmem:[%s15673_s2 + $0x1368] ss:$16 sps:$4 sm:$0xff]  }
 0x2d0   :  { %6477 = vmatpush1.bf16.msra.mxu0 %v11250_v56  ;;  %v5166_v56 = vrot.slane %v9680_v40, 1  ;;  %v11398_v40 = vld [vmem:[%s15673_s2 + $0x1384] ss:$16 sps:$4 sm:$0xff]  }
 0x2d1   :  { %6649 = vmatpush1.bf16.msra.mxu1 %v11253_v0  ;;  %6478 = vmatprep.subr.bf16.mxu0 %v11258_v57  ;;  %v11326_v0 = vld [vmem:[%s15673_s2 + $0x1208] ss:$16 sps:$4 sm:$0xff]   ;;  %v5158_v57 = vsel %vm5155_vm5, %v5156_v30, %v5157_v43  ;;  %v11404_v43 = vld [vmem:[%s15673_s2 + $0x13a4] ss:$16 sps:$4 sm:$0xff]  }
 0x2d2   :  { %6650 = vmatprep.subr.bf16.mxu1 %v11261_v59  ;;  %v11332_v59 = vld [vmem:[%s15673_s2 + $0x1224] ss:$16 sps:$4 sm:$0xff]   ;;  %v11399_v30 = vld [vmem:[%s15673_s2 + $0x1388] ss:$16 sps:$4 sm:$0xff]  }
 0x2d4   :  { %6479 = vmatpush1.bf16.msra.mxu0 %v11256_v61  ;;  %v11335_v61 = vld [vmem:[%s15673_s2 + $0x122c] ss:$16 sps:$4 sm:$0xff]  }
 0x2d5   :  { %6651 = vmatpush1.bf16.msra.mxu1 %v11259_v62  ;;  %6480 = vmatprep.subr.bf16.mxu0 %v11264_v5  ;;  %v5167_v62 = vsel %vm5155_vm5, %v5165_v48, %v5166_v56  ;;  %v11330_v5 = vld [vmem:[%s15673_s2 + $0x1220] ss:$16 sps:$4 sm:$0xff]   ;;  %v11405_v48 = vld [vmem:[%s15673_s2 + $0x13a8] ss:$16 sps:$4 sm:$0xff]   ;;  %v11410_v56 = vld [vmem:[%s15673_s2 + $0x13c4] ss:$16 sps:$4 sm:$0xff]  }
 0x2d6   :  { %6652 = vmatprep.subr.bf16.mxu1 %v11267_v11  ;;  %v11333_v11 = vld [vmem:[%s15673_s2 + $0x1228] ss:$16 sps:$4 sm:$0xff]  }
 0x2d8   :  { %6481 = vmatpush1.bf16.msra.mxu0 %v11262_v63  ;;  %v11338_v63 = vld [vmem:[%s15673_s2 + $0x1244] ss:$16 sps:$4 sm:$0xff]  }
 0x2d9   :  { %6653 = vmatpush1.bf16.msra.mxu1 %v11265_v22  ;;  %6482 = vmatprep.subr.bf16.mxu0 %v11270_v14  ;;  %v11341_v22 = vld [vmem:[%s15673_s2 + $0x124c] ss:$16 sps:$4 sm:$0xff]   ;;  %v11336_v14 = vld [vmem:[%s15673_s2 + $0x1240] ss:$16 sps:$4 sm:$0xff]  }
 0x2da   :  { %6654 = vmatprep.subr.bf16.mxu1 %v11273_v23  ;;  %v11339_v23 = vld [vmem:[%s15673_s2 + $0x1248] ss:$16 sps:$4 sm:$0xff]  }
 0x2dc   :  { %6483 = vmatpush1.bf16.msra.mxu0 %v11268_v2  ;;  %v11344_v2 = vld [vmem:[%s15673_s2 + $0x1264] ss:$16 sps:$4 sm:$0xff]  }
 0x2dd   :  { %6655 = vmatpush1.bf16.msra.mxu1 %v11271_v1  ;;  %6484 = vmatprep.subr.bf16.mxu0 %v11276_v9  ;;  %v11347_v1 = vld [vmem:[%s15673_s2 + $0x126c] ss:$16 sps:$4 sm:$0xff]   ;;  %v11342_v9 = vld [vmem:[%s15673_s2 + $0x1260] ss:$16 sps:$4 sm:$0xff]  }
 0x2de   :  { %6656 = vmatprep.subr.bf16.mxu1 %v11279_v18  ;;  %v11345_v18 = vld [vmem:[%s15673_s2 + $0x1268] ss:$16 sps:$4 sm:$0xff]  }
 0x2e0   :  { %6485 = vmatpush1.bf16.msra.mxu0 %v11274_v26  ;;  %v11350_v26 = vld [vmem:[%s15673_s2 + $0x1284] ss:$16 sps:$4 sm:$0xff]  }
 0x2e1   :  { %6657 = vmatpush1.bf16.msra.mxu1 %v11277_v31  ;;  %6486 = vmatprep.subr.bf16.mxu0 %v11282_v20  ;;  %v11353_v31 = vld [vmem:[%s15673_s2 + $0x128c] ss:$16 sps:$4 sm:$0xff]   ;;  %v11348_v20 = vld [vmem:[%s15673_s2 + $0x1280] ss:$16 sps:$4 sm:$0xff]  }
 0x2e2   :  { %6658 = vmatprep.subr.bf16.mxu1 %v11285_v39  ;;  %v11351_v39 = vld [vmem:[%s15673_s2 + $0x1288] ss:$16 sps:$4 sm:$0xff]  }
 0x2e4   :  { %6487 = vmatpush1.bf16.msra.mxu0 %v11280_v42  ;;  %v11356_v42 = vld [vmem:[%s15673_s2 + $0x12a4] ss:$16 sps:$4 sm:$0xff]  }
 0x2e5   :  { %6659 = vmatpush1.bf16.msra.mxu1 %v11283_v21  ;;  %6488 = vmatprep.subr.bf16.mxu0 %v11288_v13  ;;  %v11359_v21 = vld [vmem:[%s15673_s2 + $0x12ac] ss:$16 sps:$4 sm:$0xff]   ;;  %v11354_v13 = vld [vmem:[%s15673_s2 + $0x12a0] ss:$16 sps:$4 sm:$0xff]  }
 0x2e6   :  { %6660 = vmatprep.subr.bf16.mxu1 %v11291_v17  ;;  %v11357_v17 = vld [vmem:[%s15673_s2 + $0x12a8] ss:$16 sps:$4 sm:$0xff]  }
 0x2e8   :  { %6489 = vmatpush1.bf16.msra.mxu0 %v11286_v45  ;;  %v11362_v45 = vld [vmem:[%s15673_s2 + $0x12c4] ss:$16 sps:$4 sm:$0xff]  }
 0x2e9   :  { %6661 = vmatpush1.bf16.msra.mxu1 %v11289_v50  ;;  %6490 = vmatprep.subr.bf16.mxu0 %v11294_v60  ;;  %v11365_v50 = vld [vmem:[%s15673_s2 + $0x12cc] ss:$16 sps:$4 sm:$0xff]   ;;  %v11360_v60 = vld [vmem:[%s15673_s2 + $0x12c0] ss:$16 sps:$4 sm:$0xff]  }
 0x2ea   :  { %6662 = vmatprep.subr.bf16.mxu1 %v11297_v33  ;;  %v11363_v33 = vld [vmem:[%s15673_s2 + $0x12c8] ss:$16 sps:$4 sm:$0xff]  }
 0x2ec   :  { %6491 = vmatpush1.bf16.msra.mxu0 %v11292_v38  ;;  %v11368_v38 = vld [vmem:[%s15673_s2 + $0x12e4] ss:$16 sps:$4 sm:$0xff]  }
 0x2ed   :  { %6663 = vmatpush1.bf16.msra.mxu1 %v11295_v34  ;;  %6492 = vmatprep.subr.bf16.mxu0 %v11300_v41  ;;  %v11371_v34 = vld [vmem:[%s15673_s2 + $0x12ec] ss:$16 sps:$4 sm:$0xff]   ;;  %v11366_v41 = vld [vmem:[%s15673_s2 + $0x12e0] ss:$16 sps:$4 sm:$0xff]  }
 0x2ee   :  { %6664 = vmatprep.subr.bf16.mxu1 %v11303_v47  ;;  %v11369_v47 = vld [vmem:[%s15673_s2 + $0x12e8] ss:$16 sps:$4 sm:$0xff]  }
 0x2f0   :  { %6493 = vmatpush1.bf16.msra.mxu0 %v11298_v49  ;;  %v11374_v49 = vld [vmem:[%s15673_s2 + $0x1304] ss:$16 sps:$4 sm:$0xff]  }
 0x2f1   :  { %6665 = vmatpush1.bf16.msra.mxu1 %v11301_v8  ;;  %6494 = vmatprep.subr.bf16.mxu0 %v11306_v52  ;;  %v11377_v8 = vld [vmem:[%s15673_s2 + $0x130c] ss:$16 sps:$4 sm:$0xff]   ;;  %v11372_v52 = vld [vmem:[%s15673_s2 + $0x1300] ss:$16 sps:$4 sm:$0xff]  }
 0x2f2   :  { %6666 = vmatprep.subr.bf16.mxu1 %v11309_v55  ;;  %v11375_v55 = vld [vmem:[%s15673_s2 + $0x1308] ss:$16 sps:$4 sm:$0xff]  }
 0x2f4   :  { %6495 = vmatpush1.bf16.msra.mxu0 %v11304_v3  ;;  %v11380_v3 = vld [vmem:[%s15673_s2 + $0x1324] ss:$16 sps:$4 sm:$0xff]  }
 0x2f5   :  { %6667 = vmatpush1.bf16.msra.mxu1 %v11307_v15  ;;  %6496 = vmatprep.subr.bf16.mxu0 %v11312_v4  ;;  %v11383_v15 = vld [vmem:[%s15673_s2 + $0x132c] ss:$16 sps:$4 sm:$0xff]   ;;  %v11378_v4 = vld [vmem:[%s15673_s2 + $0x1320] ss:$16 sps:$4 sm:$0xff]  }
 0x2f6   :  { %6668 = vmatprep.subr.bf16.mxu1 %v11315_v44  ;;  %v11381_v44 = vld [vmem:[%s15673_s2 + $0x1328] ss:$16 sps:$4 sm:$0xff]  }
 0x2f8   :  { %6497 = vmatpush1.bf16.msra.mxu0 %v11310_v6  ;;  %v11386_v6 = vld [vmem:[%s15673_s2 + $0x1344] ss:$16 sps:$4 sm:$0xff]  }
 0x2f9   :  { %6669 = vmatpush1.bf16.msra.mxu1 %v11313_v54  ;;  %6498 = vmatprep.subr.bf16.mxu0 %v11318_v58  ;;  %v11389_v54 = vld [vmem:[%s15673_s2 + $0x134c] ss:$16 sps:$4 sm:$0xff]   ;;  %v11384_v58 = vld [vmem:[%s15673_s2 + $0x1340] ss:$16 sps:$4 sm:$0xff]  }
 0x2fa   :  { %6670 = vmatprep.subr.bf16.mxu1 %v11321_v29  ;;  %v11387_v29 = vld [vmem:[%s15673_s2 + $0x1348] ss:$16 sps:$4 sm:$0xff]  }
 0x2fc   :  { %6499 = vmatpush1.bf16.msra.mxu0 %v11316_v36  ;;  %v11390_v36 = vld [vmem:[%s15673_s2 + $0x1360] ss:$16 sps:$4 sm:$0xff]  }
 0x2fd   :  { %6671 = vmatpush1.bf16.msra.mxu1 %v11319_v16  ;;  %6511 = vmatprep.subr.bf16.mxu0 %v11325_v25  ;;  %v11401_v16 = vld [vmem:[%s15673_s2 + $0x138c] ss:$16 sps:$4 sm:$0xff]   ;;  %v11396_v25 = vld [vmem:[%s15673_s2 + $0x1380] ss:$16 sps:$4 sm:$0xff]  }
 0x2fe   :  { %6683 = vmatprep.subr.bf16.mxu1 %v11328_v46  ;;  %v11407_v46 = vld [vmem:[%s15673_s2 + $0x13ac] ss:$16 sps:$4 sm:$0xff]  }
 0x2ff   :  { %6501 = vmatmul.mubr.bf16.vlgmr.msra.gmra.mrb[16].mxu0 %v5158_v57 }
 0x300   :  { %6673 = vmatmul.mubr.bf16.vlgmr.msra.gmra.mrb[16].mxu1 %v5158_v57  ;;  %6512 = vmatpush1.bf16.msra.mxu0 %v11323_v53  ;;  %v11402_v53 = vld [vmem:[%s15673_s2 + $0x13a0] ss:$16 sps:$4 sm:$0xff]  }
 0x301   :  { %6543 = vmatprep.mubr.bf16.mxu0 %v5167_v62  ;;  %6684 = vmatpush1.bf16.msra.mxu1 %v11326_v0  ;;  %v11413_v0 = vld [vmem:[%s15673_s2 + $0x13cc] ss:$16 sps:$4 sm:$0xff]   ;;  %v11408_v57 = vld [vmem:[%s15673_s2 + $0x13c0] ss:$16 sps:$4 sm:$0xff]  }
 0x302   :  { %6715 = vmatprep.mubr.bf16.mxu1 %v5167_v62  ;;  %6513 = vmatprep.subr.bf16.mxu0 %v11332_v59  ;;  %v14522_v59 = vld [vmem:[#allocation2 + $0x10] sm:$0xee]  ;;  %v11411_v62 = vld [vmem:[%s15673_s2 + $0x13c8] ss:$16 sps:$4 sm:$0xff]  }
 0x303   :  { %6685 = vmatprep.subr.bf16.mxu1 %v11335_v61  ;;  %v14524_v61 = vld [vmem:[#allocation2 + $0x30] sm:$0xff] }
 0x304   :  { %6514 = vmatpush1.bf16.msra.mxu0 %v11330_v5  ;;  %v11416_v5 = vld [vmem:[%s15673_s2 + $0x13e4] ss:$16 sps:$4 sm:$0xff]  }
 0x305   :  { %6686 = vmatpush1.bf16.msra.mxu1 %v11333_v11  ;;  %6515 = vmatprep.subr.bf16.mxu0 %v11338_v63  ;;  %v14532_v11 = vld [vmem:[#allocation2 + $0x50] sm:$0x11]  ;;  %v11419_v63 = vld [vmem:[%s15673_s2 + $0x13ec] ss:$16 sps:$4 sm:$0xff]  }
 0x306   :  { %6687 = vmatprep.subr.bf16.mxu1 %v11341_v22  ;;  %v9671_v22 = vcombine.low %v14314_v7, %v14316_v51  ;;  %v11417_v7 = vld [vmem:[%s15673_s2 + $0x13e8] ss:$16 sps:$4 sm:$0xff]   ;;  %v11423_v51 = vld [vmem:[%s15673_s2 + $0x1404] ss:$16 sps:$4 sm:$0xff]  }
 0x308   :  { %6516 = vmatpush1.bf16.msra.mxu0 %v11336_v14  ;;  %v9679_v14 = vcombine.low %v14324_v27, %v14324_v27  ;;  %v5162_v27 = vrot.slane %v9671_v22, 1  ;;  %v11490_v22 = vld [vmem:[%s15673_s2 + $0x1564] ss:$16 sps:$4 sm:$0xff]  }
 0x309   :  { %6688 = vmatpush1.bf16.msra.mxu1 %v11339_v23  ;;  %6517 = vmatprep.subr.bf16.mxu0 %v11344_v2  ;;  %v11414_v23 = vld [vmem:[%s15673_s2 + $0x13e0] ss:$16 sps:$4 sm:$0xff]   ;;  %v9674_v2 = vcombine.high %v14522_v59, %v14524_v61 }
 0x30a   :  { %6689 = vmatprep.subr.bf16.mxu1 %v11347_v1  ;;  %v9682_v1 = vcombine.high %v14532_v11, %v14532_v11 }
 0x30c   :  { %6518 = vmatpush1.bf16.msra.mxu0 %v11342_v9  ;;  %v5163_v9 = vrot.slane %v9679_v14, 1  ;;  %v11493_v14 = vld [vmem:[%s15673_s2 + $0x156c] ss:$16 sps:$4 sm:$0xff]  }
 0x30d   :  { %6690 = vmatpush1.bf16.msra.mxu1 %v11345_v18  ;;  %6519 = vmatprep.subr.bf16.mxu0 %v11350_v26  ;;  %v11426_v18 = vld [vmem:[%s15673_s2 + $0x140c] ss:$16 sps:$4 sm:$0xff]   ;;  %v11421_v26 = vld [vmem:[%s15673_s2 + $0x1400] ss:$16 sps:$4 sm:$0xff]  }
 0x30e   :  { %6691 = vmatprep.subr.bf16.mxu1 %v11353_v31  ;;  %v5171_v31 = vrot.slane %v9674_v2, 1  ;;  %v11491_v2 = vld [vmem:[%s15673_s2 + $0x1568] ss:$16 sps:$4 sm:$0xff]  }
 0x310   :  { %6520 = vmatpush1.bf16.msra.mxu0 %v11348_v20  ;;  %v5172_v20 = vrot.slane %v9682_v1, 1  ;;  %v11496_v1 = vld [vmem:[%s15673_s2 + $0x1584] ss:$16 sps:$4 sm:$0xff]  }
 0x311   :  { %6692 = vmatpush1.bf16.msra.mxu1 %v11351_v39  ;;  %6521 = vmatprep.subr.bf16.mxu0 %v11356_v42  ;;  %v11424_v39 = vld [vmem:[%s15673_s2 + $0x1408] ss:$16 sps:$4 sm:$0xff]   ;;  %v5164_v42 = vsel %vm5155_vm5, %v5162_v27, %v5163_v9  ;;  %v11502_v9 = vld [vmem:[%s15673_s2 + $0x15a4] ss:$16 sps:$4 sm:$0xff]  }
 0x312   :  { %6693 = vmatprep.subr.bf16.mxu1 %v11359_v21  ;;  %v11430_v21 = vld [vmem:[%s15673_s2 + $0x1424] ss:$16 sps:$4 sm:$0xff]   ;;  %v11497_v27 = vld [vmem:[%s15673_s2 + $0x1588] ss:$16 sps:$4 sm:$0xff]  }
 0x314   :  { %6522 = vmatpush1.bf16.msra.mxu0 %v11354_v13  ;;  %v11433_v13 = vld [vmem:[%s15673_s2 + $0x142c] ss:$16 sps:$4 sm:$0xff]  }
 0x315   :  { %6694 = vmatpush1.bf16.msra.mxu1 %v11357_v17  ;;  %6523 = vmatprep.subr.bf16.mxu0 %v11362_v45  ;;  %v5173_v17 = vsel %vm5155_vm5, %v5171_v31, %v5172_v20  ;;  %v11428_v45 = vld [vmem:[%s15673_s2 + $0x1420] ss:$16 sps:$4 sm:$0xff]   ;;  %v11503_v31 = vld [vmem:[%s15673_s2 + $0x15a8] ss:$16 sps:$4 sm:$0xff]   ;;  %v11508_v20 = vld [vmem:[%s15673_s2 + $0x15c4] ss:$16 sps:$4 sm:$0xff]  }
 0x316   :  { %6695 = vmatprep.subr.bf16.mxu1 %v11365_v50  ;;  %v11431_v50 = vld [vmem:[%s15673_s2 + $0x1428] ss:$16 sps:$4 sm:$0xff]  }
 0x318   :  { %6524 = vmatpush1.bf16.msra.mxu0 %v11360_v60  ;;  %v11436_v60 = vld [vmem:[%s15673_s2 + $0x1444] ss:$16 sps:$4 sm:$0xff]  }
 0x319   :  { %6696 = vmatpush1.bf16.msra.mxu1 %v11363_v33  ;;  %6525 = vmatprep.subr.bf16.mxu0 %v11368_v38  ;;  %v11439_v33 = vld [vmem:[%s15673_s2 + $0x144c] ss:$16 sps:$4 sm:$0xff]   ;;  %v11434_v38 = vld [vmem:[%s15673_s2 + $0x1440] ss:$16 sps:$4 sm:$0xff]  }
 0x31a   :  { %6697 = vmatprep.subr.bf16.mxu1 %v11371_v34  ;;  %v11437_v34 = vld [vmem:[%s15673_s2 + $0x1448] ss:$16 sps:$4 sm:$0xff]  }
 0x31c   :  { %6526 = vmatpush1.bf16.msra.mxu0 %v11366_v41  ;;  %v11442_v41 = vld [vmem:[%s15673_s2 + $0x1464] ss:$16 sps:$4 sm:$0xff]  }
 0x31d   :  { %6698 = vmatpush1.bf16.msra.mxu1 %v11369_v47  ;;  %6527 = vmatprep.subr.bf16.mxu0 %v11374_v49  ;;  %v11445_v47 = vld [vmem:[%s15673_s2 + $0x146c] ss:$16 sps:$4 sm:$0xff]   ;;  %v11440_v49 = vld [vmem:[%s15673_s2 + $0x1460] ss:$16 sps:$4 sm:$0xff]  }
 0x31e   :  { %6699 = vmatprep.subr.bf16.mxu1 %v11377_v8  ;;  %v11443_v8 = vld [vmem:[%s15673_s2 + $0x1468] ss:$16 sps:$4 sm:$0xff]  }
 0x320   :  { %6528 = vmatpush1.bf16.msra.mxu0 %v11372_v52  ;;  %v11448_v52 = vld [vmem:[%s15673_s2 + $0x1484] ss:$16 sps:$4 sm:$0xff]  }
 0x321   :  { %6700 = vmatpush1.bf16.msra.mxu1 %v11375_v55  ;;  %6529 = vmatprep.subr.bf16.mxu0 %v11380_v3  ;;  %v11451_v55 = vld [vmem:[%s15673_s2 + $0x148c] ss:$16 sps:$4 sm:$0xff]   ;;  %v11446_v3 = vld [vmem:[%s15673_s2 + $0x1480] ss:$16 sps:$4 sm:$0xff]  }
 0x322   :  { %6701 = vmatprep.subr.bf16.mxu1 %v11383_v15  ;;  %v11449_v15 = vld [vmem:[%s15673_s2 + $0x1488] ss:$16 sps:$4 sm:$0xff]  }
 0x324   :  { %6530 = vmatpush1.bf16.msra.mxu0 %v11378_v4  ;;  %v11454_v4 = vld [vmem:[%s15673_s2 + $0x14a4] ss:$16 sps:$4 sm:$0xff]  }
 0x325   :  { %6702 = vmatpush1.bf16.msra.mxu1 %v11381_v44  ;;  %6531 = vmatprep.subr.bf16.mxu0 %v11386_v6  ;;  %v11457_v44 = vld [vmem:[%s15673_s2 + $0x14ac] ss:$16 sps:$4 sm:$0xff]   ;;  %v11452_v6 = vld [vmem:[%s15673_s2 + $0x14a0] ss:$16 sps:$4 sm:$0xff]  }
 0x326   :  { %6703 = vmatprep.subr.bf16.mxu1 %v11389_v54  ;;  %v11455_v54 = vld [vmem:[%s15673_s2 + $0x14a8] ss:$16 sps:$4 sm:$0xff]  }
 0x328   :  { %6532 = vmatpush1.bf16.msra.mxu0 %v11384_v58  ;;  %v11460_v58 = vld [vmem:[%s15673_s2 + $0x14c4] ss:$16 sps:$4 sm:$0xff]  }
 0x329   :  { %6704 = vmatpush1.bf16.msra.mxu1 %v11387_v29  ;;  %6533 = vmatprep.subr.bf16.mxu0 %v11392_v32  ;;  %v11463_v29 = vld [vmem:[%s15673_s2 + $0x14cc] ss:$16 sps:$4 sm:$0xff]   ;;  %v11458_v32 = vld [vmem:[%s15673_s2 + $0x14c0] ss:$16 sps:$4 sm:$0xff]  }
 0x32a   :  { %6705 = vmatprep.subr.bf16.mxu1 %v11395_v35  ;;  %v11461_v35 = vld [vmem:[%s15673_s2 + $0x14c8] ss:$16 sps:$4 sm:$0xff]  }
 0x32c   :  { %6534 = vmatpush1.bf16.msra.mxu0 %v11390_v36  ;;  %v11466_v36 = vld [vmem:[%s15673_s2 + $0x14e4] ss:$16 sps:$4 sm:$0xff]  }
 0x32d   :  { %6706 = vmatpush1.bf16.msra.mxu1 %v11393_v37  ;;  %6535 = vmatprep.subr.bf16.mxu0 %v11398_v40  ;;  %v11469_v37 = vld [vmem:[%s15673_s2 + $0x14ec] ss:$16 sps:$4 sm:$0xff]   ;;  %v11464_v40 = vld [vmem:[%s15673_s2 + $0x14e0] ss:$16 sps:$4 sm:$0xff]  }
 0x32e   :  { %6707 = vmatprep.subr.bf16.mxu1 %v11401_v16  ;;  %v11467_v16 = vld [vmem:[%s15673_s2 + $0x14e8] ss:$16 sps:$4 sm:$0xff]  }
 0x330   :  { %6536 = vmatpush1.bf16.msra.mxu0 %v11396_v25  ;;  %v11472_v25 = vld [vmem:[%s15673_s2 + $0x1504] ss:$16 sps:$4 sm:$0xff]  }
 0x331   :  { %6708 = vmatpush1.bf16.msra.mxu1 %v11399_v30  ;;  %6537 = vmatprep.subr.bf16.mxu0 %v11404_v43  ;;  %v11475_v30 = vld [vmem:[%s15673_s2 + $0x150c] ss:$16 sps:$4 sm:$0xff]   ;;  %v11470_v43 = vld [vmem:[%s15673_s2 + $0x1500] ss:$16 sps:$4 sm:$0xff]  }
 0x332   :  { %6709 = vmatprep.subr.bf16.mxu1 %v11407_v46  ;;  %v11473_v46 = vld [vmem:[%s15673_s2 + $0x1508] ss:$16 sps:$4 sm:$0xff]  }
 0x334   :  { %6538 = vmatpush1.bf16.msra.mxu0 %v11402_v53  ;;  %v11478_v53 = vld [vmem:[%s15673_s2 + $0x1524] ss:$16 sps:$4 sm:$0xff]  }
 0x335   :  { %6710 = vmatpush1.bf16.msra.mxu1 %v11405_v48  ;;  %6539 = vmatprep.subr.bf16.mxu0 %v11410_v56  ;;  %v11481_v48 = vld [vmem:[%s15673_s2 + $0x152c] ss:$16 sps:$4 sm:$0xff]   ;;  %v11476_v56 = vld [vmem:[%s15673_s2 + $0x1520] ss:$16 sps:$4 sm:$0xff]  }
 0x336   :  { %6711 = vmatprep.subr.bf16.mxu1 %v11413_v0  ;;  %v11479_v0 = vld [vmem:[%s15673_s2 + $0x1528] ss:$16 sps:$4 sm:$0xff]  }
 0x338   :  { %6540 = vmatpush1.bf16.msra.mxu0 %v11408_v57  ;;  %v11484_v57 = vld [vmem:[%s15673_s2 + $0x1544] ss:$16 sps:$4 sm:$0xff]  }
 0x339   :  { %6712 = vmatpush1.bf16.msra.mxu1 %v11411_v62  ;;  %6541 = vmatprep.subr.bf16.mxu0 %v11416_v5  ;;  %v11487_v62 = vld [vmem:[%s15673_s2 + $0x154c] ss:$16 sps:$4 sm:$0xff]   ;;  %v11482_v5 = vld [vmem:[%s15673_s2 + $0x1540] ss:$16 sps:$4 sm:$0xff]  }
 0x33a   :  { %6713 = vmatprep.subr.bf16.mxu1 %v11419_v63  ;;  %v11485_v63 = vld [vmem:[%s15673_s2 + $0x1548] ss:$16 sps:$4 sm:$0xff]  }
 0x33c   :  { %6542 = vmatpush1.bf16.msra.mxu0 %v11414_v23  ;;  %v11488_v23 = vld [vmem:[%s15673_s2 + $0x1560] ss:$16 sps:$4 sm:$0xff]  }
 0x33d   :  { %6714 = vmatpush1.bf16.msra.mxu1 %v11417_v7  ;;  %6554 = vmatprep.subr.bf16.mxu0 %v11423_v51  ;;  %v11499_v7 = vld [vmem:[%s15673_s2 + $0x158c] ss:$16 sps:$4 sm:$0xff]   ;;  %v11494_v51 = vld [vmem:[%s15673_s2 + $0x1580] ss:$16 sps:$4 sm:$0xff]  }
 0x33e   :  { %6726 = vmatprep.subr.bf16.mxu1 %v11426_v18  ;;  %v11505_v18 = vld [vmem:[%s15673_s2 + $0x15ac] ss:$16 sps:$4 sm:$0xff]  }
 0x33f   :  { %6544 = vmatmul.mubr.bf16.vlgmr.msra.gmra.mrb[16].mxu0 %v5164_v42 }
 0x340   :  { %6716 = vmatmul.mubr.bf16.vlgmr.msra.gmra.mrb[16].mxu1 %v5164_v42  ;;  %6555 = vmatpush1.bf16.msra.mxu0 %v11421_v26  ;;  %v11500_v26 = vld [vmem:[%s15673_s2 + $0x15a0] ss:$16 sps:$4 sm:$0xff]  }
 0x341   :  { %6586 = vmatprep.mubr.bf16.mxu0 %v5173_v17  ;;  %6727 = vmatpush1.bf16.msra.mxu1 %v11424_v39  ;;  %v11511_v39 = vld [vmem:[%s15673_s2 + $0x15cc] ss:$16 sps:$4 sm:$0xff]   ;;  %v11506_v42 = vld [vmem:[%s15673_s2 + $0x15c0] ss:$16 sps:$4 sm:$0xff]  }
 0x342   :  { %6758 = vmatprep.mubr.bf16.mxu1 %v5173_v17  ;;  %6556 = vmatprep.subr.bf16.mxu0 %v11430_v21  ;;  %v14730_v21 = vld [vmem:[#allocation2 + $0x18] sm:$0xee] }
 0x343   :  { %6728 = vmatprep.subr.bf16.mxu1 %v11433_v13  ;;  %v14732_v13 = vld [vmem:[#allocation2 + $0x38] sm:$0xff] }
 0x344   :  { %6557 = vmatpush1.bf16.msra.mxu0 %v11428_v45  ;;  %v11509_v17 = vld [vmem:[%s15673_s2 + $0x15c8] ss:$16 sps:$4 sm:$0xff]   ;;  %v11514_v45 = vld [vmem:[%s15673_s2 + $0x15e4] ss:$16 sps:$4 sm:$0xff]  }
 0x345   :  { %6729 = vmatpush1.bf16.msra.mxu1 %v11431_v50  ;;  %6558 = vmatprep.subr.bf16.mxu0 %v11436_v60  ;;  %v14740_v50 = vld [vmem:[#allocation2 + $0x58] sm:$0x11] }
 0x346   :  { %6730 = vmatprep.subr.bf16.mxu1 %v11439_v33  ;;  %v11517_v60 = vld [vmem:[%s15673_s2 + $0x15ec] ss:$16 sps:$4 sm:$0xff]   ;;  %v9673_v33 = vcombine.low %v14522_v59, %v14524_v61  ;;  %v11515_v59 = vld [vmem:[%s15673_s2 + $0x15e8] ss:$16 sps:$4 sm:$0xff]   ;;  %v11521_v61 = vld [vmem:[%s15673_s2 + $0x1604] ss:$16 sps:$4 sm:$0xff]  }
 0x348   :  { %6559 = vmatpush1.bf16.msra.mxu0 %v11434_v38  ;;  %v9681_v38 = vcombine.low %v14532_v11, %v14532_v11  ;;  %v5168_v11 = vrot.slane %v9673_v33, 1  ;;  %v11588_v33 = vld [vmem:[%s15673_s2 + $0x1764] ss:$16 sps:$4 sm:$0xff]  }
 0x349   :  { %6731 = vmatpush1.bf16.msra.mxu1 %v11437_v34  ;;  %6560 = vmatprep.subr.bf16.mxu0 %v11442_v41  ;;  %v11512_v34 = vld [vmem:[%s15673_s2 + $0x15e0] ss:$16 sps:$4 sm:$0xff]   ;;  %v9676_v41 = vcombine.high %v14730_v21, %v14732_v13 }
 0x34a   :  { %6732 = vmatprep.subr.bf16.mxu1 %v11445_v47  ;;  %v9684_v47 = vcombine.high %v14740_v50, %v14740_v50 }
 0x34c   :  { %6561 = vmatpush1.bf16.msra.mxu0 %v11440_v49  ;;  %v5169_v49 = vrot.slane %v9681_v38, 1  ;;  %v11591_v38 = vld [vmem:[%s15673_s2 + $0x176c] ss:$16 sps:$4 sm:$0xff]  }
 0x34d   :  { %6733 = vmatpush1.bf16.msra.mxu1 %v11443_v8  ;;  %6562 = vmatprep.subr.bf16.mxu0 %v11448_v52  ;;  %v11524_v8 = vld [vmem:[%s15673_s2 + $0x160c] ss:$16 sps:$4 sm:$0xff]   ;;  %v11519_v52 = vld [vmem:[%s15673_s2 + $0x1600] ss:$16 sps:$4 sm:$0xff]  }
 0x34e   :  { %6734 = vmatprep.subr.bf16.mxu1 %v11451_v55  ;;  %v5177_v55 = vrot.slane %v9676_v41, 1  ;;  %v11589_v41 = vld [vmem:[%s15673_s2 + $0x1768] ss:$16 sps:$4 sm:$0xff]  }
 0x350   :  { %6563 = vmatpush1.bf16.msra.mxu0 %v11446_v3  ;;  %v5178_v3 = vrot.slane %v9684_v47, 1  ;;  %v11594_v47 = vld [vmem:[%s15673_s2 + $0x1784] ss:$16 sps:$4 sm:$0xff]  }
 0x351   :  { %6735 = vmatpush1.bf16.msra.mxu1 %v11449_v15  ;;  %6564 = vmatprep.subr.bf16.mxu0 %v11454_v4  ;;  %v11522_v15 = vld [vmem:[%s15673_s2 + $0x1608] ss:$16 sps:$4 sm:$0xff]   ;;  %v5170_v4 = vsel %vm5155_vm5, %v5168_v11, %v5169_v49  ;;  %v11600_v49 = vld [vmem:[%s15673_s2 + $0x17a4] ss:$16 sps:$4 sm:$0xff]  }
 0x352   :  { %6736 = vmatprep.subr.bf16.mxu1 %v11457_v44  ;;  %v11528_v44 = vld [vmem:[%s15673_s2 + $0x1624] ss:$16 sps:$4 sm:$0xff]   ;;  %v11595_v11 = vld [vmem:[%s15673_s2 + $0x1788] ss:$16 sps:$4 sm:$0xff]  }
 0x354   :  { %6565 = vmatpush1.bf16.msra.mxu0 %v11452_v6  ;;  %v11531_v6 = vld [vmem:[%s15673_s2 + $0x162c] ss:$16 sps:$4 sm:$0xff]  }
 0x355   :  { %6737 = vmatpush1.bf16.msra.mxu1 %v11455_v54  ;;  %6566 = vmatprep.subr.bf16.mxu0 %v11460_v58  ;;  %v5179_v54 = vsel %vm5155_vm5, %v5177_v55, %v5178_v3  ;;  %v11526_v58 = vld [vmem:[%s15673_s2 + $0x1620] ss:$16 sps:$4 sm:$0xff]   ;;  %v11601_v55 = vld [vmem:[%s15673_s2 + $0x17a8] ss:$16 sps:$4 sm:$0xff]   ;;  %v11606_v3 = vld [vmem:[%s15673_s2 + $0x17c4] ss:$16 sps:$4 sm:$0xff]  }
 0x356   :  { %6738 = vmatprep.subr.bf16.mxu1 %v11463_v29  ;;  %v11529_v29 = vld [vmem:[%s15673_s2 + $0x1628] ss:$16 sps:$4 sm:$0xff]  }
 0x358   :  { %6567 = vmatpush1.bf16.msra.mxu0 %v11458_v32  ;;  %v11534_v32 = vld [vmem:[%s15673_s2 + $0x1644] ss:$16 sps:$4 sm:$0xff]  }
 0x359   :  { %6739 = vmatpush1.bf16.msra.mxu1 %v11461_v35  ;;  %6568 = vmatprep.subr.bf16.mxu0 %v11466_v36  ;;  %v11537_v35 = vld [vmem:[%s15673_s2 + $0x164c] ss:$16 sps:$4 sm:$0xff]   ;;  %v11532_v36 = vld [vmem:[%s15673_s2 + $0x1640] ss:$16 sps:$4 sm:$0xff]  }
 0x35a   :  { %6740 = vmatprep.subr.bf16.mxu1 %v11469_v37  ;;  %v11535_v37 = vld [vmem:[%s15673_s2 + $0x1648] ss:$16 sps:$4 sm:$0xff]  }
 0x35c   :  { %6569 = vmatpush1.bf16.msra.mxu0 %v11464_v40  ;;  %v11540_v40 = vld [vmem:[%s15673_s2 + $0x1664] ss:$16 sps:$4 sm:$0xff]  }
 0x35d   :  { %6741 = vmatpush1.bf16.msra.mxu1 %v11467_v16  ;;  %6570 = vmatprep.subr.bf16.mxu0 %v11472_v25  ;;  %v11543_v16 = vld [vmem:[%s15673_s2 + $0x166c] ss:$16 sps:$4 sm:$0xff]   ;;  %v11538_v25 = vld [vmem:[%s15673_s2 + $0x1660] ss:$16 sps:$4 sm:$0xff]  }
 0x35e   :  { %6742 = vmatprep.subr.bf16.mxu1 %v11475_v30  ;;  %v11541_v30 = vld [vmem:[%s15673_s2 + $0x1668] ss:$16 sps:$4 sm:$0xff]  }
 0x360   :  { %6571 = vmatpush1.bf16.msra.mxu0 %v11470_v43  ;;  %v11546_v43 = vld [vmem:[%s15673_s2 + $0x1684] ss:$16 sps:$4 sm:$0xff]  }
 0x361   :  { %6743 = vmatpush1.bf16.msra.mxu1 %v11473_v46  ;;  %6572 = vmatprep.subr.bf16.mxu0 %v11478_v53  ;;  %v11549_v46 = vld [vmem:[%s15673_s2 + $0x168c] ss:$16 sps:$4 sm:$0xff]   ;;  %v11544_v53 = vld [vmem:[%s15673_s2 + $0x1680] ss:$16 sps:$4 sm:$0xff]  }
 0x362   :  { %6744 = vmatprep.subr.bf16.mxu1 %v11481_v48  ;;  %v11547_v48 = vld [vmem:[%s15673_s2 + $0x1688] ss:$16 sps:$4 sm:$0xff]  }
 0x364   :  { %6573 = vmatpush1.bf16.msra.mxu0 %v11476_v56  ;;  %v11552_v56 = vld [vmem:[%s15673_s2 + $0x16a4] ss:$16 sps:$4 sm:$0xff]  }
 0x365   :  { %6745 = vmatpush1.bf16.msra.mxu1 %v11479_v0  ;;  %6574 = vmatprep.subr.bf16.mxu0 %v11484_v57  ;;  %v11555_v0 = vld [vmem:[%s15673_s2 + $0x16ac] ss:$16 sps:$4 sm:$0xff]   ;;  %v11550_v57 = vld [vmem:[%s15673_s2 + $0x16a0] ss:$16 sps:$4 sm:$0xff]  }
 0x366   :  { %6746 = vmatprep.subr.bf16.mxu1 %v11487_v62  ;;  %v11553_v62 = vld [vmem:[%s15673_s2 + $0x16a8] ss:$16 sps:$4 sm:$0xff]  }
 0x368   :  { %6575 = vmatpush1.bf16.msra.mxu0 %v11482_v5  ;;  %v11558_v5 = vld [vmem:[%s15673_s2 + $0x16c4] ss:$16 sps:$4 sm:$0xff]  }
 0x369   :  { %6747 = vmatpush1.bf16.msra.mxu1 %v11485_v63  ;;  %6576 = vmatprep.subr.bf16.mxu0 %v11490_v22  ;;  %v11561_v63 = vld [vmem:[%s15673_s2 + $0x16cc] ss:$16 sps:$4 sm:$0xff]   ;;  %v11556_v22 = vld [vmem:[%s15673_s2 + $0x16c0] ss:$16 sps:$4 sm:$0xff]  }
 0x36a   :  { %6748 = vmatprep.subr.bf16.mxu1 %v11493_v14  ;;  %v11559_v14 = vld [vmem:[%s15673_s2 + $0x16c8] ss:$16 sps:$4 sm:$0xff]  }
 0x36c   :  { %6577 = vmatpush1.bf16.msra.mxu0 %v11488_v23  ;;  %v11564_v23 = vld [vmem:[%s15673_s2 + $0x16e4] ss:$16 sps:$4 sm:$0xff]  }
 0x36d   :  { %6749 = vmatpush1.bf16.msra.mxu1 %v11491_v2  ;;  %6578 = vmatprep.subr.bf16.mxu0 %v11496_v1  ;;  %v11567_v2 = vld [vmem:[%s15673_s2 + $0x16ec] ss:$16 sps:$4 sm:$0xff]   ;;  %v11562_v1 = vld [vmem:[%s15673_s2 + $0x16e0] ss:$16 sps:$4 sm:$0xff]  }
 0x36e   :  { %6750 = vmatprep.subr.bf16.mxu1 %v11499_v7  ;;  %v11565_v7 = vld [vmem:[%s15673_s2 + $0x16e8] ss:$16 sps:$4 sm:$0xff]  }
 0x370   :  { %6579 = vmatpush1.bf16.msra.mxu0 %v11494_v51  ;;  %v11570_v51 = vld [vmem:[%s15673_s2 + $0x1704] ss:$16 sps:$4 sm:$0xff]  }
 0x371   :  { %6751 = vmatpush1.bf16.msra.mxu1 %v11497_v27  ;;  %6580 = vmatprep.subr.bf16.mxu0 %v11502_v9  ;;  %v11573_v27 = vld [vmem:[%s15673_s2 + $0x170c] ss:$16 sps:$4 sm:$0xff]   ;;  %v11568_v9 = vld [vmem:[%s15673_s2 + $0x1700] ss:$16 sps:$4 sm:$0xff]  }
 0x372   :  { %6752 = vmatprep.subr.bf16.mxu1 %v11505_v18  ;;  %v11571_v18 = vld [vmem:[%s15673_s2 + $0x1708] ss:$16 sps:$4 sm:$0xff]  }
 0x374   :  { %6581 = vmatpush1.bf16.msra.mxu0 %v11500_v26  ;;  %v11576_v26 = vld [vmem:[%s15673_s2 + $0x1724] ss:$16 sps:$4 sm:$0xff]  }
 0x375   :  { %6753 = vmatpush1.bf16.msra.mxu1 %v11503_v31  ;;  %6582 = vmatprep.subr.bf16.mxu0 %v11508_v20  ;;  %v11579_v31 = vld [vmem:[%s15673_s2 + $0x172c] ss:$16 sps:$4 sm:$0xff]   ;;  %v11574_v20 = vld [vmem:[%s15673_s2 + $0x1720] ss:$16 sps:$4 sm:$0xff]  }
 0x376   :  { %6754 = vmatprep.subr.bf16.mxu1 %v11511_v39  ;;  %v11577_v39 = vld [vmem:[%s15673_s2 + $0x1728] ss:$16 sps:$4 sm:$0xff]  }
 0x378   :  { %6583 = vmatpush1.bf16.msra.mxu0 %v11506_v42  ;;  %v11582_v42 = vld [vmem:[%s15673_s2 + $0x1744] ss:$16 sps:$4 sm:$0xff]  }
 0x379   :  { %6755 = vmatpush1.bf16.msra.mxu1 %v11509_v17  ;;  %6584 = vmatprep.subr.bf16.mxu0 %v11514_v45  ;;  %v11585_v17 = vld [vmem:[%s15673_s2 + $0x174c] ss:$16 sps:$4 sm:$0xff]   ;;  %v11580_v45 = vld [vmem:[%s15673_s2 + $0x1740] ss:$16 sps:$4 sm:$0xff]  }
 0x37a   :  { %6756 = vmatprep.subr.bf16.mxu1 %v11517_v60  ;;  %v11583_v60 = vld [vmem:[%s15673_s2 + $0x1748] ss:$16 sps:$4 sm:$0xff]  }
 0x37c   :  { %6585 = vmatpush1.bf16.msra.mxu0 %v11512_v34  ;;  %v11586_v34 = vld [vmem:[%s15673_s2 + $0x1760] ss:$16 sps:$4 sm:$0xff]  }
 0x37d   :  { %6757 = vmatpush1.bf16.msra.mxu1 %v11515_v59  ;;  %6597 = vmatprep.subr.bf16.mxu0 %v11521_v61  ;;  %v11597_v59 = vld [vmem:[%s15673_s2 + $0x178c] ss:$16 sps:$4 sm:$0xff]   ;;  %v11592_v61 = vld [vmem:[%s15673_s2 + $0x1780] ss:$16 sps:$4 sm:$0xff]  }
 0x37e   :  { %6769 = vmatprep.subr.bf16.mxu1 %v11524_v8  ;;  %v11603_v8 = vld [vmem:[%s15673_s2 + $0x17ac] ss:$16 sps:$4 sm:$0xff]  }
 0x37f   :  { %6587 = vmatmul.mubr.bf16.vlgmr.msra.gmra.mrb[16].mxu0 %v5170_v4 }
 0x380   :  { %6759 = vmatmul.mubr.bf16.vlgmr.msra.gmra.mrb[16].mxu1 %v5170_v4  ;;  %6598 = vmatpush1.bf16.msra.mxu0 %v11519_v52  ;;  %v11598_v52 = vld [vmem:[%s15673_s2 + $0x17a0] ss:$16 sps:$4 sm:$0xff]  }
 0x381   :  { %6629 = vmatprep.mubr.bf16.mxu0 %v5179_v54  ;;  %6770 = vmatpush1.bf16.msra.mxu1 %v11522_v15  ;;  %v11609_v15 = vld [vmem:[%s15673_s2 + $0x17cc] ss:$16 sps:$4 sm:$0xff]   ;;  %v11604_v4 = vld [vmem:[%s15673_s2 + $0x17c0] ss:$16 sps:$4 sm:$0xff]  }
 0x382   :  { %6801 = vmatprep.mubr.bf16.mxu1 %v5179_v54  ;;  %6599 = vmatprep.subr.bf16.mxu0 %v11528_v44  ;;  %v11607_v44 = vld [vmem:[%s15673_s2 + $0x17c8] ss:$16 sps:$4 sm:$0xff]   ;;  %v11615_v54 = vld [vmem:[%s15673_s2 + $0x17ec] ss:$16 sps:$4 sm:$0xff]  }
 0x383   :  { %6771 = vmatprep.subr.bf16.mxu1 %v11531_v6  ;;  %v11612_v6 = vld [vmem:[%s15673_s2 + $0x17e4] ss:$16 sps:$4 sm:$0xff]  }
 0x384   :  { %6600 = vmatpush1.bf16.msra.mxu0 %v11526_v58  ;;  %v9675_v58 = vcombine.low %v14730_v21, %v14732_v13 }
 0x385   :  { %6772 = vmatpush1.bf16.msra.mxu1 %v11529_v29  ;;  %6601 = vmatprep.subr.bf16.mxu0 %v11534_v32  ;;  %v9683_v29 = vcombine.low %v14740_v50, %v14740_v50  ;;  %v11610_v32 = vld [vmem:[%s15673_s2 + $0x17e0] ss:$16 sps:$4 sm:$0xff]   ;;  %v11622_v50 = vld [vmem:[%s15674_s3 + $0x304] ss:$8 sps:$4 sm:$0xff]  }
 0x386   :  { %6773 = vmatprep.subr.bf16.mxu1 %v11537_v35  ;;  %v11613_v35 = vld [vmem:[%s15673_s2 + $0x17e8] ss:$16 sps:$4 sm:$0xff]   ;;  %v5174_v21 = vrot.slane %v9675_v58, 1  ;;  %v11697_v58 = vld [vmem:[%s15674_s3 + $0x2d4] ss:$8 sps:$4 sm:$0xff]  }
 0x387   :  { %v5175_v13 = vrot.slane %v9683_v29, 1  ;;  %v11700_v29 = vld [vmem:[%s15674_s3 + $0x3d4] ss:$8 sps:$4 sm:$0xff]  }
 0x388   :  { %6602 = vmatpush1.bf16.msra.mxu0 %v11532_v36  ;;  %v11619_v36 = vld [vmem:[%s15674_s3 + $0x204] ss:$8 sps:$4 sm:$0xff]  }
 0x389   :  { %6774 = vmatpush1.bf16.msra.mxu1 %v11535_v37  ;;  %6603 = vmatprep.subr.bf16.mxu0 %v11540_v40  ;;  %v11617_v37 = vld [vmem:[%s15674_s3 + $0x200] ss:$8 sps:$4 sm:$0xff]  }
 0x38a   :  { %6775 = vmatprep.subr.bf16.mxu1 %v11543_v16  ;;  %v11620_v40 = vld [vmem:[%s15674_s3 + $0x300] ss:$8 sps:$4 sm:$0xff]   ;;  %v11625_v16 = vld [vmem:[%s15674_s3 + $0x214] ss:$8 sps:$4 sm:$0xff]  }
 0x38c   :  { %6604 = vmatpush1.bf16.msra.mxu0 %v11538_v25  ;;  %v5176_v25 = vsel %vm5155_vm5, %v5174_v21, %v5175_v13  ;;  %v11706_v21 = vld [vmem:[%s15674_s3 + $0x3e4] ss:$8 sps:$4 sm:$0xff]   ;;  %v11701_v13 = vld [vmem:[%s15674_s3 + $0x2e0] ss:$8 sps:$4 sm:$0xff]  }
 0x38d   :  { %6776 = vmatpush1.bf16.msra.mxu1 %v11541_v30  ;;  %6605 = vmatprep.subr.bf16.mxu0 %v11546_v43  ;;  %v11628_v30 = vld [vmem:[%s15674_s3 + $0x314] ss:$8 sps:$4 sm:$0xff]   ;;  %v11623_v43 = vld [vmem:[%s15674_s3 + $0x210] ss:$8 sps:$4 sm:$0xff]  }
 0x38e   :  { %6777 = vmatprep.subr.bf16.mxu1 %v11549_v46  ;;  %v11626_v46 = vld [vmem:[%s15674_s3 + $0x310] ss:$8 sps:$4 sm:$0xff]  }
 0x390   :  { %6606 = vmatpush1.bf16.msra.mxu0 %v11544_v53  ;;  %v11631_v53 = vld [vmem:[%s15674_s3 + $0x224] ss:$8 sps:$4 sm:$0xff]  }
 0x391   :  { %6778 = vmatpush1.bf16.msra.mxu1 %v11547_v48  ;;  %6607 = vmatprep.subr.bf16.mxu0 %v11552_v56  ;;  %v11634_v48 = vld [vmem:[%s15674_s3 + $0x324] ss:$8 sps:$4 sm:$0xff]   ;;  %v11629_v56 = vld [vmem:[%s15674_s3 + $0x220] ss:$8 sps:$4 sm:$0xff]  }
 0x392   :  { %6779 = vmatprep.subr.bf16.mxu1 %v11555_v0  ;;  %v11632_v0 = vld [vmem:[%s15674_s3 + $0x320] ss:$8 sps:$4 sm:$0xff]  }
 0x394   :  { %6608 = vmatpush1.bf16.msra.mxu0 %v11550_v57  ;;  %v11637_v57 = vld [vmem:[%s15674_s3 + $0x234] ss:$8 sps:$4 sm:$0xff]  }
 0x395   :  { %6780 = vmatpush1.bf16.msra.mxu1 %v11553_v62  ;;  %6609 = vmatprep.subr.bf16.mxu0 %v11558_v5  ;;  %v11640_v62 = vld [vmem:[%s15674_s3 + $0x334] ss:$8 sps:$4 sm:$0xff]   ;;  %v11635_v5 = vld [vmem:[%s15674_s3 + $0x230] ss:$8 sps:$4 sm:$0xff]  }
 0x396   :  { %6781 = vmatprep.subr.bf16.mxu1 %v11561_v63  ;;  %v11638_v63 = vld [vmem:[%s15674_s3 + $0x330] ss:$8 sps:$4 sm:$0xff]  }
 0x398   :  { %6610 = vmatpush1.bf16.msra.mxu0 %v11556_v22  ;;  %v11643_v22 = vld [vmem:[%s15674_s3 + $0x244] ss:$8 sps:$4 sm:$0xff]  }
 0x399   :  { %6782 = vmatpush1.bf16.msra.mxu1 %v11559_v14  ;;  %6611 = vmatprep.subr.bf16.mxu0 %v11564_v23  ;;  %v11646_v14 = vld [vmem:[%s15674_s3 + $0x344] ss:$8 sps:$4 sm:$0xff]   ;;  %v11641_v23 = vld [vmem:[%s15674_s3 + $0x240] ss:$8 sps:$4 sm:$0xff]  }
 0x39a   :  { %6783 = vmatprep.subr.bf16.mxu1 %v11567_v2  ;;  %v11644_v2 = vld [vmem:[%s15674_s3 + $0x340] ss:$8 sps:$4 sm:$0xff]  }
 0x39c   :  { %6612 = vmatpush1.bf16.msra.mxu0 %v11562_v1  ;;  %v11649_v1 = vld [vmem:[%s15674_s3 + $0x254] ss:$8 sps:$4 sm:$0xff]  }
 0x39d   :  { %6784 = vmatpush1.bf16.msra.mxu1 %v11565_v7  ;;  %6613 = vmatprep.subr.bf16.mxu0 %v11570_v51  ;;  %v11652_v7 = vld [vmem:[%s15674_s3 + $0x354] ss:$8 sps:$4 sm:$0xff]   ;;  %v11647_v51 = vld [vmem:[%s15674_s3 + $0x250] ss:$8 sps:$4 sm:$0xff]  }
 0x39e   :  { %6785 = vmatprep.subr.bf16.mxu1 %v11573_v27  ;;  %v11650_v27 = vld [vmem:[%s15674_s3 + $0x350] ss:$8 sps:$4 sm:$0xff]  }
 0x3a0   :  { %6614 = vmatpush1.bf16.msra.mxu0 %v11568_v9  ;;  %v11655_v9 = vld [vmem:[%s15674_s3 + $0x264] ss:$8 sps:$4 sm:$0xff]  }
 0x3a1   :  { %6786 = vmatpush1.bf16.msra.mxu1 %v11571_v18  ;;  %6615 = vmatprep.subr.bf16.mxu0 %v11576_v26  ;;  %v11658_v18 = vld [vmem:[%s15674_s3 + $0x364] ss:$8 sps:$4 sm:$0xff]   ;;  %v11653_v26 = vld [vmem:[%s15674_s3 + $0x260] ss:$8 sps:$4 sm:$0xff]  }
 0x3a2   :  { %6787 = vmatprep.subr.bf16.mxu1 %v11579_v31  ;;  %v11656_v31 = vld [vmem:[%s15674_s3 + $0x360] ss:$8 sps:$4 sm:$0xff]  }
 0x3a4   :  { %6616 = vmatpush1.bf16.msra.mxu0 %v11574_v20  ;;  %v11661_v20 = vld [vmem:[%s15674_s3 + $0x274] ss:$8 sps:$4 sm:$0xff]  }
 0x3a5   :  { %6788 = vmatpush1.bf16.msra.mxu1 %v11577_v39  ;;  %6617 = vmatprep.subr.bf16.mxu0 %v11582_v42  ;;  %v11664_v39 = vld [vmem:[%s15674_s3 + $0x374] ss:$8 sps:$4 sm:$0xff]   ;;  %v11659_v42 = vld [vmem:[%s15674_s3 + $0x270] ss:$8 sps:$4 sm:$0xff]  }
 0x3a6   :  { %6789 = vmatprep.subr.bf16.mxu1 %v11585_v17  ;;  %v11662_v17 = vld [vmem:[%s15674_s3 + $0x370] ss:$8 sps:$4 sm:$0xff]  }
 0x3a8   :  { %6618 = vmatpush1.bf16.msra.mxu0 %v11580_v45  ;;  %v11667_v45 = vld [vmem:[%s15674_s3 + $0x284] ss:$8 sps:$4 sm:$0xff]  }
 0x3a9   :  { %6790 = vmatpush1.bf16.msra.mxu1 %v11583_v60  ;;  %6619 = vmatprep.subr.bf16.mxu0 %v11588_v33  ;;  %v11670_v60 = vld [vmem:[%s15674_s3 + $0x384] ss:$8 sps:$4 sm:$0xff]   ;;  %v11665_v33 = vld [vmem:[%s15674_s3 + $0x280] ss:$8 sps:$4 sm:$0xff]  }
 0x3aa   :  { %6791 = vmatprep.subr.bf16.mxu1 %v11591_v38  ;;  %v11668_v38 = vld [vmem:[%s15674_s3 + $0x380] ss:$8 sps:$4 sm:$0xff]  }
 0x3ac   :  { %6620 = vmatpush1.bf16.msra.mxu0 %v11586_v34  ;;  %v11673_v34 = vld [vmem:[%s15674_s3 + $0x294] ss:$8 sps:$4 sm:$0xff]  }
 0x3ad   :  { %6792 = vmatpush1.bf16.msra.mxu1 %v11589_v41  ;;  %6621 = vmatprep.subr.bf16.mxu0 %v11594_v47  ;;  %v11676_v41 = vld [vmem:[%s15674_s3 + $0x394] ss:$8 sps:$4 sm:$0xff]   ;;  %v11671_v47 = vld [vmem:[%s15674_s3 + $0x290] ss:$8 sps:$4 sm:$0xff]  }
 0x3ae   :  { %6793 = vmatprep.subr.bf16.mxu1 %v11597_v59  ;;  %v11674_v59 = vld [vmem:[%s15674_s3 + $0x390] ss:$8 sps:$4 sm:$0xff]  }
 0x3b0   :  { %6622 = vmatpush1.bf16.msra.mxu0 %v11592_v61  ;;  %v11679_v61 = vld [vmem:[%s15674_s3 + $0x2a4] ss:$8 sps:$4 sm:$0xff]  }
 0x3b1   :  { %6794 = vmatpush1.bf16.msra.mxu1 %v11595_v11  ;;  %6623 = vmatprep.subr.bf16.mxu0 %v11600_v49  ;;  %v11682_v11 = vld [vmem:[%s15674_s3 + $0x3a4] ss:$8 sps:$4 sm:$0xff]   ;;  %v11677_v49 = vld [vmem:[%s15674_s3 + $0x2a0] ss:$8 sps:$4 sm:$0xff]  }
 0x3b2   :  { %6795 = vmatprep.subr.bf16.mxu1 %v11603_v8  ;;  %v11680_v8 = vld [vmem:[%s15674_s3 + $0x3a0] ss:$8 sps:$4 sm:$0xff]  }
 0x3b4   :  { %6624 = vmatpush1.bf16.msra.mxu0 %v11598_v52  ;;  %v11685_v52 = vld [vmem:[%s15674_s3 + $0x2b4] ss:$8 sps:$4 sm:$0xff]  }
 0x3b5   :  { %6796 = vmatpush1.bf16.msra.mxu1 %v11601_v55  ;;  %6625 = vmatprep.subr.bf16.mxu0 %v11606_v3  ;;  %v11688_v55 = vld [vmem:[%s15674_s3 + $0x3b4] ss:$8 sps:$4 sm:$0xff]   ;;  %v11683_v3 = vld [vmem:[%s15674_s3 + $0x2b0] ss:$8 sps:$4 sm:$0xff]  }
 0x3b6   :  { %6797 = vmatprep.subr.bf16.mxu1 %v11609_v15  ;;  %v11686_v15 = vld [vmem:[%s15674_s3 + $0x3b0] ss:$8 sps:$4 sm:$0xff]  }
 0x3b8   :  { %6626 = vmatpush1.bf16.msra.mxu0 %v11604_v4  ;;  %v11691_v4 = vld [vmem:[%s15674_s3 + $0x2c4] ss:$8 sps:$4 sm:$0xff]  }
 0x3b9   :  { %6798 = vmatpush1.bf16.msra.mxu1 %v11607_v44  ;;  %6627 = vmatprep.subr.bf16.mxu0 %v11612_v6  ;;  %v11694_v44 = vld [vmem:[%s15674_s3 + $0x3c4] ss:$8 sps:$4 sm:$0xff]   ;;  %v11689_v6 = vld [vmem:[%s15674_s3 + $0x2c0] ss:$8 sps:$4 sm:$0xff]  }
 0x3ba   :  { %6799 = vmatprep.subr.bf16.mxu1 %v11615_v54  ;;  %v11692_v54 = vld [vmem:[%s15674_s3 + $0x3c0] ss:$8 sps:$4 sm:$0xff]  }
 0x3bc   :  { %6628 = vmatpush1.bf16.msra.mxu0 %v11610_v32  ;;  %v11695_v32 = vld [vmem:[%s15674_s3 + $0x2d0] ss:$8 sps:$4 sm:$0xff]  }
 0x3bd   :  { %6800 = vmatpush1.bf16.msra.mxu1 %v11613_v35  ;;  %7382 = vmatprep.subr.bf16.mxu0 %v11619_v36  ;;  %v11698_v35 = vld [vmem:[%s15674_s3 + $0x3d0] ss:$8 sps:$4 sm:$0xff]   ;;  %v11703_v36 = vld [vmem:[%s15674_s3 + $0x2e4] ss:$8 sps:$4 sm:$0xff]  }
 0x3be   :  { %7423 = vmatprep.subr.bf16.mxu1 %v11622_v50  ;;  %v11704_v50 = vld [vmem:[%s15674_s3 + $0x3e0] ss:$8 sps:$4 sm:$0xff]  }
 0x3bf   :  { %6630 = vmatmul.mubr.bf16.vlgmr.msra.gmra.mrb[16].mxu0 %v5176_v25 }
 0x3c0   :  { %6802 = vmatmul.mubr.bf16.vlgmr.msra.gmra.mrb[16].mxu1 %v5176_v25  ;;  %7383 = vmatpush1.bf16.msra.mxu0 %v11617_v37  ;;  %v11709_v37 = vld [vmem:[%s15674_s3 + $0x2f4] ss:$8 sps:$4 sm:$0xff]   ;;  %v11710_v25 = vld [vmem:[%s15674_s3 + $0x3f0] ss:$8 sps:$4 sm:$0xff]  }
 0x3c1   :  { %7424 = vmatpush1.bf16.msra.mxu1 %v11620_v40  ;;  %7384 = vmatprep.subr.bf16.mxu0 %v11625_v16  ;;  %v11712_v40 = vld [vmem:[%s15674_s3 + $0x3f4] ss:$8 sps:$4 sm:$0xff]   ;;  %v11707_v16 = vld [vmem:[%s15674_s3 + $0x2f0] ss:$8 sps:$4 sm:$0xff]  }
 0x3c2   :  { %7425 = vmatprep.subr.bf16.mxu1 %v11628_v30  ;;  %v11719_v30 = vld [vmem:[%s15674_s3 + $0x4] ss:$8 sps:$4 sm:$0xff]  }
 0x3c4   :  { %7385 = vmatpush1.bf16.msra.mxu0 %v11623_v43  ;;  %v11722_v43 = vld [vmem:[%s15674_s3 + $0x104] ss:$8 sps:$4 sm:$0xff]  }
 0x3c5   :  { %7426 = vmatpush1.bf16.msra.mxu1 %v11626_v46  ;;  %7386 = vmatprep.subr.bf16.mxu0 %v11631_v53  ;;  %v6820_v46 = vld [vmem:[%s15676_s5] sm:$0xf] }
 0x3c6   :  { %7427 = vmatprep.subr.bf16.mxu1 %v11634_v48  ;;  %v6825_v53 = vrot.slane %v6820_v46, %v12644_v12  ;;  %v6833_v48 = vrot.slane %v6820_v46, %v110_v24 }
 0x3c8   :  { %7387 = vmatpush1.bf16.msra.mxu0 %v11629_v56  ;;  %v6829_v56 = vrot.slane %v6820_v46, %v12652_v19 }
 0x3c9   :  { %7428 = vmatpush1.bf16.msra.mxu1 %v11632_v0  ;;  %7388 = vmatprep.subr.bf16.mxu0 %v11637_v57  ;;  %v6837_v0 = vrot.slane %v6820_v46, %v114_v28  ;;  %v11736_v46 = vld [vmem:[%s15674_s3 + $0x120] ss:$8 sps:$4 sm:$0xff]  }
 0x3ca   :  { %7429 = vmatprep.subr.bf16.mxu1 %v11640_v62 }
 0x3cc   :  { %7389 = vmatpush1.bf16.msra.mxu0 %v11635_v5 }
 0x3cd   :  { %7430 = vmatpush1.bf16.msra.mxu1 %v11638_v63  ;;  %7390 = vmatprep.subr.bf16.mxu0 %v11643_v22 }
 0x3ce   :  { %7431 = vmatprep.subr.bf16.mxu1 %v11646_v14 }
 0x3d0   :  { %7391 = vmatpush1.bf16.msra.mxu0 %v11641_v23 }
 0x3d1   :  { %7432 = vmatpush1.bf16.msra.mxu1 %v11644_v2  ;;  %7392 = vmatprep.subr.bf16.mxu0 %v11649_v1 }
 0x3d2   :  { %7433 = vmatprep.subr.bf16.mxu1 %v11652_v7 }
 0x3d4   :  { %7393 = vmatpush1.bf16.msra.mxu0 %v11647_v51 }
 0x3d5   :  { %7434 = vmatpush1.bf16.msra.mxu1 %v11650_v27  ;;  %7394 = vmatprep.subr.bf16.mxu0 %v11655_v9 }
 0x3d6   :  { %7435 = vmatprep.subr.bf16.mxu1 %v11658_v18 }
 0x3d8   :  { %7395 = vmatpush1.bf16.msra.mxu0 %v11653_v26 }
 0x3d9   :  { %7436 = vmatpush1.bf16.msra.mxu1 %v11656_v31  ;;  %7396 = vmatprep.subr.bf16.mxu0 %v11661_v20 }
 0x3da   :  { %7437 = vmatprep.subr.bf16.mxu1 %v11664_v39 }
 0x3dc   :  { %7397 = vmatpush1.bf16.msra.mxu0 %v11659_v42 }
 0x3dd   :  { %7438 = vmatpush1.bf16.msra.mxu1 %v11662_v17  ;;  %7398 = vmatprep.subr.bf16.mxu0 %v11667_v45 }
 0x3de   :  { %7439 = vmatprep.subr.bf16.mxu1 %v11670_v60 }
 0x3e0   :  { %7399 = vmatpush1.bf16.msra.mxu0 %v11665_v33 }
 0x3e1   :  { %7440 = vmatpush1.bf16.msra.mxu1 %v11668_v38  ;;  %7400 = vmatprep.subr.bf16.mxu0 %v11673_v34 }
 0x3e2   :  { %7441 = vmatprep.subr.bf16.mxu1 %v11676_v41 }
 0x3e4   :  { %7401 = vmatpush1.bf16.msra.mxu0 %v11671_v47 }
 0x3e5   :  { %7442 = vmatpush1.bf16.msra.mxu1 %v11674_v59  ;;  %7402 = vmatprep.subr.bf16.mxu0 %v11679_v61 }
 0x3e6   :  { %7443 = vmatprep.subr.bf16.mxu1 %v11682_v11 }
 0x3e8   :  { %7403 = vmatpush1.bf16.msra.mxu0 %v11677_v49 }
 0x3e9   :  { %7444 = vmatpush1.bf16.msra.mxu1 %v11680_v8  ;;  %7404 = vmatprep.subr.bf16.mxu0 %v11685_v52 }
 0x3ea   :  { %7445 = vmatprep.subr.bf16.mxu1 %v11688_v55 }
 0x3ec   :  { %7405 = vmatpush1.bf16.msra.mxu0 %v11683_v3 }
 0x3ed   :  { %7446 = vmatpush1.bf16.msra.mxu1 %v11686_v15  ;;  %7406 = vmatprep.subr.bf16.mxu0 %v11691_v4  ;;  %v11717_v4 = vld [vmem:[%s15674_s3] ss:$8 sps:$4 sm:$0xff]  }
 0x3ee   :  { %7447 = vmatprep.subr.bf16.mxu1 %v11694_v44 }
 0x3f0   :  { %7407 = vmatpush1.bf16.msra.mxu0 %v11689_v6 }
 0x3f1   :  { %7448 = vmatpush1.bf16.msra.mxu1 %v11692_v54  ;;  %7408 = vmatprep.subr.bf16.mxu0 %v11697_v58 }
 0x3f2   :  { %7449 = vmatprep.subr.bf16.mxu1 %v11700_v29 }
 0x3f4   :  { %7409 = vmatpush1.bf16.msra.mxu0 %v11695_v32 }
 0x3f5   :  { %7450 = vmatpush1.bf16.msra.mxu1 %v11698_v35  ;;  %7410 = vmatprep.subr.bf16.mxu0 %v11703_v36  ;;  %v11720_v35 = vld [vmem:[%s15674_s3 + $0x100] ss:$8 sps:$4 sm:$0xff]  }
 0x3f6   :  { %7451 = vmatprep.subr.bf16.mxu1 %v11706_v21  ;;  %v11729_v21 = vld [vmem:[%s15674_s3 + $0x14] ss:$8 sps:$4 sm:$0xff]  }
 0x3f8   :  { %7411 = vmatpush1.bf16.msra.mxu0 %v11701_v13 }
 0x3f9   :  { %7452 = vmatpush1.bf16.msra.mxu1 %v11704_v50  ;;  %7412 = vmatprep.subr.bf16.mxu0 %v11709_v37  ;;  %v11732_v50 = vld [vmem:[%s15674_s3 + $0x114] ss:$8 sps:$4 sm:$0xff]  }
 0x3fa   :  { %7453 = vmatprep.subr.bf16.mxu1 %v11712_v40  ;;  %v11727_v40 = vld [vmem:[%s15674_s3 + $0x10] ss:$8 sps:$4 sm:$0xff]  }
 0x3fc   :  { %7413 = vmatpush1.bf16.msra.mxu0 %v11707_v16  ;;  %v11730_v16 = vld [vmem:[%s15674_s3 + $0x110] ss:$8 sps:$4 sm:$0xff]  }
 0x3fd   :  { %7454 = vmatpush1.bf16.msra.mxu1 %v11710_v25  ;;  %7798 = vmatprep.subr.bf16.mxu0 %v11719_v30  ;;  %v11735_v25 = vld [vmem:[%s15674_s3 + $0x24] ss:$8 sps:$4 sm:$0xff]  }
 0x3fe   :  { %7839 = vmatprep.subr.bf16.mxu1 %v11722_v43  ;;  %v11738_v30 = vld [vmem:[%s15674_s3 + $0x124] ss:$8 sps:$4 sm:$0xff]   ;;  %v11733_v43 = vld [vmem:[%s15674_s3 + $0x20] ss:$8 sps:$4 sm:$0xff]  }
 0x492   :  { %v6631_v57 = vpop.f32.mrb[16].mxu0 }
 0x493   :  { %v6842_v62 = vadd.f32 %v6825_v53, %v6631_v57  ;;  %v6803_v5 = vpop.f32.mrb[16].mxu1  ;;  %v6633_v63 = vpop.f32.mrb[17].mxu0  ;;  %v11747_v57 = vld [vmem:[%s15674_s3 + $0x44] ss:$8 sps:$4 sm:$0xff]  }
 0x494   :  { %v6844_v22 = vadd.f32 %v6833_v48, %v6803_v5  ;;  %v6843_v14 = vadd.f32 %v6829_v56, %v6633_v63  ;;  %v6805_v23 = vpop.f32.mrb[17].mxu1  ;;  %v6635_v2 = vpop.f32.mrb[18].mxu0  ;;  %v11745_v5 = vld [vmem:[%s15674_s3 + $0x40] ss:$8 sps:$4 sm:$0xff]  }
 0x495   :  { %v6850_v1 = vmax.f32 %v6842_v62, 0.0  ;;  %v6845_v7 = vadd.f32 %v6837_v0, %v6805_v23  ;;  %v6846_v51 = vadd.f32 %v6825_v53, %v6635_v2  ;;  %v6807_v27 = vpop.f32.mrb[18].mxu1  ;;  %v6637_v9 = vpop.f32.mrb[19].mxu0  ;;  %v11741_v53 = vld [vmem:[%s15674_s3 + $0x34] ss:$8 sps:$4 sm:$0xff]  }
 0x496   :  { %v6852_v18 = vmax.f32 %v6844_v22, 0.0  ;;  %v6851_v24 = vmax.f32 %v6843_v14, 0.0  ;;  %v6848_v26 = vadd.f32 %v6833_v48, %v6807_v27  ;;  %v6847_v31 = vadd.f32 %v6829_v56, %v6637_v9  ;;  %v6809_v20 = vpop.f32.mrb[19].mxu1  ;;  %v11744_v48 = vld [vmem:[%s15674_s3 + $0x134] ss:$8 sps:$4 sm:$0xff]  }
 0x497   :  { %v6853_v10 = vmax.f32 %v6845_v7, 0.0  ;;  %v6854_v28 = vmax.f32 %v6846_v51, 0.0  ;;  %v6849_v39 = vadd.f32 %v6837_v0, %v6809_v20  ;;  %v11739_v56 = vld [vmem:[%s15674_s3 + $0x30] ss:$8 sps:$4 sm:$0xff]   ;;  %v11750_v62 = vld [vmem:[%s15674_s3 + $0x144] ss:$8 sps:$4 sm:$0xff]  }
 0x498   :  { %v10294_v42 = vpack.c.bf16 %v6851_v24, %v6850_v1  ;;  %v6856_v17 = vmax.f32 %v6848_v26, 0.0  ;;  %v6855_v45 = vmax.f32 %v6847_v31, 0.0  ;;  %v11742_v0 = vld [vmem:[%s15674_s3 + $0x130] ss:$8 sps:$4 sm:$0xff]   ;;  %v11748_v63 = vld [vmem:[%s15674_s3 + $0x140] ss:$8 sps:$4 sm:$0xff]  }
 0x499   :  { %v10295_v60 = vpack.c.bf16 %v6853_v10, %v6852_v18  ;;  %v6857_v33 = vmax.f32 %v6849_v39, 0.0  ;;  %v11753_v22 = vld [vmem:[%s15674_s3 + $0x54] ss:$8 sps:$4 sm:$0xff]   ;;  %v11751_v23 = vld [vmem:[%s15674_s3 + $0x50] ss:$8 sps:$4 sm:$0xff]  }
 0x49a   :  { %6875 = vst [vmem:[#allocation3 + $0x20] sm:$0x11] %v10294_v42  ;;  %6877 = vst [vmem:[#allocation3] sm:$0x22] %v10294_v42  ;;  %v6879_v38 = vrot.slane %v10294_v42, 5  ;;  %v10296_v34 = vpack.c.bf16 %v6855_v45, %v6854_v28 }
 0x49b   :  { %6876 = vst [vmem:[#allocation3 + $0x28] sm:$0x11] %v10295_v60  ;;  %6878 = vst [vmem:[#allocation3 + $0x8] sm:$0x22] %v10295_v60  ;;  %v6881_v41 = vrot.slane %v10295_v60, 5  ;;  %v10297_v47 = vpack.c.bf16 %v6857_v33, %v6856_v17 }
 0x49c   :  { %v6880_v59 = vrot.slane %v6879_v38, 4  ;;  %v6895_v61 = vrot.slane %v10296_v34, 6  ;;  %v6903_v11 = vrot.slane %v10296_v34, 7  ;;  %v11756_v14 = vld [vmem:[%s15674_s3 + $0x154] ss:$8 sps:$4 sm:$0xff]  }
 0x49d   :  { %v6882_v49 = vrot.slane %v6881_v41, 4  ;;  %v6896_v8 = vrot.slane %v10297_v47, 6  ;;  %v6904_v52 = vrot.slane %v10297_v47, 7  ;;  %v11754_v2 = vld [vmem:[%s15674_s3 + $0x150] ss:$8 sps:$4 sm:$0xff]  }
 0x49e   :  { %6885 = vst [vmem:[#allocation3 + $0x20] sm:$0x22] %v6880_v59  ;;  %6887 = vst [vmem:[#allocation3] sm:$0x44] %v6880_v59  ;;  %v6909_v55 = vrot.slane %v6903_v11, 4 }
 0x49f   :  { %6899 = vst [vmem:[#allocation3 + $0x20] sm:$0x44] %v6895_v61  ;;  %6901 = vst [vmem:[#allocation3] sm:$0x88] %v6895_v61  ;;  %v6910_v3 = vrot.slane %v6904_v52, 4 }
 0x4a0   :  { %6907 = vst [vmem:[#allocation3 + $0x20] sm:$0x88] %v6903_v11  ;;  %6886 = vst [vmem:[#allocation3 + $0x28] sm:$0x22] %v6882_v49  ;;  %v11759_v1 = vld [vmem:[%s15674_s3 + $0x64] ss:$8 sps:$4 sm:$0xff]  }
 0x4a1   :  { %6888 = vst [vmem:[#allocation3 + $0x8] sm:$0x44] %v6882_v49  ;;  %6900 = vst [vmem:[#allocation3 + $0x28] sm:$0x44] %v6896_v8  ;;  %v11762_v7 = vld [vmem:[%s15674_s3 + $0x164] ss:$8 sps:$4 sm:$0xff]  }
 0x4a2   :  { %6902 = vst [vmem:[#allocation3 + $0x8] sm:$0x88] %v6896_v8  ;;  %6908 = vst [vmem:[#allocation3 + $0x28] sm:$0x88] %v6904_v52  ;;  %v11757_v51 = vld [vmem:[%s15674_s3 + $0x60] ss:$8 sps:$4 sm:$0xff]  }
 0x4a3   :  { %6913 = vst [vmem:[#allocation3 + $0x10] sm:$0x11] %v6909_v55  ;;  %6914 = vst [vmem:[#allocation3 + $0x18] sm:$0x11] %v6910_v3  ;;  %v11760_v27 = vld [vmem:[%s15674_s3 + $0x160] ss:$8 sps:$4 sm:$0xff]  }
 0x4a4   :  { %v11765_v9 = vld [vmem:[%s15674_s3 + $0x74] ss:$8 sps:$4 sm:$0xff]   ;;  %v11763_v24 = vld [vmem:[%s15674_s3 + $0x70] ss:$8 sps:$4 sm:$0xff]   ;;  %v11771_v31 = vld [vmem:[%s15674_s3 + $0x84] ss:$8 sps:$4 sm:$0xff]  }
 0x4a5   :  { %v11768_v18 = vld [vmem:[%s15674_s3 + $0x174] ss:$8 sps:$4 sm:$0xff]   ;;  %v11766_v26 = vld [vmem:[%s15674_s3 + $0x170] ss:$8 sps:$4 sm:$0xff]   ;;  %v11774_v20 = vld [vmem:[%s15674_s3 + $0x184] ss:$8 sps:$4 sm:$0xff]  }
 0x4a6   :  { %v15168_v58 = vld [vmem:[#allocation3] sm:$0xff]  ;;  %v11769_v10 = vld [vmem:[%s15674_s3 + $0x80] ss:$8 sps:$4 sm:$0xff]   ;;  %v11783_v60 = vld [vmem:[%s15674_s3 + $0xa4] ss:$8 sps:$4 sm:$0xff]  }
 0x4a7   :  { %v6981_v15 = vld [vmem:[#allocation3 + $0x20] sm:$0xff]  ;;  %v10078_v13 = vcombine.high %v15168_v58, %v15168_v58  ;;  %v11772_v28 = vld [vmem:[%s15674_s3 + $0x180] ss:$8 sps:$4 sm:$0xff]   ;;  %v11786_v33 = vld [vmem:[%s15674_s3 + $0x1a4] ss:$8 sps:$4 sm:$0xff]  }
 0x4a8   :  { %v10009_v44 = vcombine.low %v6981_v15, %v6981_v15  ;;  %v10010_v6 = vcombine.high %v6981_v15, %v6981_v15  ;;  %v11777_v39 = vld [vmem:[%s15674_s3 + $0x94] ss:$8 sps:$4 sm:$0xff]   ;;  %v11775_v17 = vld [vmem:[%s15674_s3 + $0x90] ss:$8 sps:$4 sm:$0xff]   ;;  %v11781_v38 = vld [vmem:[%s15674_s3 + $0xa0] ss:$8 sps:$4 sm:$0xff]  }
 0x4a9   :  { %v6982_v54 = vld [vmem:[#allocation3 + $0x28] sm:$0xff]  ;;  %v11784_v34 = vld [vmem:[%s15674_s3 + $0x1a0] ss:$8 sps:$4 sm:$0xff]   ;;  %v11795_v11 = vld [vmem:[%s15674_s3 + $0xc4] ss:$8 sps:$4 sm:$0xff]  }
 0x4aa   :  { %v10011_v29 = vcombine.low %v6982_v54, %v6982_v54  ;;  %v10012_v32 = vcombine.high %v6982_v54, %v6982_v54  ;;  %v15173_v36 = vld [vmem:[#allocation3 + $0x8] sm:$0xff]  ;;  %7414 = vmatprep.mubr.bf16.mxu0 %v10010_v6  ;;  %v11798_v49 = vld [vmem:[%s15674_s3 + $0x1c4] ss:$8 sps:$4 sm:$0xff]   ;;  %v11793_v8 = vld [vmem:[%s15674_s3 + $0xc0] ss:$8 sps:$4 sm:$0xff]  }
 0x4ab   :  { %7415 = vmatmul.mubr.bf16.vlgmr.msra.gmra.mrb[20].mxu0 %v10009_v44  ;;  %v10080_v37 = vcombine.high %v15173_v36, %v15173_v36  ;;  %v11780_v42 = vld [vmem:[%s15674_s3 + $0x194] ss:$8 sps:$4 sm:$0xff]   ;;  %v11778_v45 = vld [vmem:[%s15674_s3 + $0x190] ss:$8 sps:$4 sm:$0xff]   ;;  %v11796_v52 = vld [vmem:[%s15674_s3 + $0x1c0] ss:$8 sps:$4 sm:$0xff]  }
 0x4ac   :  { %7455 = vmatprep.mubr.bf16.mxu1 %v10012_v32  ;;  %7799 = vmatpush1.bf16.msra.mxu0 %v11717_v4  ;;  %v11789_v41 = vld [vmem:[%s15674_s3 + $0xb4] ss:$8 sps:$4 sm:$0xff]   ;;  %v11787_v59 = vld [vmem:[%s15674_s3 + $0xb0] ss:$8 sps:$4 sm:$0xff]   ;;  %v11807_v44 = vld [vmem:[%s15674_s3 + $0xe4] ss:$8 sps:$4 sm:$0xff]  }
 0x4ad   :  { %7456 = vmatmul.mubr.bf16.vlgmr.msra.gmra.mrb[20].mxu1 %v10011_v29  ;;  %7830 = vmatprep.mubr.bf16.mxu0 %v10078_v13  ;;  %v11792_v47 = vld [vmem:[%s15674_s3 + $0x1b4] ss:$8 sps:$4 sm:$0xff]   ;;  %v11790_v61 = vld [vmem:[%s15674_s3 + $0x1b0] ss:$8 sps:$4 sm:$0xff]   ;;  %v11810_v6 = vld [vmem:[%s15674_s3 + $0x1e4] ss:$8 sps:$4 sm:$0xff]  }
 0x4ae   :  { %7840 = vmatpush1.bf16.msra.mxu1 %v11720_v35  ;;  %7871 = vmatprep.mubr.bf16.mxu1 %v10080_v37  ;;  %v11801_v55 = vld [vmem:[%s15674_s3 + $0xd4] ss:$8 sps:$4 sm:$0xff]   ;;  %v11799_v15 = vld [vmem:[%s15674_s3 + $0xd0] ss:$8 sps:$4 sm:$0xff]   ;;  %v11805_v54 = vld [vmem:[%s15674_s3 + $0xe0] ss:$8 sps:$4 sm:$0xff]  }
 0x4af   :  { %7800 = vmatprep.subr.bf16.mxu0 %v11729_v21  ;;  %7841 = vmatprep.subr.bf16.mxu1 %v11732_v50  ;;  %v11804_v3 = vld [vmem:[%s15674_s3 + $0x1d4] ss:$8 sps:$4 sm:$0xff]   ;;  %v11802_v4 = vld [vmem:[%s15674_s3 + $0x1d0] ss:$8 sps:$4 sm:$0xff]   ;;  %v11808_v29 = vld [vmem:[%s15674_s3 + $0x1e0] ss:$8 sps:$4 sm:$0xff]  }
 0x4b0   :  { %7801 = vmatpush1.bf16.msra.mxu0 %v11727_v40  ;;  %v11813_v32 = vld [vmem:[%s15674_s3 + $0xf4] ss:$8 sps:$4 sm:$0xff]   ;;  %v11811_v21 = vld [vmem:[%s15674_s3 + $0xf0] ss:$8 sps:$4 sm:$0xff]   ;;  %v11819_v50 = vld [vmem:[%s15674_s3 + $0x404] ss:$8 sps:$4 sm:$0xff]  }
 0x4b1   :  { %7802 = vmatprep.subr.bf16.mxu0 %v11735_v25  ;;  %v11816_v35 = vld [vmem:[%s15674_s3 + $0x1f4] ss:$8 sps:$4 sm:$0xff]   ;;  %v11814_v13 = vld [vmem:[%s15674_s3 + $0x1f0] ss:$8 sps:$4 sm:$0xff]   ;;  %v11822_v37 = vld [vmem:[%s15674_s3 + $0x504] ss:$8 sps:$4 sm:$0xff]  }
 0x4b2   :  { %7842 = vmatpush1.bf16.msra.mxu1 %v11730_v16  ;;  %v11825_v40 = vld [vmem:[#allocation3 + $0x4] ss:$16 sps:$4 sm:$0x1e]   ;;  %v11817_v16 = vld [vmem:[%s15674_s3 + $0x400] ss:$8 sps:$4 sm:$0xff]  }
 0x4b3   :  { %7843 = vmatprep.subr.bf16.mxu1 %v11738_v30  ;;  %v11828_v25 = vld [vmem:[#allocation3 + $0xc] ss:$16 sps:$4 sm:$0x1e]   ;;  %v10077_v30 = vcombine.low %v15168_v58, %v15168_v58 }
 0x4b4   :  { %7803 = vmatpush1.bf16.msra.mxu0 %v11733_v43  ;;  %v11820_v43 = vld [vmem:[%s15674_s3 + $0x500] ss:$8 sps:$4 sm:$0xff]   ;;  %v11834_v58 = vld [vmem:[%s15674_s3 + $0x514] ss:$8 sps:$4 sm:$0xff]  }
 0x4b5   :  { %7804 = vmatprep.subr.bf16.mxu0 %v11741_v53  ;;  %v11831_v53 = vld [vmem:[%s15674_s3 + $0x414] ss:$8 sps:$4 sm:$0xff]  }
 0x4b6   :  { %7844 = vmatpush1.bf16.msra.mxu1 %v11736_v46  ;;  %v10079_v46 = vcombine.low %v15173_v36, %v15173_v36  ;;  %v11832_v36 = vld [vmem:[%s15674_s3 + $0x510] ss:$8 sps:$4 sm:$0xff]  }
 0x4b7   :  { %7845 = vmatprep.subr.bf16.mxu1 %v11744_v48  ;;  %v7966_v48 = vrot.slane %v11825_v40, 1  ;;  %v11907_v40 = vld [vmem:[%s15674_s3 + $0x4e0] ss:$8 sps:$4 sm:$0xff]  }
 0x4b8   :  { %7805 = vmatpush1.bf16.msra.mxu0 %v11739_v56  ;;  %v7968_v56 = vrot.slane %v11828_v25, 1  ;;  %v11915_v25 = vld [vmem:[%s15674_s3 + $0x4f4] ss:$8 sps:$4 sm:$0xff]  }
 0x4b9   :  { %7806 = vmatprep.subr.bf16.mxu0 %v11747_v57  ;;  %v11837_v57 = vld [vmem:[%s15674_s3 + $0x424] ss:$8 sps:$4 sm:$0xff]  }
 0x4ba   :  { %7846 = vmatpush1.bf16.msra.mxu1 %v11742_v0  ;;  %v11829_v0 = vld [vmem:[%s15674_s3 + $0x410] ss:$8 sps:$4 sm:$0xff]  }
 0x4bb   :  { %7847 = vmatprep.subr.bf16.mxu1 %v11750_v62  ;;  %v11840_v62 = vld [vmem:[%s15674_s3 + $0x524] ss:$8 sps:$4 sm:$0xff]  }
 0x4bc   :  { %7807 = vmatpush1.bf16.msra.mxu0 %v11745_v5  ;;  %v11835_v5 = vld [vmem:[%s15674_s3 + $0x420] ss:$8 sps:$4 sm:$0xff]  }
 0x4bd   :  { %7808 = vmatprep.subr.bf16.mxu0 %v11753_v22  ;;  %v11843_v22 = vld [vmem:[%s15674_s3 + $0x434] ss:$8 sps:$4 sm:$0xff]  }
 0x4be   :  { %7848 = vmatpush1.bf16.msra.mxu1 %v11748_v63  ;;  %v11838_v63 = vld [vmem:[%s15674_s3 + $0x520] ss:$8 sps:$4 sm:$0xff]  }
 0x4bf   :  { %7849 = vmatprep.subr.bf16.mxu1 %v11756_v14  ;;  %v11846_v14 = vld [vmem:[%s15674_s3 + $0x534] ss:$8 sps:$4 sm:$0xff]  }
 0x4c0   :  { %7809 = vmatpush1.bf16.msra.mxu0 %v11751_v23  ;;  %v11841_v23 = vld [vmem:[%s15674_s3 + $0x430] ss:$8 sps:$4 sm:$0xff]  }
 0x4c1   :  { %7810 = vmatprep.subr.bf16.mxu0 %v11759_v1  ;;  %v11849_v1 = vld [vmem:[%s15674_s3 + $0x444] ss:$8 sps:$4 sm:$0xff]  }
 0x4c2   :  { %7850 = vmatpush1.bf16.msra.mxu1 %v11754_v2  ;;  %v11844_v2 = vld [vmem:[%s15674_s3 + $0x530] ss:$8 sps:$4 sm:$0xff]  }
 0x4c3   :  { %7851 = vmatprep.subr.bf16.mxu1 %v11762_v7  ;;  %v11852_v7 = vld [vmem:[%s15674_s3 + $0x544] ss:$8 sps:$4 sm:$0xff]  }
 0x4c4   :  { %7811 = vmatpush1.bf16.msra.mxu0 %v11757_v51  ;;  %v11847_v51 = vld [vmem:[%s15674_s3 + $0x440] ss:$8 sps:$4 sm:$0xff]  }
 0x4c5   :  { %7812 = vmatprep.subr.bf16.mxu0 %v11765_v9  ;;  %v11855_v9 = vld [vmem:[%s15674_s3 + $0x454] ss:$8 sps:$4 sm:$0xff]  }
 0x4c6   :  { %7852 = vmatpush1.bf16.msra.mxu1 %v11760_v27  ;;  %v11850_v27 = vld [vmem:[%s15674_s3 + $0x540] ss:$8 sps:$4 sm:$0xff]  }
 0x4c7   :  { %7853 = vmatprep.subr.bf16.mxu1 %v11768_v18  ;;  %v11858_v18 = vld [vmem:[%s15674_s3 + $0x554] ss:$8 sps:$4 sm:$0xff]  }
 0x4c8   :  { %7813 = vmatpush1.bf16.msra.mxu0 %v11763_v24  ;;  %v11853_v24 = vld [vmem:[%s15674_s3 + $0x450] ss:$8 sps:$4 sm:$0xff]  }
 0x4c9   :  { %7814 = vmatprep.subr.bf16.mxu0 %v11771_v31  ;;  %v11861_v31 = vld [vmem:[%s15674_s3 + $0x464] ss:$8 sps:$4 sm:$0xff]  }
 0x4ca   :  { %7854 = vmatpush1.bf16.msra.mxu1 %v11766_v26  ;;  %v11856_v26 = vld [vmem:[%s15674_s3 + $0x550] ss:$8 sps:$4 sm:$0xff]  }
 0x4cb   :  { %7855 = vmatprep.subr.bf16.mxu1 %v11774_v20  ;;  %v11864_v20 = vld [vmem:[%s15674_s3 + $0x564] ss:$8 sps:$4 sm:$0xff]  }
 0x4cc   :  { %7815 = vmatpush1.bf16.msra.mxu0 %v11769_v10  ;;  %v11859_v10 = vld [vmem:[%s15674_s3 + $0x460] ss:$8 sps:$4 sm:$0xff]  }
 0x4cd   :  { %7816 = vmatprep.subr.bf16.mxu0 %v11777_v39  ;;  %v11867_v39 = vld [vmem:[%s15674_s3 + $0x474] ss:$8 sps:$4 sm:$0xff]  }
 0x4ce   :  { %7856 = vmatpush1.bf16.msra.mxu1 %v11772_v28  ;;  %v11862_v28 = vld [vmem:[%s15674_s3 + $0x560] ss:$8 sps:$4 sm:$0xff]  }
 0x4cf   :  { %7857 = vmatprep.subr.bf16.mxu1 %v11780_v42  ;;  %v11870_v42 = vld [vmem:[%s15674_s3 + $0x574] ss:$8 sps:$4 sm:$0xff]  }
 0x4d0   :  { %7817 = vmatpush1.bf16.msra.mxu0 %v11775_v17  ;;  %v11865_v17 = vld [vmem:[%s15674_s3 + $0x470] ss:$8 sps:$4 sm:$0xff]  }
 0x4d1   :  { %7818 = vmatprep.subr.bf16.mxu0 %v11783_v60  ;;  %v11873_v60 = vld [vmem:[%s15674_s3 + $0x484] ss:$8 sps:$4 sm:$0xff]  }
 0x4d2   :  { %7858 = vmatpush1.bf16.msra.mxu1 %v11778_v45  ;;  %v11868_v45 = vld [vmem:[%s15674_s3 + $0x570] ss:$8 sps:$4 sm:$0xff]  }
 0x4d3   :  { %7859 = vmatprep.subr.bf16.mxu1 %v11786_v33  ;;  %v11876_v33 = vld [vmem:[%s15674_s3 + $0x584] ss:$8 sps:$4 sm:$0xff]  }
 0x4d4   :  { %7819 = vmatpush1.bf16.msra.mxu0 %v11781_v38  ;;  %v11871_v38 = vld [vmem:[%s15674_s3 + $0x480] ss:$8 sps:$4 sm:$0xff]  }
 0x4d5   :  { %7820 = vmatprep.subr.bf16.mxu0 %v11789_v41  ;;  %v11879_v41 = vld [vmem:[%s15674_s3 + $0x494] ss:$8 sps:$4 sm:$0xff]  }
 0x4d6   :  { %7860 = vmatpush1.bf16.msra.mxu1 %v11784_v34  ;;  %v11874_v34 = vld [vmem:[%s15674_s3 + $0x580] ss:$8 sps:$4 sm:$0xff]  }
 0x4d7   :  { %7861 = vmatprep.subr.bf16.mxu1 %v11792_v47  ;;  %v11882_v47 = vld [vmem:[%s15674_s3 + $0x594] ss:$8 sps:$4 sm:$0xff]  }
 0x4d8   :  { %7821 = vmatpush1.bf16.msra.mxu0 %v11787_v59  ;;  %v11877_v59 = vld [vmem:[%s15674_s3 + $0x490] ss:$8 sps:$4 sm:$0xff]  }
 0x4d9   :  { %7822 = vmatprep.subr.bf16.mxu0 %v11795_v11  ;;  %v11885_v11 = vld [vmem:[%s15674_s3 + $0x4a4] ss:$8 sps:$4 sm:$0xff]  }
 0x4da   :  { %7862 = vmatpush1.bf16.msra.mxu1 %v11790_v61  ;;  %v11880_v61 = vld [vmem:[%s15674_s3 + $0x590] ss:$8 sps:$4 sm:$0xff]  }
 0x4db   :  { %7863 = vmatprep.subr.bf16.mxu1 %v11798_v49  ;;  %v11888_v49 = vld [vmem:[%s15674_s3 + $0x5a4] ss:$8 sps:$4 sm:$0xff]  }
 0x4dc   :  { %7823 = vmatpush1.bf16.msra.mxu0 %v11793_v8  ;;  %v11883_v8 = vld [vmem:[%s15674_s3 + $0x4a0] ss:$8 sps:$4 sm:$0xff]  }
 0x4dd   :  { %7824 = vmatprep.subr.bf16.mxu0 %v11801_v55  ;;  %v11891_v55 = vld [vmem:[%s15674_s3 + $0x4b4] ss:$8 sps:$4 sm:$0xff]  }
 0x4de   :  { %7864 = vmatpush1.bf16.msra.mxu1 %v11796_v52  ;;  %v11886_v52 = vld [vmem:[%s15674_s3 + $0x5a0] ss:$8 sps:$4 sm:$0xff]  }
 0x4df   :  { %7865 = vmatprep.subr.bf16.mxu1 %v11804_v3  ;;  %v11894_v3 = vld [vmem:[%s15674_s3 + $0x5b4] ss:$8 sps:$4 sm:$0xff]  }
 0x4e0   :  { %7825 = vmatpush1.bf16.msra.mxu0 %v11799_v15  ;;  %v11889_v15 = vld [vmem:[%s15674_s3 + $0x4b0] ss:$8 sps:$4 sm:$0xff]  }
 0x4e1   :  { %7826 = vmatprep.subr.bf16.mxu0 %v11807_v44  ;;  %v11897_v44 = vld [vmem:[%s15674_s3 + $0x4c4] ss:$8 sps:$4 sm:$0xff]  }
 0x4e2   :  { %7866 = vmatpush1.bf16.msra.mxu1 %v11802_v4  ;;  %v11892_v4 = vld [vmem:[%s15674_s3 + $0x5b0] ss:$8 sps:$4 sm:$0xff]  }
 0x4e3   :  { %7867 = vmatprep.subr.bf16.mxu1 %v11810_v6  ;;  %v11900_v6 = vld [vmem:[%s15674_s3 + $0x5c4] ss:$8 sps:$4 sm:$0xff]  }
 0x4e4   :  { %7827 = vmatpush1.bf16.msra.mxu0 %v11805_v54  ;;  %v11895_v54 = vld [vmem:[%s15674_s3 + $0x4c0] ss:$8 sps:$4 sm:$0xff]  }
 0x4e5   :  { %7828 = vmatprep.subr.bf16.mxu0 %v11813_v32  ;;  %v11903_v32 = vld [vmem:[%s15674_s3 + $0x4d4] ss:$8 sps:$4 sm:$0xff]  }
 0x4e6   :  { %7868 = vmatpush1.bf16.msra.mxu1 %v11808_v29  ;;  %v11898_v29 = vld [vmem:[%s15674_s3 + $0x5c0] ss:$8 sps:$4 sm:$0xff]  }
 0x4e7   :  { %7869 = vmatprep.subr.bf16.mxu1 %v11816_v35  ;;  %v11906_v35 = vld [vmem:[%s15674_s3 + $0x5d4] ss:$8 sps:$4 sm:$0xff]  }
 0x4e8   :  { %7829 = vmatpush1.bf16.msra.mxu0 %v11811_v21  ;;  %v11901_v21 = vld [vmem:[%s15674_s3 + $0x4d0] ss:$8 sps:$4 sm:$0xff]  }
 0x4e9   :  { %8293 = vmatprep.subr.bf16.mxu0 %v11819_v50  ;;  %v11909_v50 = vld [vmem:[%s15674_s3 + $0x4e4] ss:$8 sps:$4 sm:$0xff]  }
 0x4ea   :  { %7870 = vmatpush1.bf16.msra.mxu1 %v11814_v13  ;;  %v11904_v13 = vld [vmem:[%s15674_s3 + $0x5d0] ss:$8 sps:$4 sm:$0xff]  }
 0x4eb   :  { %8334 = vmatprep.subr.bf16.mxu1 %v11822_v37  ;;  %7831 = vmatmul.mubr.bf16.vlgmr.msra.gmra.mrb[24].mxu0 %v10077_v30  ;;  %v11912_v37 = vld [vmem:[%s15674_s3 + $0x5e4] ss:$8 sps:$4 sm:$0xff]   ;;  %v11918_v30 = vld [vmem:[%s15674_s3 + $0x5f4] ss:$8 sps:$4 sm:$0xff]  }
 0x4ec   :  { %8294 = vmatpush1.bf16.msra.mxu0 %v11817_v16  ;;  %8325 = vmatprep.mubr.bf16.mxu0 %v7966_v48  ;;  %v11910_v16 = vld [vmem:[%s15674_s3 + $0x5e0] ss:$8 sps:$4 sm:$0xff]  }
 0x4ed   :  { %7872 = vmatmul.mubr.bf16.vlgmr.msra.gmra.mrb[24].mxu1 %v10079_v46  ;;  %8295 = vmatprep.subr.bf16.mxu0 %v11831_v53  ;;  %v11823_v46 = vld [vmem:[#allocation3] ss:$16 sps:$4 sm:$0x1e]   ;;  %v11826_v48 = vld [vmem:[#allocation3 + $0x8] ss:$16 sps:$4 sm:$0x1e]  }
 0x4ee   :  { %8335 = vmatpush1.bf16.msra.mxu1 %v11820_v43  ;;  %8366 = vmatprep.mubr.bf16.mxu1 %v7968_v56  ;;  %v11913_v43 = vld [vmem:[%s15674_s3 + $0x4f0] ss:$8 sps:$4 sm:$0xff]   ;;  %v7967_v56 = vrot.slane %v11826_v48, 1 }
 0x4ef   :  { %8336 = vmatprep.subr.bf16.mxu1 %v11834_v58  ;;  %v11916_v53 = vld [vmem:[%s15674_s3 + $0x5f0] ss:$8 sps:$4 sm:$0xff]   ;;  %v7965_v58 = vrot.slane %v11823_v46, 1 }
 0x4f0   :  { %8296 = vmatpush1.bf16.msra.mxu0 %v11829_v0  ;;  %v8429_v0 = vld [vmem:[%s15678_s7 + $0x80] sm:$0xff] }
 0x4f1   :  { %8297 = vmatprep.subr.bf16.mxu0 %v11837_v57  ;;  %v8413_v57 = vld [vmem:[%s15678_s7] sm:$0xff] }
 0x4f2   :  { %8337 = vmatpush1.bf16.msra.mxu1 %v11832_v36  ;;  %v8430_v36 = vld [vmem:[%s15678_s7 + $0x88] sm:$0xff] }
 0x4f3   :  { %8338 = vmatprep.subr.bf16.mxu1 %v11840_v62  ;;  %v10333_v62 = vpack.c.bf16 %v8430_v36, %v8429_v0 }
 0x4f4   :  { %8298 = vmatpush1.bf16.msra.mxu0 %v11835_v5  ;;  %v8414_v5 = vld [vmem:[%s15678_s7 + $0x8] sm:$0xff] }
 0x4f5   :  { %8299 = vmatprep.subr.bf16.mxu0 %v11843_v22  ;;  %v8432_v22 = vld [vmem:[%s15678_s7 + $0x98] sm:$0xff] }
 0x4f6   :  { %8339 = vmatpush1.bf16.msra.mxu1 %v11838_v63  ;;  %v8431_v63 = vld [vmem:[%s15678_s7 + $0x90] sm:$0xff] }
 0x4f7   :  { %8340 = vmatprep.subr.bf16.mxu1 %v11846_v14  ;;  %v10335_v14 = vpack.c.bf16 %v8414_v5, %v8413_v57 }
 0x4f8   :  { %8300 = vmatpush1.bf16.msra.mxu0 %v11841_v23  ;;  %v10337_v23 = vpack.c.bf16 %v8432_v22, %v8431_v63 }
 0x4f9   :  { %8301 = vmatprep.subr.bf16.mxu0 %v11849_v1  ;;  %v8416_v1 = vld [vmem:[%s15678_s7 + $0x18] sm:$0xff] }
 0x4fa   :  { %8341 = vmatpush1.bf16.msra.mxu1 %v11844_v2  ;;  %v8415_v2 = vld [vmem:[%s15678_s7 + $0x10] sm:$0xff] }
 0x4fb   :  { %8342 = vmatprep.subr.bf16.mxu1 %v11852_v7  ;;  %v8433_v7 = vld [vmem:[%s15678_s7 + $0xa0] sm:$0xff] }
 0x4fc   :  { %8302 = vmatpush1.bf16.msra.mxu0 %v11847_v51  ;;  %v8434_v51 = vld [vmem:[%s15678_s7 + $0xa8] sm:$0xff] }
 0x4fd   :  { %8303 = vmatprep.subr.bf16.mxu0 %v11855_v9  ;;  %v10341_v9 = vpack.c.bf16 %v8434_v51, %v8433_v7 }
 0x4fe   :  { %8343 = vmatpush1.bf16.msra.mxu1 %v11850_v27  ;;  %v10339_v27 = vpack.c.bf16 %v8416_v1, %v8415_v2 }
 0x4ff   :  { %8344 = vmatprep.subr.bf16.mxu1 %v11858_v18  ;;  %v8417_v18 = vld [vmem:[%s15678_s7 + $0x20] sm:$0xff] }
 0x500   :  { %8304 = vmatpush1.bf16.msra.mxu0 %v11853_v24  ;;  %v8418_v24 = vld [vmem:[%s15678_s7 + $0x28] sm:$0xff] }
 0x501   :  { %8305 = vmatprep.subr.bf16.mxu0 %v11861_v31  ;;  %v8436_v31 = vld [vmem:[%s15678_s7 + $0xb8] sm:$0xff] }
 0x502   :  { %8345 = vmatpush1.bf16.msra.mxu1 %v11856_v26  ;;  %v8435_v26 = vld [vmem:[%s15678_s7 + $0xb0] sm:$0xff] }
 0x503   :  { %8346 = vmatprep.subr.bf16.mxu1 %v11864_v20  ;;  %v10343_v20 = vpack.c.bf16 %v8418_v24, %v8417_v18 }
 0x504   :  { %8306 = vmatpush1.bf16.msra.mxu0 %v11859_v10  ;;  %v10345_v10 = vpack.c.bf16 %v8436_v31, %v8435_v26 }
 0x505   :  { %8307 = vmatprep.subr.bf16.mxu0 %v11867_v39  ;;  %v8420_v39 = vld [vmem:[%s15678_s7 + $0x38] sm:$0xff] }
 0x506   :  { %8347 = vmatpush1.bf16.msra.mxu1 %v11862_v28  ;;  %v8419_v28 = vld [vmem:[%s15678_s7 + $0x30] sm:$0xff] }
 0x507   :  { %8348 = vmatprep.subr.bf16.mxu1 %v11870_v42 }
 0x508   :  { %8308 = vmatpush1.bf16.msra.mxu0 %v11865_v17  ;;  %v10347_v17 = vpack.c.bf16 %v8420_v39, %v8419_v28 }
 0x509   :  { %8309 = vmatprep.subr.bf16.mxu0 %v11873_v60 }
 0x50a   :  { %8349 = vmatpush1.bf16.msra.mxu1 %v11868_v45 }
 0x50b   :  { %8350 = vmatprep.subr.bf16.mxu1 %v11876_v33 }
 0x50c   :  { %8310 = vmatpush1.bf16.msra.mxu0 %v11871_v38 }
 0x50d   :  { %8311 = vmatprep.subr.bf16.mxu0 %v11879_v41  ;;  %v8437_v41 = vld [vmem:[%s15678_s7 + $0xc0] sm:$0xff] }
 0x50e   :  { %8351 = vmatpush1.bf16.msra.mxu1 %v11874_v34 }
 0x50f   :  { %8352 = vmatprep.subr.bf16.mxu1 %v11882_v47  ;;  %v8438_v47 = vld [vmem:[%s15678_s7 + $0xc8] sm:$0xff] }
 0x510   :  { %8312 = vmatpush1.bf16.msra.mxu0 %v11877_v59 }
 0x511   :  { %8313 = vmatprep.subr.bf16.mxu0 %v11885_v11 }
 0x512   :  { %8353 = vmatpush1.bf16.msra.mxu1 %v11880_v61 }
 0x513   :  { %8354 = vmatprep.subr.bf16.mxu1 %v11888_v49  ;;  %v10349_v49 = vpack.c.bf16 %v8438_v47, %v8437_v41 }
 0x514   :  { %8314 = vmatpush1.bf16.msra.mxu0 %v11883_v8  ;;  %v8421_v8 = vld [vmem:[%s15678_s7 + $0x40] sm:$0xff] }
 0x515   :  { %8315 = vmatprep.subr.bf16.mxu0 %v11891_v55 }
 0x516   :  { %8355 = vmatpush1.bf16.msra.mxu1 %v11886_v52  ;;  %v8422_v52 = vld [vmem:[%s15678_s7 + $0x48] sm:$0xff] }
 0x517   :  { %8356 = vmatprep.subr.bf16.mxu1 %v11894_v3  ;;  %v10351_v3 = vpack.c.bf16 %v8422_v52, %v8421_v8 }
 0x518   :  { %8316 = vmatpush1.bf16.msra.mxu0 %v11889_v15  ;;  %v8439_v15 = vld [vmem:[%s15678_s7 + $0xd0] sm:$0xff] }
 0x519   :  { %8317 = vmatprep.subr.bf16.mxu0 %v11897_v44 }
 0x51a   :  { %8357 = vmatpush1.bf16.msra.mxu1 %v11892_v4  ;;  %v8440_v4 = vld [vmem:[%s15678_s7 + $0xd8] sm:$0xff] }
 0x51b   :  { %8358 = vmatprep.subr.bf16.mxu1 %v11900_v6  ;;  %v10353_v44 = vpack.c.bf16 %v8440_v4, %v8439_v15  ;;  %v8423_v6 = vld [vmem:[%s15678_s7 + $0x50] sm:$0xff] }
 0x51c   :  { %8318 = vmatpush1.bf16.msra.mxu0 %v11895_v54  ;;  %v8424_v54 = vld [vmem:[%s15678_s7 + $0x58] sm:$0xff] }
 0x51d   :  { %8319 = vmatprep.subr.bf16.mxu0 %v11903_v32  ;;  %v8441_v32 = vld [vmem:[%s15678_s7 + $0xe0] sm:$0xff] }
 0x51e   :  { %8359 = vmatpush1.bf16.msra.mxu1 %v11898_v29  ;;  %v10355_v29 = vpack.c.bf16 %v8424_v54, %v8423_v6 }
 0x51f   :  { %8360 = vmatprep.subr.bf16.mxu1 %v11906_v35  ;;  %v8442_v35 = vld [vmem:[%s15678_s7 + $0xe8] sm:$0xff] }
 0x520   :  { %8320 = vmatpush1.bf16.msra.mxu0 %v11901_v21  ;;  %v8425_v21 = vld [vmem:[%s15678_s7 + $0x60] sm:$0xff] }
 0x521   :  { %8321 = vmatprep.subr.bf16.mxu0 %v11909_v50  ;;  %v8426_v50 = vld [vmem:[%s15678_s7 + $0x68] sm:$0xff] }
 0x522   :  { %8361 = vmatpush1.bf16.msra.mxu1 %v11904_v13  ;;  %v10357_v13 = vpack.c.bf16 %v8442_v35, %v8441_v32 }
 0x523   :  { %8362 = vmatprep.subr.bf16.mxu1 %v11912_v37  ;;  %v8443_v37 = vld [vmem:[%s15678_s7 + $0xf0] sm:$0xff] }
 0x524   :  { %8322 = vmatpush1.bf16.msra.mxu0 %v11907_v40  ;;  %v8444_v40 = vld [vmem:[%s15678_s7 + $0xf8] sm:$0xff] }
 0x525   :  { %8323 = vmatprep.subr.bf16.mxu0 %v11915_v25  ;;  %v10361_v25 = vpack.c.bf16 %v8444_v40, %v8443_v37 }
 0x526   :  { %8363 = vmatpush1.bf16.msra.mxu1 %v11910_v16  ;;  %v10359_v16 = vpack.c.bf16 %v8426_v50, %v8425_v21 }
 0x527   :  { %8364 = vmatprep.subr.bf16.mxu1 %v11918_v30  ;;  %v8427_v30 = vld [vmem:[%s15678_s7 + $0x70] sm:$0xff] }
 0x528   :  { %8324 = vmatpush1.bf16.msra.mxu0 %v11913_v43  ;;  %v8428_v43 = vld [vmem:[%s15678_s7 + $0x78] sm:$0xff] }
 0x529   :  { %10334 = vmatprep.subr.bf16.mxu0 %v10333_v62  ;;  %v10363_v46 = vpack.c.bf16 %v8428_v43, %v8427_v30 }
 0x52a   :  { %8365 = vmatpush1.bf16.msra.mxu1 %v11916_v53 }
 0x52b   :  { %8326 = vmatmul.mubr.bf16.vlgmr.msra.gmra.mrb[28].mxu0 %v7965_v58 }
 0x52c   :  { %10336 = vmatpush3.bf16.msra.mxu0 %v10335_v14 }
 0x52d   :  { %8367 = vmatmul.mubr.bf16.vlgmr.msra.gmra.mrb[28].mxu1 %v7967_v56  ;;  %10338 = vmatprep.subr.bf16.mxu0 %v10337_v23  ;;  %v8377_v23 = vld [vmem:[%s15677_s6] sm:$0x3] }
 0x52e   :  { %v8386_v26 = vrot.slane %v8377_v23, %v12652_v19 }
 0x530   :  { %10340 = vmatpush3.bf16.msra.mxu0 %v10339_v27  ;;  %v8382_v27 = vrot.slane %v8377_v23, %v12644_v12 }
 0x531   :  { %10342 = vmatprep.subr.bf16.mxu0 %v10341_v9 }
 0x534   :  { %10344 = vmatpush3.bf16.msra.mxu0 %v10343_v20 }
 0x535   :  { %10346 = vmatprep.subr.bf16.mxu0 %v10345_v10 }
 0x538   :  { %10348 = vmatpush3.bf16.msra.mxu0 %v10347_v17 }
 0x539   :  { %10350 = vmatprep.subr.bf16.mxu0 %v10349_v49 }
 0x53c   :  { %10352 = vmatpush3.bf16.msra.mxu0 %v10351_v3  ;;  %v10277_v3 = vld [vmem:[%s15679_s8] ss:$0 sm:$0xff] }
 0x53d   :  { %10354 = vmatprep.subr.bf16.mxu0 %v10353_v44 }
 0x540   :  { %10356 = vmatpush3.bf16.msra.mxu0 %v10355_v29 }
 0x541   :  { %10358 = vmatprep.subr.bf16.mxu0 %v10357_v13 }
 0x544   :  { %10360 = vmatpush3.bf16.msra.mxu0 %v10359_v16 }
 0x545   :  { %10362 = vmatprep.subr.bf16.mxu0 %v10361_v25 }
 0x548   :  { %10364 = vmatpush3.bf16.msra.mxu0 %v10363_v46 }
 0x57e   :  { %v7416_v42 = vpop.f32.mrb[20].mxu0 }
 0x57f   :  { %v7418_v60 = vpop.f32.mrb[21].mxu0 }
 0x580   :  { %v7457_v45 = vpop.f32.mrb[20].mxu1  ;;  %v7420_v34 = vpop.f32.mrb[22].mxu0 }
 0x581   :  { %v7458_v33 = vadd.f32 %v7457_v45, %v7416_v42  ;;  %v7459_v38 = vpop.f32.mrb[21].mxu1  ;;  %v7421_v11 = vpop.f32.mrb[23].mxu0 }
 0x582   :  { %v7460_v59 = vadd.f32 %v7459_v38, %v7418_v60  ;;  %v7461_v61 = vpop.f32.mrb[22].mxu1 }
 0x583   :  { %v7462_v55 = vpop.f32.mrb[23].mxu1 }
 0x5be   :  { %v7832_v53 = vpop.f32.mrb[24].mxu0 }
 0x5bf   :  { %v7833_v48 = vadd.f32 %v7832_v53, %v7458_v33  ;;  %v7834_v56 = vpop.f32.mrb[25].mxu0 }
 0x5c0   :  { %v7873_v58 = vpop.f32.mrb[24].mxu1  ;;  %v7835_v0 = vadd.f32 %v7834_v56, %v7460_v59  ;;  %v7836_v57 = vpop.f32.mrb[26].mxu0 }
 0x5c1   :  { %v7875_v36 = vpop.f32.mrb[25].mxu1  ;;  %v7874_v62 = vadd.f32 %v7873_v58, %v7833_v48  ;;  %v7837_v63 = vpop.f32.mrb[27].mxu0 }
 0x5c2   :  { %v7877_v5 = vpop.f32.mrb[26].mxu1  ;;  %v7876_v22 = vadd.f32 %v7875_v36, %v7835_v0 }
 0x5c3   :  { %v7878_v14 = vpop.f32.mrb[27].mxu1 }
 0x5fe   :  { %v8327_v2 = vpop.f32.mrb[28].mxu0 }
 0x5ff   :  { %v8329_v7 = vpop.f32.mrb[29].mxu0 }
 0x600   :  { %v8368_v1 = vpop.f32.mrb[28].mxu1  ;;  %v8331_v18 = vpop.f32.mrb[30].mxu0 }
 0x601   :  { %v8369_v51 = vadd.f32 %v8368_v1, %v8327_v2  ;;  %v8370_v9 = vpop.f32.mrb[29].mxu1  ;;  %v8332_v20 = vpop.f32.mrb[31].mxu0 }
 0x602   :  { %v8371_v24 = vadd.f32 %v8370_v9, %v8329_v7  ;;  %v8372_v31 = vpop.f32.mrb[30].mxu1 }
 0x603   :  { %v8375_v10 = vadd.f32 %v8369_v51, %v7874_v62  ;;  %v8373_v28 = vpop.f32.mrb[31].mxu1 }
 0x604   :  { %v8376_v39 = vadd.f32 %v8371_v24, %v7876_v22 }
 0x605   :  { %v8389_v42 = vadd.f32 %v8382_v27, %v8375_v10 }
 0x606   :  { %v8390_v17 = vadd.f32 %v8386_v26, %v8376_v39 }
 0x607   :  { %v8391_v45 = vmax.f32 %v8389_v42, 0.0 }
 0x608   :  { %v8392_v60 = vmax.f32 %v8390_v17, 0.0 }
 0x609   :  { %v8395_v33 = vrot.slane %v8391_v45, 2  ;;  %v8401_v41 = vrot.slane %v8391_v45, 4  ;;  %v8407_v49 = vrot.slane %v8391_v45, 6 }
 0x60a   :  { %v8396_v38 = vrot.slane %v8392_v60, 2  ;;  %v8402_v12 = vrot.slane %v8392_v60, 4  ;;  %v8408_v11 = vrot.slane %v8392_v60, 6 }
 0x60b   :  { %v8399_v34 = vadd.f32 %v8395_v33, %v8391_v45 }
 0x60c   :  { %v8400_v47 = vadd.f32 %v8396_v38, %v8392_v60 }
 0x60d   :  { %v8405_v59 = vadd.f32 %v8401_v41, %v8399_v34 }
 0x60e   :  { %v8406_v61 = vadd.f32 %v8402_v12, %v8400_v47 }
 0x60f   :  { %v8411_v8 = vadd.f32 %v8407_v49, %v8405_v59 }
 0x610   :  { %v8412_v19 = vadd.f32 %v8408_v11, %v8406_v61 }
 0x612   :  { %8516 = vmatprep.mubr.f32.mxu0 %v8412_v19 }
 0x613   :  { %8517 = vmatmul.mubr.f32.vlgmr.msra.gmra.mrb[32].mxu0 %v8411_v8 }
 0x6e6   :  { %v10330_v52 = vpop.f32.mrb[32].mxu0 }
 0x6e7   :  { %v10331_v55 = vpop.f32.mrb[33].mxu0 }
 0x6e8   :  { %v10332_v15 = vadd.f32 %v10331_v55, %v10330_v52 }
 0x6ea   :  { %v8519_v4 = vadd.f32 %v10332_v15, %v10277_v3 }
 0x6ec   :  { %8522 = vst [vmem:[#allocation4] sm:$0x3] %v8519_v4 }
 0x6ed   :  { %11940 = shalt.err (!%p11937_p4)
}
 0x6ee   :  { %s11941_s1 = scalar_lea.hbm %s15680_s9, 32 }
 0x6ef   :  { %p11942_p5 = scmp.ne.s32.totalorder %s15680_s9, %s11941_s1  ;;  %p11945_p6 = scmp.lt.u32.totalorder %s11941_s1, %s15680_s9 }
 0x6f1   :  { %p11947_p7 = pnand %p11945_p6, %p11942_p5 }
 0x6f3   :  { %11950 = shalt.err (!%p11947_p7)
}
 0x6f4   :  { %8532 = dma.vmem_to_hbm [thread:$0]  %s8530_s15, 32, %s15680_s9, [#allocation5]  }
 0x6f5   :  { %11951 = dma.done.wait [#allocation5], 32  }
 0x6f6   :  { %11952 = vsyncadd [#allocation5], 4294967264 }
 0x6f7   :  { %8536 = vsyncpa [#allocation5], 1 }

</bundles_post_ra>
